<compile_context>
chip_gen: v7x
topology: tpu7x:2x2x1
jax: 0.10.0
libtpu: 0.0.40
codegen_flags: <defaults>
</compile_context>

<pallas_src>
import functools

import jax
import jax.numpy as jnp
from jax import lax
from jax.experimental import pallas as pl
from jax.experimental.pallas import tpu as pltpu


def _pick_tile(n, cap, quantum=8):
    """Largest divisor of n <= cap that is a multiple of `quantum` (or n)."""
    for d in range(min(n, cap), 0, -1):
        if n % d == 0 and (d % quantum == 0 or d == n):
            return d
    return n


def _vmem_limit_bytes():
    """Generation-aware scoped-VMEM budget (v7x: 64 MiB phys, v5e/v6e: 128)."""
    try:
        cap = pltpu.get_tpu_info().vmem_capacity_bytes
    except Exception:
        cap = 128 * 1024 * 1024
    return int(min(max(cap // 2, 32 * 1024 * 1024), 100 * 1024 * 1024))


# ---------------------------------------------------------------------------
# Pass A: 3x3 conv on the MXU + per-step partial BN statistics.
#   bn_relu_input : fuse relu(x*scale + shift) onto the loaded padded tile
#                   (used for conv2; removes the y1 HBM round trip).
#   pad_output    : write the conv in padded spatial layout (feeds next conv)
#                   instead of flat (M, Cout) rows (feeds pass B).
# ---------------------------------------------------------------------------
def _conv3x3_kernel(*refs, H, W, bn_relu_input, pad_output):
    if bn_relu_input:
        x_ref, scale_ref, shift_ref, w_ref, out_ref, psum_ref, psq_ref = refs
    else:
        x_ref, w_ref, out_ref, psum_ref, psq_ref = refs
    Hp2, Wp2, cin = x_ref.shape
    cout = psum_ref.shape[-1]

    xpad = x_ref[...]                                   # (Hp2, Wp2, Cin) bf16
    if bn_relu_input:
        # Fused BN1 + ReLU; the spatial zero border must stay exactly zero.
        ri = lax.broadcasted_iota(jnp.int32, (Hp2, Wp2, cin), 0)
        ci = lax.broadcasted_iota(jnp.int32, (Hp2, Wp2, cin), 1)
        inside = (ri >= 1) & (ri <= H) & (ci >= 1) & (ci <= W)
        y = jnp.maximum(
            xpad.astype(jnp.float32) * scale_ref[...] + shift_ref[...], 0.0)
        xpad = jnp.where(inside, y, 0.0).astype(jnp.bfloat16)

    # All 9 taps are formed in VMEM from the single padded tile (the previous
    # version's 3x kh-packed HBM slab is gone).  bf16 MXU, f32 accumulation.
    acc = jnp.zeros((H * W, cout), jnp.float32)
    for kh in range(3):
        for kw in range(3):
            lhs = xpad[kh:kh + H, kw:kw + W, :].reshape(H * W, cin)
            acc = acc + jnp.dot(lhs, w_ref[kh * 3 + kw],
                                preferred_element_type=jnp.float32)
    # NOTE: the conv bias is intentionally not added; BN cancels it exactly.

    if pad_output:
        out_ref[...] = jnp.zeros_like(out_ref)
        out_ref[1:H + 1, 1:W + 1, :] = (
            acc.reshape(H, W, cout).astype(out_ref.dtype))
    else:
        out_ref[...] = acc.astype(out_ref.dtype)

    # Partial BN statistics, accumulated in f32 *before* the bf16 store.
    # Distinct output blocks per grid step keep the axis "parallel" (v7x).
    psum_ref[...] = jnp.broadcast_to(
        jnp.sum(acc, axis=0, keepdims=True), psum_ref.shape)
    psq_ref[...] = jnp.broadcast_to(
        jnp.sum(acc * acc, axis=0, keepdims=True), psq_ref.shape)


def _conv3x3_stats(xpad, w_taps, *, N, H, W, scale=None, shift=None,
                   pad_output, vmem_limit):
    """xpad: (N*(H+2), W+2, Cin) bf16 padded tiles; w_taps: (9, Cin, Cout)."""
    Hp2, Wp2 = H + 2, W + 2
    cin = xpad.shape[-1]
    cout = w_taps.shape[-1]
    M = N * H * W
    bn_relu_input = scale is not None

    if pad_output:
        conv_shape = (N * Hp2, Wp2, cout)
        conv_spec = pl.BlockSpec((Hp2, Wp2, cout), lambda n: (n, 0, 0))
    else:
        # Requires H*W % 8 == 0 (true for the usual even feature-map sizes).
        conv_shape = (M, cout)
        conv_spec = pl.BlockSpec((H * W, cout), lambda n: (n, 0))

    in_specs = [pl.BlockSpec((Hp2, Wp2, cin), lambda n: (n, 0, 0))]
    inputs = [xpad]
    if bn_relu_input:
        in_specs += [pl.BlockSpec((1, cin), lambda n: (0, 0)),
                     pl.BlockSpec((1, cin), lambda n: (0, 0))]
        inputs += [scale.reshape(1, -1).astype(jnp.float32),
                   shift.reshape(1, -1).astype(jnp.float32)]
    # Weights stay VMEM-resident across the whole grid (constant index map).
    in_specs.append(pl.BlockSpec((9, cin, cout), lambda n: (0, 0, 0)))
    inputs.append(w_taps)

    kernel = functools.partial(_conv3x3_kernel, H=H, W=W,
                               bn_relu_input=bn_relu_input,
                               pad_output=pad_output)
    conv, psum, psq = pl.pallas_call(
        kernel,
        out_shape=(jax.ShapeDtypeStruct(conv_shape, jnp.bfloat16),
                   jax.ShapeDtypeStruct((N * 8, cout), jnp.float32),
                   jax.ShapeDtypeStruct((N * 8, cout), jnp.float32)),
        grid=(N,),
        in_specs=in_specs,
        out_specs=(conv_spec,
                   pl.BlockSpec((8, cout), lambda n: (n, 0)),
                   pl.BlockSpec((8, cout), lambda n: (n, 0))),
        compiler_params=pltpu.CompilerParams(
            dimension_semantics=("parallel",),       # megacore-shardable
            vmem_limit_bytes=vmem_limit),
    )(*inputs)
    return conv, psum, psq


def _bn_affine(psum, psq, gamma, beta, m, eps):
    """Fold per-step partial stats into per-channel (scale, shift), f32."""
    s = psum.reshape(-1, 8, psum.shape[-1])[:, 0, :].sum(axis=0)
    sq = psq.reshape(-1, 8, psq.shape[-1])[:, 0, :].sum(axis=0)
    mean = s / m
    var = jnp.maximum(sq / m - mean * mean, 0.0)        # clamp (review concern)
    scale = gamma.astype(jnp.float32) * lax.rsqrt(var + eps)
    shift = beta.astype(jnp.float32) - mean * scale
    return scale, shift


# ---------------------------------------------------------------------------
# Pass B: BN2-normalize (+ residual) + ReLU on a lane-dense folded view.
# residual_mode: 0 = none, 1 = identity residual, 2 = 1x1-conv residual
# ---------------------------------------------------------------------------
def _bn_residual_relu_kernel(conv_ref, scale_ref, shift_ref, *rest,
                             residual_mode):
    if residual_mode == 2:
        res_ref, w3_ref, b3_ref, out_ref = rest
    elif residual_mode == 1:
        res_ref, out_ref = rest
    else:
        (out_ref,) = rest

    y = conv_ref[...].astype(jnp.float32) * scale_ref[...] + shift_ref[...]
    if residual_mode == 1:
        y = y + res_ref[...].astype(jnp.float32)
    elif residual_mode == 2:
        y = y + (jnp.dot(res_ref[...], w3_ref[...],
                         preferred_element_type=jnp.float32) + b3_ref[...])
    out_ref[...] = jnp.maximum(y, 0.0).astype(out_ref.dtype)


def _bn_residual_relu(conv_flat, scale, shift, *, residual=None, w3=None,
                      b3=None, out_dtype=jnp.float32, vmem_limit=None):
    M, cout = conv_flat.shape
    # Fold r spatial rows into the lane axis so this bandwidth-bound pass
    # uses 128-lane-dense loads/stores even when Cout < 128 (review item),
    # with no HBM traffic inflation (the fold is a free row-major reshape).
    r = 1
    if cout < 128 and 128 % cout == 0 and M % (128 // cout) == 0:
        r = 128 // cout
    Mf, width = M // r, r * cout
    conv_f = conv_flat.reshape(Mf, width)
    scale_t = jnp.tile(scale.reshape(1, cout), (1, r)).astype(jnp.float32)
    shift_t = jnp.tile(shift.reshape(1, cout), (1, r)).astype(jnp.float32)

    TM = _pick_tile(Mf, 2048)                           # big mem-bound tiles
    grid = (Mf // TM,)

    def row_spec(w):
        return pl.BlockSpec((TM, w), lambda i: (i, 0))

    def const_spec(w):
        return pl.BlockSpec((1, w), lambda i: (0, 0))

    in_specs = [row_spec(width), const_spec(width), const_spec(width)]
    inputs = [conv_f, scale_t, shift_t]
    if residual is None:
        mode = 0
    elif w3 is None:
        mode = 1
        cin = residual.shape[-1]
        in_specs.append(row_spec(r * cin))
        inputs.append(residual.reshape(Mf, r * cin).astype(jnp.float32))
    else:
        mode = 2
        cin = residual.shape[-1]
        # Block-diagonal 1x1-conv weight acts directly on the folded layout.
        w3_bd = jnp.kron(jnp.eye(r, dtype=w3.dtype), w3).astype(jnp.bfloat16)
        b3_t = jnp.tile(b3.reshape(1, cout), (1, r)).astype(jnp.float32)
        in_specs += [row_spec(r * cin),
                     pl.BlockSpec((r * cin, width), lambda i: (0, 0)),
                     const_spec(width)]
        inputs += [residual.reshape(Mf, r * cin).astype(jnp.bfloat16),
                   w3_bd, b3_t]

    kernel = functools.partial(_bn_residual_relu_kernel, residual_mode=mode)
    out = pl.pallas_call(
        kernel,
        out_shape=jax.ShapeDtypeStruct((Mf, width), out_dtype),
        grid=grid,
        in_specs=in_specs,
        out_specs=row_spec(width),
        compiler_params=pltpu.CompilerParams(
            dimension_semantics=("parallel",),
            vmem_limit_bytes=vmem_limit),
    )(*inputs)
    return out.reshape(M, cout)


# ---------------------------------------------------------------------------
# Wrapper glue (layout conversion only).
# ---------------------------------------------------------------------------
def _w_to_taps(w_oihw):
    """(Cout, Cin, 3, 3) -> (9, Cin, Cout) bf16; index = kh*3 + kw."""
    cout, cin = w_oihw.shape[0], w_oihw.shape[1]
    w = jnp.transpose(w_oihw, (2, 3, 1, 0))             # (KH, KW, Cin, Cout)
    return w.reshape(9, cin, cout).astype(jnp.bfloat16)


def residual_block_forward(x_nchw, params, use_1x1conv, strides=1, eps=1e-5):
    """Pallas implementation of ResidualBlock.forward. Input/output: NCHW."""
    if strides != 1:
        # TODO(synk): strides > 1 (downsampling blocks) not implemented.
        raise NotImplementedError("strides > 1 not implemented")
    N, Cin, H, W = x_nchw.shape
    Cout = params["w1"].shape[0]
    M = N * H * W
    vmem = _vmem_limit_bytes()

    x_nhwc = jnp.transpose(x_nchw, (0, 2, 3, 1)).astype(jnp.float32)
    xpad = jnp.pad(x_nhwc, ((0, 0), (1, 1), (1, 1), (0, 0)))
    xpad = xpad.reshape(N * (H + 2), W + 2, Cin).astype(jnp.bfloat16)

    # --- conv1 (raw, bias dropped): output written in the padded spatial
    #     layout conv2 consumes, plus partial BN1 stats. -----------------
    conv1, ps1, pq1 = _conv3x3_stats(xpad, _w_to_taps(params["w1"]),
                                     N=N, H=H, W=W, pad_output=True,
                                     vmem_limit=vmem)
    scale1, shift1 = _bn_affine(ps1, pq1, params["g1"], params["beta1"], M, eps)

    # --- conv2 with BN1+ReLU fused into its input path (no y1 round trip). --
    conv2, ps2, pq2 = _conv3x3_stats(conv1, _w_to_taps(params["w2"]),
                                     N=N, H=H, W=W, scale=scale1, shift=shift1,
                                     pad_output=False, vmem_limit=vmem)
    scale2, shift2 = _bn_affine(ps2, pq2, params["g2"], params["beta2"], M, eps)

    # --- BN2 + residual + ReLU (lane-dense folded pass B). ------------------
    x_flat = x_nhwc.reshape(M, Cin)
    if use_1x1conv:
        w3 = jnp.transpose(params["w3"][:, :, 0, 0], (1, 0))   # (Cin, Cout)
        out_flat = _bn_residual_relu(conv2, scale2, shift2, residual=x_flat,
                                     w3=w3, b3=params["b3"], vmem_limit=vmem)
    else:
        if Cin != Cout:
            raise ValueError("identity residual requires Cin == Cout")
        out_flat = _bn_residual_relu(conv2, scale2, shift2, residual=x_flat,
                                     vmem_limit=vmem)

    return jnp.transpose(out_flat.reshape(N, H, W, Cout), (0, 3, 1, 2))


# ---------------------------------------------------------------------------
# Pure-JAX reference (mirrors the PyTorch forward, NCHW, training-mode BN).
# conv_dtype=bf16 approximates the kernel's matmul precision.
# ---------------------------------------------------------------------------
def reference_forward(x_nchw, p, use_1x1conv, eps=1e-5, conv_dtype=jnp.float32):
    def conv(x, w, b, pad=1):
        y = jax.lax.conv_general_dilated(
            x.astype(conv_dtype), w.astype(conv_dtype),
            window_strides=(1, 1), padding=[(pad, pad), (pad, pad)],
            dimension_numbers=("NCHW", "OIHW", "NCHW"),
            preferred_element_type=jnp.float32)
        return y + b[None, :, None, None]

    def bn(y, g, be):
        m = jnp.mean(y, axis=(0, 2, 3), keepdims=True)
        v = jnp.mean((y - m) ** 2, axis=(0, 2, 3), keepdims=True)
        return ((y - m) * jax.lax.rsqrt(v + eps) * g[None, :, None, None]
                + be[None, :, None, None])

    Y = jax.nn.relu(bn(conv(x_nchw, p["w1"], p["b1"]), p["g1"], p["beta1"]))
    Y = bn(conv(Y, p["w2"], p["b2"]), p["g2"], p["beta2"])
    X = x_nchw
    if use_1x1conv:
        X = conv(x_nchw, p["w3"], p["b3"], pad=0)
    return jax.nn.relu(Y + X)


# ---------------------------------------------------------------------------
def _make_params(key, cin, cout, use_1x1conv):
    ks = jax.random.split(key, 8)
    p = {
        "w1": 0.1 * jax.random.normal(ks[0], (cout, cin, 3, 3), jnp.float32),
        "b1": 0.1 * jax.random.normal(ks[1], (cout,), jnp.float32),
        "w2": 0.1 * jax.random.normal(ks[2], (cout, cout, 3, 3), jnp.float32),
        "b2": 0.1 * jax.random.normal(ks[3], (cout,), jnp.float32),
        "g1": 1.0 + 0.1 * jax.random.normal(ks[4], (cout,), jnp.float32),
        "beta1": 0.1 * jax.random.normal(ks[5], (cout,), jnp.float32),
        "g2": 1.0 + 0.1 * jax.random.normal(ks[6], (cout,), jnp.float32),
        "beta2": 0.1 * jax.random.normal(ks[7], (cout,), jnp.float32),
    }
    if use_1x1conv:
        k3a, k3b = jax.random.split(jax.random.fold_in(key, 99))
        p["w3"] = 0.1 * jax.random.normal(k3a, (cout, cin, 1, 1), jnp.float32)
        p["b3"] = 0.1 * jax.random.normal(k3b, (cout,), jnp.float32)
    return p


def _check(out, x, p, use_1x1conv, expected_shape):
    assert out.shape == expected_shape, out.shape
    ref_bf16 = reference_forward(x, p, use_1x1conv, conv_dtype=jnp.bfloat16)
    ref_f32 = reference_forward(x, p, use_1x1conv, conv_dtype=jnp.float32)
    max_err = float(jnp.max(jnp.abs(out - ref_bf16)))
    assert max_err < 8e-2, max_err                 # matched-precision check
    rel = float(jnp.linalg.norm(out - ref_f32) / jnp.linalg.norm(ref_f32))
    assert rel < 4e-2, rel                         # sanity vs full-f32 ref


if __name__ == "__main__":
    key = jax.random.PRNGKey(0)
    N, H, W = 2, 16, 16
    kx1, kp1, kx2, kp2 = jax.random.split(key, 4)

    fwd_proj = jax.jit(lambda x, p: residual_block_forward(x, p, True))
    fwd_id = jax.jit(lambda x, p: residual_block_forward(x, p, False))

    # Case 1: use_1x1conv=True, channel change 16 -> 32
    x1 = jax.random.normal(kx1, (N, 16, H, W), jnp.float32)
    p1 = _make_params(kp1, 16, 32, use_1x1conv=True)
    out1 = jax.block_until_ready(fwd_proj(x1, p1))
    _check(out1, x1, p1, True, (N, 32, H, W))

    # Case 2: use_1x1conv=False, identity residual, 32 -> 32
    x2 = jax.random.normal(kx2, (N, 32, H, W), jnp.float32)
    p2 = _make_params(kp2, 32, 32, use_1x1conv=False)
    out2 = jax.block_until_ready(fwd_id(x2, p2))
    _check(out2, x2, p2, False, (N, 32, H, W))

    print("KERNEL_OK")
</pallas_src>

<mosaic_0001>
module attributes {stable_mosaic.version = 11 : i64} {
  func.func @_conv3x3_kernel(%arg0: i32, %arg1: memref<18x18x16xbf16, #tpu.memory_space<vmem>>, %arg2: memref<9x16x32xbf16, #tpu.memory_space<vmem>>, %arg3: memref<18x18x32xbf16, #tpu.memory_space<vmem>>, %arg4: memref<8x32xf32, #tpu.memory_space<vmem>>, %arg5: memref<8x32xf32, #tpu.memory_space<vmem>>) attributes {dimension_semantics = [#tpu.dimension_semantics<parallel>], iteration_bounds = array<i64: 2>, scalar_prefetch = 0 : i64, scratch_operands = 0 : i64, tpu.core_type = #tpu.core_type<tc>, window_params = [{transform_indices = @transform_0, window_bounds = array<i64: 18, 18, 16>}, {pipeline_mode = #tpu.pipeline_mode<synchronous>, transform_indices = @transform_1, window_bounds = array<i64: 9, 16, 32>}, {transform_indices = @transform_2, window_bounds = array<i64: 18, 18, 32>}, {transform_indices = @transform_3, window_bounds = array<i64: 8, 32>}, {transform_indices = @transform_4, window_bounds = array<i64: 8, 32>}]} {
    %c0 = arith.constant 0 : index
    %c0_0 = arith.constant 0 : index
    %c0_1 = arith.constant 0 : index
    %0 = vector.load %arg1[%c0, %c0_0, %c0_1] : memref<18x18x16xbf16, #tpu.memory_space<vmem>>, vector<18x18x16xbf16>
    %cst = arith.constant 0.000000e+00 : f32
    %1 = vector.broadcast %cst : f32 to vector<256x32xf32>
    %2 = vector.extract_strided_slice %0 {offsets = [0, 0, 0], sizes = [16, 16, 16], strides = [1, 1, 1]} : vector<18x18x16xbf16> to vector<16x16x16xbf16>
    %3 = vector.shape_cast %2 : vector<16x16x16xbf16> to vector<256x16xbf16>
    %c0_2 = arith.constant 0 : index
    %c0_3 = arith.constant 0 : index
    %c0_4 = arith.constant 0 : index
    %4 = vector.load %arg2[%c0_2, %c0_3, %c0_4] : memref<9x16x32xbf16, #tpu.memory_space<vmem>>, vector<1x16x32xbf16>
    %5 = vector.shape_cast %4 : vector<1x16x32xbf16> to vector<16x32xbf16>
    %cst_5 = arith.constant dense<0.000000e+00> : vector<256x32xf32>
    %6 = tpu.matmul %3, %5, %cst_5 {dimension_numbers = #tpu.dot_dimension_numbers<[1], [0], [0], [1], [0, 0, 1, 1], [], []>} : vector<256x16xbf16>, vector<16x32xbf16>, vector<256x32xf32> -> vector<256x32xf32>
    %7 = arith.addf %1, %6 : vector<256x32xf32>
    %8 = vector.extract_strided_slice %0 {offsets = [0, 1, 0], sizes = [16, 16, 16], strides = [1, 1, 1]} : vector<18x18x16xbf16> to vector<16x16x16xbf16>
    %9 = vector.shape_cast %8 : vector<16x16x16xbf16> to vector<256x16xbf16>
    %c1 = arith.constant 1 : index
    %c0_6 = arith.constant 0 : index
    %c0_7 = arith.constant 0 : index
    %10 = vector.load %arg2[%c1, %c0_6, %c0_7] : memref<9x16x32xbf16, #tpu.memory_space<vmem>>, vector<1x16x32xbf16>
    %11 = vector.shape_cast %10 : vector<1x16x32xbf16> to vector<16x32xbf16>
    %cst_8 = arith.constant dense<0.000000e+00> : vector<256x32xf32>
    %12 = tpu.matmul %9, %11, %cst_8 {dimension_numbers = #tpu.dot_dimension_numbers<[1], [0], [0], [1], [0, 0, 1, 1], [], []>} : vector<256x16xbf16>, vector<16x32xbf16>, vector<256x32xf32> -> vector<256x32xf32>
    %13 = arith.addf %7, %12 : vector<256x32xf32>
    %14 = vector.extract_strided_slice %0 {offsets = [0, 2, 0], sizes = [16, 16, 16], strides = [1, 1, 1]} : vector<18x18x16xbf16> to vector<16x16x16xbf16>
    %15 = vector.shape_cast %14 : vector<16x16x16xbf16> to vector<256x16xbf16>
    %c2 = arith.constant 2 : index
    %c0_9 = arith.constant 0 : index
    %c0_10 = arith.constant 0 : index
    %16 = vector.load %arg2[%c2, %c0_9, %c0_10] : memref<9x16x32xbf16, #tpu.memory_space<vmem>>, vector<1x16x32xbf16>
    %17 = vector.shape_cast %16 : vector<1x16x32xbf16> to vector<16x32xbf16>
    %cst_11 = arith.constant dense<0.000000e+00> : vector<256x32xf32>
    %18 = tpu.matmul %15, %17, %cst_11 {dimension_numbers = #tpu.dot_dimension_numbers<[1], [0], [0], [1], [0, 0, 1, 1], [], []>} : vector<256x16xbf16>, vector<16x32xbf16>, vector<256x32xf32> -> vector<256x32xf32>
    %19 = arith.addf %13, %18 : vector<256x32xf32>
    %20 = vector.extract_strided_slice %0 {offsets = [1, 0, 0], sizes = [16, 16, 16], strides = [1, 1, 1]} : vector<18x18x16xbf16> to vector<16x16x16xbf16>
    %21 = vector.shape_cast %20 : vector<16x16x16xbf16> to vector<256x16xbf16>
    %c3 = arith.constant 3 : index
    %c0_12 = arith.constant 0 : index
    %c0_13 = arith.constant 0 : index
    %22 = vector.load %arg2[%c3, %c0_12, %c0_13] : memref<9x16x32xbf16, #tpu.memory_space<vmem>>, vector<1x16x32xbf16>
    %23 = vector.shape_cast %22 : vector<1x16x32xbf16> to vector<16x32xbf16>
    %cst_14 = arith.constant dense<0.000000e+00> : vector<256x32xf32>
    %24 = tpu.matmul %21, %23, %cst_14 {dimension_numbers = #tpu.dot_dimension_numbers<[1], [0], [0], [1], [0, 0, 1, 1], [], []>} : vector<256x16xbf16>, vector<16x32xbf16>, vector<256x32xf32> -> vector<256x32xf32>
    %25 = arith.addf %19, %24 : vector<256x32xf32>
    %26 = vector.extract_strided_slice %0 {offsets = [1, 1, 0], sizes = [16, 16, 16], strides = [1, 1, 1]} : vector<18x18x16xbf16> to vector<16x16x16xbf16>
    %27 = vector.shape_cast %26 : vector<16x16x16xbf16> to vector<256x16xbf16>
    %c4 = arith.constant 4 : index
    %c0_15 = arith.constant 0 : index
    %c0_16 = arith.constant 0 : index
    %28 = vector.load %arg2[%c4, %c0_15, %c0_16] : memref<9x16x32xbf16, #tpu.memory_space<vmem>>, vector<1x16x32xbf16>
    %29 = vector.shape_cast %28 : vector<1x16x32xbf16> to vector<16x32xbf16>
    %cst_17 = arith.constant dense<0.000000e+00> : vector<256x32xf32>
    %30 = tpu.matmul %27, %29, %cst_17 {dimension_numbers = #tpu.dot_dimension_numbers<[1], [0], [0], [1], [0, 0, 1, 1], [], []>} : vector<256x16xbf16>, vector<16x32xbf16>, vector<256x32xf32> -> vector<256x32xf32>
    %31 = arith.addf %25, %30 : vector<256x32xf32>
    %32 = vector.extract_strided_slice %0 {offsets = [1, 2, 0], sizes = [16, 16, 16], strides = [1, 1, 1]} : vector<18x18x16xbf16> to vector<16x16x16xbf16>
    %33 = vector.shape_cast %32 : vector<16x16x16xbf16> to vector<256x16xbf16>
    %c5 = arith.constant 5 : index
    %c0_18 = arith.constant 0 : index
    %c0_19 = arith.constant 0 : index
    %34 = vector.load %arg2[%c5, %c0_18, %c0_19] : memref<9x16x32xbf16, #tpu.memory_space<vmem>>, vector<1x16x32xbf16>
    %35 = vector.shape_cast %34 : vector<1x16x32xbf16> to vector<16x32xbf16>
    %cst_20 = arith.constant dense<0.000000e+00> : vector<256x32xf32>
    %36 = tpu.matmul %33, %35, %cst_20 {dimension_numbers = #tpu.dot_dimension_numbers<[1], [0], [0], [1], [0, 0, 1, 1], [], []>} : vector<256x16xbf16>, vector<16x32xbf16>, vector<256x32xf32> -> vector<256x32xf32>
    %37 = arith.addf %31, %36 : vector<256x32xf32>
    %38 = vector.extract_strided_slice %0 {offsets = [2, 0, 0], sizes = [16, 16, 16], strides = [1, 1, 1]} : vector<18x18x16xbf16> to vector<16x16x16xbf16>
    %39 = vector.shape_cast %38 : vector<16x16x16xbf16> to vector<256x16xbf16>
    %c6 = arith.constant 6 : index
    %c0_21 = arith.constant 0 : index
    %c0_22 = arith.constant 0 : index
    %40 = vector.load %arg2[%c6, %c0_21, %c0_22] : memref<9x16x32xbf16, #tpu.memory_space<vmem>>, vector<1x16x32xbf16>
    %41 = vector.shape_cast %40 : vector<1x16x32xbf16> to vector<16x32xbf16>
    %cst_23 = arith.constant dense<0.000000e+00> : vector<256x32xf32>
    %42 = tpu.matmul %39, %41, %cst_23 {dimension_numbers = #tpu.dot_dimension_numbers<[1], [0], [0], [1], [0, 0, 1, 1], [], []>} : vector<256x16xbf16>, vector<16x32xbf16>, vector<256x32xf32> -> vector<256x32xf32>
    %43 = arith.addf %37, %42 : vector<256x32xf32>
    %44 = vector.extract_strided_slice %0 {offsets = [2, 1, 0], sizes = [16, 16, 16], strides = [1, 1, 1]} : vector<18x18x16xbf16> to vector<16x16x16xbf16>
    %45 = vector.shape_cast %44 : vector<16x16x16xbf16> to vector<256x16xbf16>
    %c7 = arith.constant 7 : index
    %c0_24 = arith.constant 0 : index
    %c0_25 = arith.constant 0 : index
    %46 = vector.load %arg2[%c7, %c0_24, %c0_25] : memref<9x16x32xbf16, #tpu.memory_space<vmem>>, vector<1x16x32xbf16>
    %47 = vector.shape_cast %46 : vector<1x16x32xbf16> to vector<16x32xbf16>
    %cst_26 = arith.constant dense<0.000000e+00> : vector<256x32xf32>
    %48 = tpu.matmul %45, %47, %cst_26 {dimension_numbers = #tpu.dot_dimension_numbers<[1], [0], [0], [1], [0, 0, 1, 1], [], []>} : vector<256x16xbf16>, vector<16x32xbf16>, vector<256x32xf32> -> vector<256x32xf32>
    %49 = arith.addf %43, %48 : vector<256x32xf32>
    %50 = vector.extract_strided_slice %0 {offsets = [2, 2, 0], sizes = [16, 16, 16], strides = [1, 1, 1]} : vector<18x18x16xbf16> to vector<16x16x16xbf16>
    %51 = vector.shape_cast %50 : vector<16x16x16xbf16> to vector<256x16xbf16>
    %c8 = arith.constant 8 : index
    %c0_27 = arith.constant 0 : index
    %c0_28 = arith.constant 0 : index
    %52 = vector.load %arg2[%c8, %c0_27, %c0_28] : memref<9x16x32xbf16, #tpu.memory_space<vmem>>, vector<1x16x32xbf16>
    %53 = vector.shape_cast %52 : vector<1x16x32xbf16> to vector<16x32xbf16>
    %cst_29 = arith.constant dense<0.000000e+00> : vector<256x32xf32>
    %54 = tpu.matmul %51, %53, %cst_29 {dimension_numbers = #tpu.dot_dimension_numbers<[1], [0], [0], [1], [0, 0, 1, 1], [], []>} : vector<256x16xbf16>, vector<16x32xbf16>, vector<256x32xf32> -> vector<256x32xf32>
    %55 = arith.addf %49, %54 : vector<256x32xf32>
    %cst_30 = arith.constant 0.000000e+00 : bf16
    %56 = vector.broadcast %cst_30 : bf16 to vector<18x18x32xbf16>
    %c0_31 = arith.constant 0 : index
    %c0_32 = arith.constant 0 : index
    %c0_33 = arith.constant 0 : index
    %57 = vector.load %arg3[%c0_31, %c0_32, %c0_33] : memref<18x18x32xbf16, #tpu.memory_space<vmem>>, vector<18x18x32xbf16>
    tpu.vector_store %arg3[%c0_31, %c0_32, %c0_33], %56 {strides = array<i32>} : memref<18x18x32xbf16, #tpu.memory_space<vmem>>, vector<18x18x32xbf16>,
    %58 = vector.shape_cast %55 : vector<256x32xf32> to vector<16x16x32xf32>
    %59 = arith.truncf %58 : vector<16x16x32xf32> to vector<16x16x32xbf16>
    %c1_34 = arith.constant 1 : index
    %c1_35 = arith.constant 1 : index
    %c0_36 = arith.constant 0 : index
    %60 = vector.load %arg3[%c1_34, %c1_35, %c0_36] : memref<18x18x32xbf16, #tpu.memory_space<vmem>>, vector<16x16x32xbf16>
    tpu.vector_store %arg3[%c1_34, %c1_35, %c0_36], %59 {strides = array<i32>} : memref<18x18x32xbf16, #tpu.memory_space<vmem>>, vector<16x16x32xbf16>,
    %cst_37 = arith.constant dense<0.000000e+00> : vector<32xf32>
    %61 = vector.multi_reduction <add>, %55, %cst_37 [0] : vector<256x32xf32> to vector<32xf32>
    %62 = vector.shape_cast %61 : vector<32xf32> to vector<1x32xf32>
    %63 = vector.shape_cast %62 : vector<1x32xf32> to vector<1x32xf32>
    %64 = vector.broadcast %63 : vector<1x32xf32> to vector<8x32xf32>
    %c0_38 = arith.constant 0 : index
    %c0_39 = arith.constant 0 : index
    %65 = vector.load %arg4[%c0_38, %c0_39] : memref<8x32xf32, #tpu.memory_space<vmem>>, vector<8x32xf32>
    tpu.vector_store %arg4[%c0_38, %c0_39], %64 {strides = array<i32>} : memref<8x32xf32, #tpu.memory_space<vmem>>, vector<8x32xf32>,
    %66 = arith.mulf %55, %55 : vector<256x32xf32>
    %cst_40 = arith.constant dense<0.000000e+00> : vector<32xf32>
    %67 = vector.multi_reduction <add>, %66, %cst_40 [0] : vector<256x32xf32> to vector<32xf32>
    %68 = vector.shape_cast %67 : vector<32xf32> to vector<1x32xf32>
    %69 = vector.shape_cast %68 : vector<1x32xf32> to vector<1x32xf32>
    %70 = vector.broadcast %69 : vector<1x32xf32> to vector<8x32xf32>
    %c0_41 = arith.constant 0 : index
    %c0_42 = arith.constant 0 : index
    %71 = vector.load %arg5[%c0_41, %c0_42] : memref<8x32xf32, #tpu.memory_space<vmem>>, vector<8x32xf32>
    tpu.vector_store %arg5[%c0_41, %c0_42], %70 {strides = array<i32>} : memref<8x32xf32, #tpu.memory_space<vmem>>, vector<8x32xf32>,
    return
  }
  func.func @transform_0(%arg0: i32) -> (i32, i32, i32) {
    %c0_i32 = arith.constant 0 : i32
    %c0_i32_0 = arith.constant 0 : i32
    %c0_i32_1 = arith.constant 0 : i32
    return %arg0, %c0_i32, %c0_i32_0 : i32, i32, i32
  }
  func.func @transform_1(%arg0: i32) -> (i32, i32, i32) {
    %c0_i32 = arith.constant 0 : i32
    %c0_i32_0 = arith.constant 0 : i32
    %c0_i32_1 = arith.constant 0 : i32
    %c0_i32_2 = arith.constant 0 : i32
    return %c0_i32, %c0_i32_0, %c0_i32_1 : i32, i32, i32
  }
  func.func @transform_2(%arg0: i32) -> (i32, i32, i32) {
    %c0_i32 = arith.constant 0 : i32
    %c0_i32_0 = arith.constant 0 : i32
    %c0_i32_1 = arith.constant 0 : i32
    return %arg0, %c0_i32, %c0_i32_0 : i32, i32, i32
  }
  func.func @transform_3(%arg0: i32) -> (i32, i32) {
    %c0_i32 = arith.constant 0 : i32
    %c0_i32_0 = arith.constant 0 : i32
    return %arg0, %c0_i32 : i32, i32
  }
  func.func @transform_4(%arg0: i32) -> (i32, i32) {
    %c0_i32 = arith.constant 0 : i32
    %c0_i32_0 = arith.constant 0 : i32
    return %arg0, %c0_i32 : i32, i32
  }
}

module attributes {stable_mosaic.version = 11 : i64} {
  func.func @_conv3x3_kernel(%arg0: i32, %arg1: memref<18x18x32xbf16, #tpu.memory_space<vmem>>, %arg2: memref<1x32xf32, #tpu.memory_space<vmem>>, %arg3: memref<1x32xf32, #tpu.memory_space<vmem>>, %arg4: memref<9x32x32xbf16, #tpu.memory_space<vmem>>, %arg5: memref<256x32xbf16, #tpu.memory_space<vmem>>, %arg6: memref<8x32xf32, #tpu.memory_space<vmem>>, %arg7: memref<8x32xf32, #tpu.memory_space<vmem>>) attributes {dimension_semantics = [#tpu.dimension_semantics<parallel>], iteration_bounds = array<i64: 2>, scalar_prefetch = 0 : i64, scratch_operands = 0 : i64, tpu.core_type = #tpu.core_type<tc>, window_params = [{transform_indices = @transform_0, window_bounds = array<i64: 18, 18, 32>}, {pipeline_mode = #tpu.pipeline_mode<synchronous>, transform_indices = @transform_1, window_bounds = array<i64: 1, 32>}, {pipeline_mode = #tpu.pipeline_mode<synchronous>, transform_indices = @transform_2, window_bounds = array<i64: 1, 32>}, {pipeline_mode = #tpu.pipeline_mode<synchronous>, transform_indices = @transform_3, window_bounds = array<i64: 9, 32, 32>}, {transform_indices = @transform_4, window_bounds = array<i64: 256, 32>}, {transform_indices = @transform_5, window_bounds = array<i64: 8, 32>}, {transform_indices = @transform_6, window_bounds = array<i64: 8, 32>}]} {
    %c0 = arith.constant 0 : index
    %c0_0 = arith.constant 0 : index
    %c0_1 = arith.constant 0 : index
    %0 = vector.load %arg1[%c0, %c0_0, %c0_1] : memref<18x18x32xbf16, #tpu.memory_space<vmem>>, vector<18x18x32xbf16>
    %1 = tpu.iota {dimensions = array<i32: 0>} : vector<18x18x32xi32>
    %2 = tpu.iota {dimensions = array<i32: 1>} : vector<18x18x32xi32>
    %c1_i32 = arith.constant 1 : i32
    %3 = vector.broadcast %c1_i32 : i32 to vector<18x18x32xi32>
    %4 = arith.cmpi sge, %1, %3 : vector<18x18x32xi32>
    %c16_i32 = arith.constant 16 : i32
    %5 = vector.broadcast %c16_i32 : i32 to vector<18x18x32xi32>
    %6 = arith.cmpi sle, %1, %5 : vector<18x18x32xi32>
    %7 = arith.andi %4, %6 : vector<18x18x32xi1>
    %c1_i32_2 = arith.constant 1 : i32
    %8 = vector.broadcast %c1_i32_2 : i32 to vector<18x18x32xi32>
    %9 = arith.cmpi sge, %2, %8 : vector<18x18x32xi32>
    %10 = arith.andi %7, %9 : vector<18x18x32xi1>
    %c16_i32_3 = arith.constant 16 : i32
    %11 = vector.broadcast %c16_i32_3 : i32 to vector<18x18x32xi32>
    %12 = arith.cmpi sle, %2, %11 : vector<18x18x32xi32>
    %13 = arith.andi %10, %12 : vector<18x18x32xi1>
    %14 = arith.extf %0 : vector<18x18x32xbf16> to vector<18x18x32xf32>
    %c0_4 = arith.constant 0 : index
    %c0_5 = arith.constant 0 : index
    %15 = vector.load %arg2[%c0_4, %c0_5] : memref<1x32xf32, #tpu.memory_space<vmem>>, vector<1x32xf32>
    %16 = vector.shape_cast %15 : vector<1x32xf32> to vector<1x1x32xf32>
    %17 = vector.broadcast %16 : vector<1x1x32xf32> to vector<18x18x32xf32>
    %18 = arith.mulf %14, %17 : vector<18x18x32xf32>
    %c0_6 = arith.constant 0 : index
    %c0_7 = arith.constant 0 : index
    %19 = vector.load %arg3[%c0_6, %c0_7] : memref<1x32xf32, #tpu.memory_space<vmem>>, vector<1x32xf32>
    %20 = vector.shape_cast %19 : vector<1x32xf32> to vector<1x1x32xf32>
    %21 = vector.broadcast %20 : vector<1x1x32xf32> to vector<18x18x32xf32>
    %22 = arith.addf %18, %21 : vector<18x18x32xf32>
    %cst = arith.constant 0.000000e+00 : f32
    %23 = vector.broadcast %cst : f32 to vector<18x18x32xf32>
    %24 = arith.maximumf %22, %23 : vector<18x18x32xf32>
    %cst_8 = arith.constant 0.000000e+00 : f32
    %25 = vector.broadcast %cst_8 : f32 to vector<18x18x32xf32>
    %26 = arith.select %13, %24, %25 : vector<18x18x32xi1>, vector<18x18x32xf32>
    %27 = arith.truncf %26 : vector<18x18x32xf32> to vector<18x18x32xbf16>
    %cst_9 = arith.constant 0.000000e+00 : f32
    %28 = vector.broadcast %cst_9 : f32 to vector<256x32xf32>
    %29 = vector.extract_strided_slice %27 {offsets = [0, 0, 0], sizes = [16, 16, 32], strides = [1, 1, 1]} : vector<18x18x32xbf16> to vector<16x16x32xbf16>
    %30 = vector.shape_cast %29 : vector<16x16x32xbf16> to vector<256x32xbf16>
    %c0_10 = arith.constant 0 : index
    %c0_11 = arith.constant 0 : index
    %c0_12 = arith.constant 0 : index
    %31 = vector.load %arg4[%c0_10, %c0_11, %c0_12] : memref<9x32x32xbf16, #tpu.memory_space<vmem>>, vector<1x32x32xbf16>
    %32 = vector.shape_cast %31 : vector<1x32x32xbf16> to vector<32x32xbf16>
    %cst_13 = arith.constant dense<0.000000e+00> : vector<256x32xf32>
    %33 = tpu.matmul %30, %32, %cst_13 {dimension_numbers = #tpu.dot_dimension_numbers<[1], [0], [0], [1], [0, 0, 1, 1], [], []>} : vector<256x32xbf16>, vector<32x32xbf16>, vector<256x32xf32> -> vector<256x32xf32>
    %34 = arith.addf %28, %33 : vector<256x32xf32>
    %35 = vector.extract_strided_slice %27 {offsets = [0, 1, 0], sizes = [16, 16, 32], strides = [1, 1, 1]} : vector<18x18x32xbf16> to vector<16x16x32xbf16>
    %36 = vector.shape_cast %35 : vector<16x16x32xbf16> to vector<256x32xbf16>
    %c1 = arith.constant 1 : index
    %c0_14 = arith.constant 0 : index
    %c0_15 = arith.constant 0 : index
    %37 = vector.load %arg4[%c1, %c0_14, %c0_15] : memref<9x32x32xbf16, #tpu.memory_space<vmem>>, vector<1x32x32xbf16>
    %38 = vector.shape_cast %37 : vector<1x32x32xbf16> to vector<32x32xbf16>
    %cst_16 = arith.constant dense<0.000000e+00> : vector<256x32xf32>
    %39 = tpu.matmul %36, %38, %cst_16 {dimension_numbers = #tpu.dot_dimension_numbers<[1], [0], [0], [1], [0, 0, 1, 1], [], []>} : vector<256x32xbf16>, vector<32x32xbf16>, vector<256x32xf32> -> vector<256x32xf32>
    %40 = arith.addf %34, %39 : vector<256x32xf32>
    %41 = vector.extract_strided_slice %27 {offsets = [0, 2, 0], sizes = [16, 16, 32], strides = [1, 1, 1]} : vector<18x18x32xbf16> to vector<16x16x32xbf16>
    %42 = vector.shape_cast %41 : vector<16x16x32xbf16> to vector<256x32xbf16>
    %c2 = arith.constant 2 : index
    %c0_17 = arith.constant 0 : index
    %c0_18 = arith.constant 0 : index
    %43 = vector.load %arg4[%c2, %c0_17, %c0_18] : memref<9x32x32xbf16, #tpu.memory_space<vmem>>, vector<1x32x32xbf16>
    %44 = vector.shape_cast %43 : vector<1x32x32xbf16> to vector<32x32xbf16>
    %cst_19 = arith.constant dense<0.000000e+00> : vector<256x32xf32>
    %45 = tpu.matmul %42, %44, %cst_19 {dimension_numbers = #tpu.dot_dimension_numbers<[1], [0], [0], [1], [0, 0, 1, 1], [], []>} : vector<256x32xbf16>, vector<32x32xbf16>, vector<256x32xf32> -> vector<256x32xf32>
    %46 = arith.addf %40, %45 : vector<256x32xf32>
    %47 = vector.extract_strided_slice %27 {offsets = [1, 0, 0], sizes = [16, 16, 32], strides = [1, 1, 1]} : vector<18x18x32xbf16> to vector<16x16x32xbf16>
    %48 = vector.shape_cast %47 : vector<16x16x32xbf16> to vector<256x32xbf16>
    %c3 = arith.constant 3 : index
    %c0_20 = arith.constant 0 : index
    %c0_21 = arith.constant 0 : index
    %49 = vector.load %arg4[%c3, %c0_20, %c0_21] : memref<9x32x32xbf16, #tpu.memory_space<vmem>>, vector<1x32x32xbf16>
    %50 = vector.shape_cast %49 : vector<1x32x32xbf16> to vector<32x32xbf16>
    %cst_22 = arith.constant dense<0.000000e+00> : vector<256x32xf32>
    %51 = tpu.matmul %48, %50, %cst_22 {dimension_numbers = #tpu.dot_dimension_numbers<[1], [0], [0], [1], [0, 0, 1, 1], [], []>} : vector<256x32xbf16>, vector<32x32xbf16>, vector<256x32xf32> -> vector<256x32xf32>
    %52 = arith.addf %46, %51 : vector<256x32xf32>
    %53 = vector.extract_strided_slice %27 {offsets = [1, 1, 0], sizes = [16, 16, 32], strides = [1, 1, 1]} : vector<18x18x32xbf16> to vector<16x16x32xbf16>
    %54 = vector.shape_cast %53 : vector<16x16x32xbf16> to vector<256x32xbf16>
    %c4 = arith.constant 4 : index
    %c0_23 = arith.constant 0 : index
    %c0_24 = arith.constant 0 : index
    %55 = vector.load %arg4[%c4, %c0_23, %c0_24] : memref<9x32x32xbf16, #tpu.memory_space<vmem>>, vector<1x32x32xbf16>
    %56 = vector.shape_cast %55 : vector<1x32x32xbf16> to vector<32x32xbf16>
    %cst_25 = arith.constant dense<0.000000e+00> : vector<256x32xf32>
    %57 = tpu.matmul %54, %56, %cst_25 {dimension_numbers = #tpu.dot_dimension_numbers<[1], [0], [0], [1], [0, 0, 1, 1], [], []>} : vector<256x32xbf16>, vector<32x32xbf16>, vector<256x32xf32> -> vector<256x32xf32>
    %58 = arith.addf %52, %57 : vector<256x32xf32>
    %59 = vector.extract_strided_slice %27 {offsets = [1, 2, 0], sizes = [16, 16, 32], strides = [1, 1, 1]} : vector<18x18x32xbf16> to vector<16x16x32xbf16>
    %60 = vector.shape_cast %59 : vector<16x16x32xbf16> to vector<256x32xbf16>
    %c5 = arith.constant 5 : index
    %c0_26 = arith.constant 0 : index
    %c0_27 = arith.constant 0 : index
    %61 = vector.load %arg4[%c5, %c0_26, %c0_27] : memref<9x32x32xbf16, #tpu.memory_space<vmem>>, vector<1x32x32xbf16>
    %62 = vector.shape_cast %61 : vector<1x32x32xbf16> to vector<32x32xbf16>
    %cst_28 = arith.constant dense<0.000000e+00> : vector<256x32xf32>
    %63 = tpu.matmul %60, %62, %cst_28 {dimension_numbers = #tpu.dot_dimension_numbers<[1], [0], [0], [1], [0, 0, 1, 1], [], []>} : vector<256x32xbf16>, vector<32x32xbf16>, vector<256x32xf32> -> vector<256x32xf32>
    %64 = arith.addf %58, %63 : vector<256x32xf32>
    %65 = vector.extract_strided_slice %27 {offsets = [2, 0, 0], sizes = [16, 16, 32], strides = [1, 1, 1]} : vector<18x18x32xbf16> to vector<16x16x32xbf16>
    %66 = vector.shape_cast %65 : vector<16x16x32xbf16> to vector<256x32xbf16>
    %c6 = arith.constant 6 : index
    %c0_29 = arith.constant 0 : index
    %c0_30 = arith.constant 0 : index
    %67 = vector.load %arg4[%c6, %c0_29, %c0_30] : memref<9x32x32xbf16, #tpu.memory_space<vmem>>, vector<1x32x32xbf16>
    %68 = vector.shape_cast %67 : vector<1x32x32xbf16> to vector<32x32xbf16>
    %cst_31 = arith.constant dense<0.000000e+00> : vector<256x32xf32>
    %69 = tpu.matmul %66, %68, %cst_31 {dimension_numbers = #tpu.dot_dimension_numbers<[1], [0], [0], [1], [0, 0, 1, 1], [], []>} : vector<256x32xbf16>, vector<32x32xbf16>, vector<256x32xf32> -> vector<256x32xf32>
    %70 = arith.addf %64, %69 : vector<256x32xf32>
    %71 = vector.extract_strided_slice %27 {offsets = [2, 1, 0], sizes = [16, 16, 32], strides = [1, 1, 1]} : vector<18x18x32xbf16> to vector<16x16x32xbf16>
    %72 = vector.shape_cast %71 : vector<16x16x32xbf16> to vector<256x32xbf16>
    %c7 = arith.constant 7 : index
    %c0_32 = arith.constant 0 : index
    %c0_33 = arith.constant 0 : index
    %73 = vector.load %arg4[%c7, %c0_32, %c0_33] : memref<9x32x32xbf16, #tpu.memory_space<vmem>>, vector<1x32x32xbf16>
    %74 = vector.shape_cast %73 : vector<1x32x32xbf16> to vector<32x32xbf16>
    %cst_34 = arith.constant dense<0.000000e+00> : vector<256x32xf32>
    %75 = tpu.matmul %72, %74, %cst_34 {dimension_numbers = #tpu.dot_dimension_numbers<[1], [0], [0], [1], [0, 0, 1, 1], [], []>} : vector<256x32xbf16>, vector<32x32xbf16>, vector<256x32xf32> -> vector<256x32xf32>
    %76 = arith.addf %70, %75 : vector<256x32xf32>
    %77 = vector.extract_strided_slice %27 {offsets = [2, 2, 0], sizes = [16, 16, 32], strides = [1, 1, 1]} : vector<18x18x32xbf16> to vector<16x16x32xbf16>
    %78 = vector.shape_cast %77 : vector<16x16x32xbf16> to vector<256x32xbf16>
    %c8 = arith.constant 8 : index
    %c0_35 = arith.constant 0 : index
    %c0_36 = arith.constant 0 : index
    %79 = vector.load %arg4[%c8, %c0_35, %c0_36] : memref<9x32x32xbf16, #tpu.memory_space<vmem>>, vector<1x32x32xbf16>
    %80 = vector.shape_cast %79 : vector<1x32x32xbf16> to vector<32x32xbf16>
    %cst_37 = arith.constant dense<0.000000e+00> : vector<256x32xf32>
    %81 = tpu.matmul %78, %80, %cst_37 {dimension_numbers = #tpu.dot_dimension_numbers<[1], [0], [0], [1], [0, 0, 1, 1], [], []>} : vector<256x32xbf16>, vector<32x32xbf16>, vector<256x32xf32> -> vector<256x32xf32>
    %82 = arith.addf %76, %81 : vector<256x32xf32>
    %83 = arith.truncf %82 : vector<256x32xf32> to vector<256x32xbf16>
    %c0_38 = arith.constant 0 : index
    %c0_39 = arith.constant 0 : index
    %84 = vector.load %arg5[%c0_38, %c0_39] : memref<256x32xbf16, #tpu.memory_space<vmem>>, vector<256x32xbf16>
    tpu.vector_store %arg5[%c0_38, %c0_39], %83 {strides = array<i32>} : memref<256x32xbf16, #tpu.memory_space<vmem>>, vector<256x32xbf16>,
    %cst_40 = arith.constant dense<0.000000e+00> : vector<32xf32>
    %85 = vector.multi_reduction <add>, %82, %cst_40 [0] : vector<256x32xf32> to vector<32xf32>
    %86 = vector.shape_cast %85 : vector<32xf32> to vector<1x32xf32>
    %87 = vector.shape_cast %86 : vector<1x32xf32> to vector<1x32xf32>
    %88 = vector.broadcast %87 : vector<1x32xf32> to vector<8x32xf32>
    %c0_41 = arith.constant 0 : index
    %c0_42 = arith.constant 0 : index
    %89 = vector.load %arg6[%c0_41, %c0_42] : memref<8x32xf32, #tpu.memory_space<vmem>>, vector<8x32xf32>
    tpu.vector_store %arg6[%c0_41, %c0_42], %88 {strides = array<i32>} : memref<8x32xf32, #tpu.memory_space<vmem>>, vector<8x32xf32>,
    %90 = arith.mulf %82, %82 : vector<256x32xf32>
    %cst_43 = arith.constant dense<0.000000e+00> : vector<32xf32>
    %91 = vector.multi_reduction <add>, %90, %cst_43 [0] : vector<256x32xf32> to vector<32xf32>
    %92 = vector.shape_cast %91 : vector<32xf32> to vector<1x32xf32>
    %93 = vector.shape_cast %92 : vector<1x32xf32> to vector<1x32xf32>
    %94 = vector.broadcast %93 : vector<1x32xf32> to vector<8x32xf32>
    %c0_44 = arith.constant 0 : index
    %c0_45 = arith.constant 0 : index
    %95 = vector.load %arg7[%c0_44, %c0_45] : memref<8x32xf32, #tpu.memory_space<vmem>>, vector<8x32xf32>
    tpu.vector_store %arg7[%c0_44, %c0_45], %94 {strides = array<i32>} : memref<8x32xf32, #tpu.memory_space<vmem>>, vector<8x32xf32>,
    return
  }
  func.func @transform_0(%arg0: i32) -> (i32, i32, i32) {
    %c0_i32 = arith.constant 0 : i32
    %c0_i32_0 = arith.constant 0 : i32
    %c0_i32_1 = arith.constant 0 : i32
    return %arg0, %c0_i32, %c0_i32_0 : i32, i32, i32
  }
  func.func @transform_1(%arg0: i32) -> (i32, i32) {
    %c0_i32 = arith.constant 0 : i32
    %c0_i32_0 = arith.constant 0 : i32
    %c0_i32_1 = arith.constant 0 : i32
    return %c0_i32, %c0_i32_0 : i32, i32
  }
  func.func @transform_2(%arg0: i32) -> (i32, i32) {
    %c0_i32 = arith.constant 0 : i32
    %c0_i32_0 = arith.constant 0 : i32
    %c0_i32_1 = arith.constant 0 : i32
    return %c0_i32, %c0_i32_0 : i32, i32
  }
  func.func @transform_3(%arg0: i32) -> (i32, i32, i32) {
    %c0_i32 = arith.constant 0 : i32
    %c0_i32_0 = arith.constant 0 : i32
    %c0_i32_1 = arith.constant 0 : i32
    %c0_i32_2 = arith.constant 0 : i32
    return %c0_i32, %c0_i32_0, %c0_i32_1 : i32, i32, i32
  }
  func.func @transform_4(%arg0: i32) -> (i32, i32) {
    %c0_i32 = arith.constant 0 : i32
    %c0_i32_0 = arith.constant 0 : i32
    return %arg0, %c0_i32 : i32, i32
  }
  func.func @transform_5(%arg0: i32) -> (i32, i32) {
    %c0_i32 = arith.constant 0 : i32
    %c0_i32_0 = arith.constant 0 : i32
    return %arg0, %c0_i32 : i32, i32
  }
  func.func @transform_6(%arg0: i32) -> (i32, i32) {
    %c0_i32 = arith.constant 0 : i32
    %c0_i32_0 = arith.constant 0 : i32
    return %arg0, %c0_i32 : i32, i32
  }
}

module attributes {stable_mosaic.version = 11 : i64} {
  func.func @_bn_residual_relu_kernel(%arg0: i32, %arg1: memref<128x128xbf16, #tpu.memory_space<vmem>>, %arg2: memref<1x128xf32, #tpu.memory_space<vmem>>, %arg3: memref<1x128xf32, #tpu.memory_space<vmem>>, %arg4: memref<128x64xbf16, #tpu.memory_space<vmem>>, %arg5: memref<64x128xbf16, #tpu.memory_space<vmem>>, %arg6: memref<1x128xf32, #tpu.memory_space<vmem>>, %arg7: memref<128x128xf32, #tpu.memory_space<vmem>>) attributes {dimension_semantics = [#tpu.dimension_semantics<parallel>], iteration_bounds = array<i64: 1>, scalar_prefetch = 0 : i64, scratch_operands = 0 : i64, tpu.core_type = #tpu.core_type<tc>, window_params = [{transform_indices = @transform_0, window_bounds = array<i64: 128, 128>}, {pipeline_mode = #tpu.pipeline_mode<synchronous>, transform_indices = @transform_1, window_bounds = array<i64: 1, 128>}, {pipeline_mode = #tpu.pipeline_mode<synchronous>, transform_indices = @transform_2, window_bounds = array<i64: 1, 128>}, {transform_indices = @transform_3, window_bounds = array<i64: 128, 64>}, {pipeline_mode = #tpu.pipeline_mode<synchronous>, transform_indices = @transform_4, window_bounds = array<i64: 64, 128>}, {pipeline_mode = #tpu.pipeline_mode<synchronous>, transform_indices = @transform_5, window_bounds = array<i64: 1, 128>}, {transform_indices = @transform_6, window_bounds = array<i64: 128, 128>}]} {
    %c0 = arith.constant 0 : index
    %c0_0 = arith.constant 0 : index
    %0 = vector.load %arg1[%c0, %c0_0] : memref<128x128xbf16, #tpu.memory_space<vmem>>, vector<128x128xbf16>
    %1 = arith.extf %0 : vector<128x128xbf16> to vector<128x128xf32>
    %c0_1 = arith.constant 0 : index
    %c0_2 = arith.constant 0 : index
    %2 = vector.load %arg2[%c0_1, %c0_2] : memref<1x128xf32, #tpu.memory_space<vmem>>, vector<1x128xf32>
    %3 = vector.broadcast %2 : vector<1x128xf32> to vector<128x128xf32>
    %4 = arith.mulf %1, %3 : vector<128x128xf32>
    %c0_3 = arith.constant 0 : index
    %c0_4 = arith.constant 0 : index
    %5 = vector.load %arg3[%c0_3, %c0_4] : memref<1x128xf32, #tpu.memory_space<vmem>>, vector<1x128xf32>
    %6 = vector.broadcast %5 : vector<1x128xf32> to vector<128x128xf32>
    %7 = arith.addf %4, %6 : vector<128x128xf32>
    %c0_5 = arith.constant 0 : index
    %c0_6 = arith.constant 0 : index
    %8 = vector.load %arg4[%c0_5, %c0_6] : memref<128x64xbf16, #tpu.memory_space<vmem>>, vector<128x64xbf16>
    %c0_7 = arith.constant 0 : index
    %c0_8 = arith.constant 0 : index
    %9 = vector.load %arg5[%c0_7, %c0_8] : memref<64x128xbf16, #tpu.memory_space<vmem>>, vector<64x128xbf16>
    %cst = arith.constant dense<0.000000e+00> : vector<128x128xf32>
    %10 = tpu.matmul %8, %9, %cst {dimension_numbers = #tpu.dot_dimension_numbers<[1], [0], [0], [1], [0, 0, 1, 1], [], []>} : vector<128x64xbf16>, vector<64x128xbf16>, vector<128x128xf32> -> vector<128x128xf32>
    %c0_9 = arith.constant 0 : index
    %c0_10 = arith.constant 0 : index
    %11 = vector.load %arg6[%c0_9, %c0_10] : memref<1x128xf32, #tpu.memory_space<vmem>>, vector<1x128xf32>
    %12 = vector.broadcast %11 : vector<1x128xf32> to vector<128x128xf32>
    %13 = arith.addf %10, %12 : vector<128x128xf32>
    %14 = arith.addf %7, %13 : vector<128x128xf32>
    %cst_11 = arith.constant 0.000000e+00 : f32
    %15 = vector.broadcast %cst_11 : f32 to vector<128x128xf32>
    %16 = arith.maximumf %14, %15 : vector<128x128xf32>
    %c0_12 = arith.constant 0 : index
    %c0_13 = arith.constant 0 : index
    %17 = vector.load %arg7[%c0_12, %c0_13] : memref<128x128xf32, #tpu.memory_space<vmem>>, vector<128x128xf32>
    tpu.vector_store %arg7[%c0_12, %c0_13], %16 {strides = array<i32>} : memref<128x128xf32, #tpu.memory_space<vmem>>, vector<128x128xf32>,
    return
  }
  func.func @transform_0(%arg0: i32) -> (i32, i32) {
    %c0_i32 = arith.constant 0 : i32
    %c0_i32_0 = arith.constant 0 : i32
    return %arg0, %c0_i32 : i32, i32
  }
  func.func @transform_1(%arg0: i32) -> (i32, i32) {
    %c0_i32 = arith.constant 0 : i32
    %c0_i32_0 = arith.constant 0 : i32
    %c0_i32_1 = arith.constant 0 : i32
    return %c0_i32, %c0_i32_0 : i32, i32
  }
  func.func @transform_2(%arg0: i32) -> (i32, i32) {
    %c0_i32 = arith.constant 0 : i32
    %c0_i32_0 = arith.constant 0 : i32
    %c0_i32_1 = arith.constant 0 : i32
    return %c0_i32, %c0_i32_0 : i32, i32
  }
  func.func @transform_3(%arg0: i32) -> (i32, i32) {
    %c0_i32 = arith.constant 0 : i32
    %c0_i32_0 = arith.constant 0 : i32
    return %arg0, %c0_i32 : i32, i32
  }
  func.func @transform_4(%arg0: i32) -> (i32, i32) {
    %c0_i32 = arith.constant 0 : i32
    %c0_i32_0 = arith.constant 0 : i32
    %c0_i32_1 = arith.constant 0 : i32
    return %c0_i32, %c0_i32_0 : i32, i32
  }
  func.func @transform_5(%arg0: i32) -> (i32, i32) {
    %c0_i32 = arith.constant 0 : i32
    %c0_i32_0 = arith.constant 0 : i32
    %c0_i32_1 = arith.constant 0 : i32
    return %c0_i32, %c0_i32_0 : i32, i32
  }
  func.func @transform_6(%arg0: i32) -> (i32, i32) {
    %c0_i32 = arith.constant 0 : i32
    %c0_i32_0 = arith.constant 0 : i32
    return %arg0, %c0_i32 : i32, i32
  }
}

</mosaic_0001>

<bundles_post_ra>
// kernel: _lambda_.5
= control target key start
LH: loop header
LB: loop body
LE: loop exit
PB: predicated region body
PF: predicated region fallthrough
CT: control target
= control target key end

     0   :  { %11 = vsyncpa [#allocation3], 0  ;;  %s940_s0 = inlined_call_operand.hbm [shape: bf16[128,128], index: 0, kind: input, shape index: {}]   ;;  %s941_s1 = inlined_call_operand.hbm [shape: f32[1,128], index: 1, kind: input, shape index: {}]   ;;  %s942_s2 = inlined_call_operand.hbm [shape: f32[1,128], index: 2, kind: input, shape index: {}]   ;;  %s943_s3 = inlined_call_operand.hbm [shape: bf16[128,64], index: 3, kind: input, shape index: {}]   ;;  %s944_s4 = inlined_call_operand.hbm [shape: bf16[64,128], index: 4, kind: input, shape index: {}]   ;;  %s945_s5 = inlined_call_operand.hbm [shape: f32[1,128], index: 5, kind: input, shape index: {}]   ;;  %s946_s6 = inlined_call_operand.hbm [shape: f32[128,128], index: 6, kind: output, shape index: {}]  }
   0x1   :  { %12 = vsyncpa [#allocation6], 0 }
   0x2   :  { %13 = vsyncpa [#allocation9], 0 }
   0x3   :  { %14 = vsyncpa [#allocation12], 0 }
   0x4   :  { %15 = vsyncpa [#allocation4], 0  ;;  %s757_s21 = smov [#allocation5]   ;;  %s593_s25 = scalar_lea.hbm %s941_s1, 16 }
   0x5   :  { %s34_s22 = sshll.u32 %s757_s21, 4  ;;  %p594_p0 = scmp.ne.s32.totalorder %s941_s1, %s593_s25  ;;  %s35_s22 = int_to_ptr.vmem [resolvable:$true] %s34_s22 }
   0x6   :  { %p597_p1 = scmp.lt.u32.totalorder %s593_s25, %s941_s1 }
   0x8   :  { %p599_p2 = pnand %p597_p1, %p594_p0 }
   0xa   :  { %602 = shalt.err (!%p599_p2)
}
   0xb   :  { %s603_s30 = scalar_lea.vmem %s35_s22, 16  ;;  %s607_s7 = scalar_lea.vmem %s35_s22, 32 }
   0xc   :  { %p604_p3 = scmp.ne.s32.totalorder %s35_s22, %s603_s30  ;;  %p608_p4 = scmp.lt.s32.totalorder %s35_s22, %s35_s22 }
   0xd   :  { %p609_p5 = scmp.lt.s32.totalorder %s607_s7, %s603_s30 }
   0xf   :  { %p610_p6 = por %p609_p5, %p608_p4 }
  0x11   :  { %p611_p7 = pnand %p610_p6, %p604_p3 }
  0x13   :  { %614 = shalt.err (!%p611_p7)
}
  0x14   :  { %37 = dma.hbm_to_vmem [thread:$0]  %s941_s1, 16, %s35_s22, [#allocation6]  }
  0x15   :  { %s758_s10 = smov [#allocation8]   ;;  %s759_s12 = smov [#allocation2]  }
  0x16   :  { %s53_s11 = sshll.u32 %s758_s10, 4  ;;  %s21_s13 = sshll.u32 %s759_s12, 4  ;;  %s54_s11 = int_to_ptr.vmem [resolvable:$true] %s53_s11  ;;  %s22_s13 = int_to_ptr.vmem [resolvable:$true] %s21_s13 }
  0x17   :  { %s615_s16 = scalar_lea.hbm %s943_s3, 1024 }
  0x18   :  { %p616_p8 = scmp.ne.s32.totalorder %s943_s3, %s615_s16  ;;  %p619_p9 = scmp.lt.u32.totalorder %s615_s16, %s943_s3 }
  0x1a   :  { %p621_p10 = pnand %p619_p9, %p616_p8 }
  0x1c   :  { %624 = shalt.err (!%p621_p10)
}
  0x1d   :  { %s625_s1 = scalar_lea.vmem %s54_s11, 1024  ;;  %p630_p12 = scmp.lt.s32.totalorder %s54_s11, %s54_s11 }
  0x1e   :  { %p626_p11 = scmp.ne.s32.totalorder %s54_s11, %s625_s1  ;;  %p631_p13 = scmp.lt.s32.totalorder %s625_s1, %s625_s1 }
  0x20   :  { %p632_p0 = por %p631_p13, %p630_p12 }
  0x22   :  { %p633_p1 = pnand %p632_p0, %p626_p11 }
  0x24   :  { %636 = shalt.err (!%p633_p1)
}
  0x25   :  { %s760_s21 = smov 64   ;;  %s761_s22 = smov 4  }
  0x26   :  { %59 = dma.hbm_to_vmem [thread:$0]  %s943_s3, 1024, %s54_s11, [#allocation9], %s760_s21, %s760_s21, %s761_s22  }
  0x27   :  { %s637_s27 = scalar_lea.hbm %s940_s0, 1024 }
  0x28   :  { %p638_p2 = scmp.ne.s32.totalorder %s940_s0, %s637_s27  ;;  %p641_p3 = scmp.lt.u32.totalorder %s637_s27, %s940_s0 }
  0x2a   :  { %p643_p4 = pnand %p641_p3, %p638_p2 }
  0x2c   :  { %646 = shalt.err (!%p643_p4)
}
  0x2d   :  { %s647_s8 = scalar_lea.vmem %s22_s13, 1024  ;;  %p652_p6 = scmp.lt.s32.totalorder %s22_s13, %s22_s13 }
  0x2e   :  { %p648_p5 = scmp.ne.s32.totalorder %s22_s13, %s647_s8  ;;  %p653_p7 = scmp.lt.s32.totalorder %s647_s8, %s647_s8 }
  0x30   :  { %p654_p8 = por %p653_p7, %p652_p6 }
  0x32   :  { %p655_p9 = pnand %p654_p8, %p648_p5 }
  0x34   :  { %658 = shalt.err (!%p655_p9)
}
  0x35   :  { %27 = dma.hbm_to_vmem [thread:$0]  %s940_s0, 1024, %s22_s13, [#allocation3], %s760_s21, %s760_s21, %s761_s22  }
  0x36   :  { %s762_s10 = smov [#allocation7]   ;;  %s763_s12 = smov [#allocation10]  }
  0x37   :  { %s44_s11 = sshll.u32 %s762_s10, 4  ;;  %s65_s14 = sshll.u32 %s763_s12, 4  ;;  %s45_s11 = int_to_ptr.vmem [resolvable:$true] %s44_s11  ;;  %s66_s14 = int_to_ptr.vmem [resolvable:$true] %s65_s14 }
  0x38   :  { %s659_s17 = scalar_lea.hbm %s942_s2, 16 }
  0x39   :  { %p660_p10 = scmp.ne.s32.totalorder %s942_s2, %s659_s17  ;;  %p663_p11 = scmp.lt.u32.totalorder %s659_s17, %s942_s2 }
  0x3b   :  { %p665_p12 = pnand %p663_p11, %p660_p10 }
  0x3d   :  { %668 = shalt.err (!%p665_p12)
}
  0x3e   :  { %s669_s0 = scalar_lea.vmem %s45_s11, 16  ;;  %s673_s13 = scalar_lea.vmem %s45_s11, 32 }
  0x3f   :  { %p670_p13 = scmp.ne.s32.totalorder %s45_s11, %s669_s0  ;;  %p674_p0 = scmp.lt.s32.totalorder %s45_s11, %s45_s11 }
  0x40   :  { %p675_p1 = scmp.lt.s32.totalorder %s673_s13, %s669_s0 }
  0x42   :  { %p676_p2 = por %p675_p1, %p674_p0 }
  0x44   :  { %p677_p3 = pnand %p676_p2, %p670_p13 }
  0x46   :  { %680 = shalt.err (!%p677_p3)
}
  0x47   :  { %47 = dma.hbm_to_vmem [thread:$0]  %s942_s2, 16, %s45_s11, [#allocation6]  }
  0x48   :  { %s681_s27 = scalar_lea.hbm %s944_s4, 512 }
  0x49   :  { %p682_p4 = scmp.ne.s32.totalorder %s944_s4, %s681_s27  ;;  %p685_p5 = scmp.lt.u32.totalorder %s681_s27, %s944_s4 }
  0x4b   :  { %p687_p6 = pnand %p685_p5, %p682_p4 }
  0x4d   :  { %690 = shalt.err (!%p687_p6)
}
  0x4e   :  { %s691_s8 = scalar_lea.vmem %s66_s14, 512  ;;  %p696_p8 = scmp.lt.s32.totalorder %s66_s14, %s66_s14 }
  0x4f   :  { %p692_p7 = scmp.ne.s32.totalorder %s66_s14, %s691_s8  ;;  %p697_p9 = scmp.lt.s32.totalorder %s691_s8, %s691_s8 }
  0x51   :  { %p698_p10 = por %p697_p9, %p696_p8 }
  0x53   :  { %p699_p11 = pnand %p698_p10, %p692_p7 }
  0x55   :  { %702 = shalt.err (!%p699_p11)
}
  0x56   :  { %71 = dma.hbm_to_vmem [thread:$0]  %s944_s4, 512, %s66_s14, [#allocation9], %s760_s21, %s760_s21, %s761_s22  }
  0x57   :  { %s764_s9 = smov [#allocation11]   ;;  %s703_s15 = scalar_lea.hbm %s945_s5, 16 }
  0x58   :  { %s78_s10 = sshll.u32 %s764_s9, 4  ;;  %p704_p12 = scmp.ne.s32.totalorder %s945_s5, %s703_s15  ;;  %s79_s10 = int_to_ptr.vmem [resolvable:$true] %s78_s10 }
  0x59   :  { %p707_p13 = scmp.lt.u32.totalorder %s703_s15, %s945_s5 }
  0x5b   :  { %p709_p0 = pnand %p707_p13, %p704_p12 }
  0x5d   :  { %712 = shalt.err (!%p709_p0)
}
  0x5e   :  { %s713_s20 = scalar_lea.vmem %s79_s10, 16  ;;  %s717_s4 = scalar_lea.vmem %s79_s10, 32 }
  0x5f   :  { %p714_p1 = scmp.ne.s32.totalorder %s79_s10, %s713_s20  ;;  %p718_p2 = scmp.lt.s32.totalorder %s79_s10, %s79_s10 }
  0x60   :  { %p719_p3 = scmp.lt.s32.totalorder %s717_s4, %s713_s20 }
  0x62   :  { %p720_p4 = por %p719_p3, %p718_p2 }
  0x64   :  { %p721_p5 = pnand %p720_p4, %p714_p1 }
  0x66   :  { %724 = shalt.err (!%p721_p5)
}
  0x67   :  { %81 = dma.hbm_to_vmem [thread:$0]  %s945_s5, 16, %s79_s10, [#allocation12]  }
  0x68   :  { %747 = dma.done.wait [#allocation3], 1024  }
  0x69   :  { %748 = vsyncadd [#allocation3], 4294966272 }
  0x6a   :  { %749 = dma.done.wait [#allocation6], 32  }
  0x6b   :  { %750 = vsyncadd [#allocation6], 4294967264 }
  0x6c   :  { %751 = dma.done.wait [#allocation9], 1536  }
  0x6d   :  { %752 = vsyncadd [#allocation9], 4294965760 }
  0x6e   :  { %753 = dma.done.wait [#allocation12], 16  }
  0x6f   :  { %754 = vsyncadd [#allocation12], 4294967280  ;;  %v581_v0 = vld [vmem:[#allocation10] sm:$0xff]   ;;  %v582_v1 = vld [vmem:[#allocation10 + $0x8] sm:$0xff]   ;;  %vm274_vm0 = vcmask 523264   ;;  %s765_s5 = smov [#allocation13]  }
  0x70   :  { %538 = vmatprep.subr.bf16.mxu0 %v581_v0  ;;  %562 = vmatprep.subr.bf16.mxu1 %v581_v0  ;;  %v583_v2 = vld [vmem:[#allocation10 + $0x10] sm:$0xff]   ;;  %v585_v3 = vld [vmem:[#allocation8] sm:$0xff]   ;;  %v584_v5 = vld [vmem:[#allocation10 + $0x18] sm:$0xff]   ;;  %s449_s14 = sshll.u32 %s765_s5, 4  ;;  %s450_s14 = int_to_ptr.vmem [resolvable:$true] %s449_s14 }
  0x71   :  { %539 = vmatpush3.bf16.msra.mxu0 %v581_v0  ;;  %566 = vmatpush3.bf16.msra.mxu1 %v581_v0  ;;  %v586_v4 = vld [vmem:[#allocation8 + $0x20] sm:$0xff]   ;;  %v587_v6 = vld [vmem:[#allocation8 + $0x8] sm:$0xff]   ;;  %v589_v8 = vld [vmem:[#allocation8 + $0x10] sm:$0xff]   ;;  %s725_s1 = scalar_lea.vmem %s450_s14, 2048  ;;  %p730_p7 = scmp.lt.s32.totalorder %s450_s14, %s450_s14 }
  0x72   :  { %540 = vmatprep.subr.bf16.mxu0 %v582_v1  ;;  %563 = vmatprep.subr.bf16.mxu1 %v582_v1  ;;  %v588_v7 = vld [vmem:[#allocation8 + $0x28] sm:$0xff]   ;;  %v590_v9 = vld [vmem:[#allocation8 + $0x30] sm:$0xff]   ;;  %v591_v10 = vld [vmem:[#allocation8 + $0x18] sm:$0xff]   ;;  %p726_p6 = scmp.ne.s32.totalorder %s450_s14, %s725_s1  ;;  %p731_p8 = scmp.lt.s32.totalorder %s725_s1, %s725_s1 }
  0x73   :  { %546 = vmatprep.mubr.msk.bf16.mxu0 %vm274_vm0, %v585_v3  ;;  %554 = vmatprep.mubr.msk.bf16.mxu1 %vm274_vm0, %v586_v4  ;;  %v592_v11 = vld [vmem:[#allocation8 + $0x38] sm:$0xff]   ;;  %v519_v12 = vld [vmem:[#allocation2 + $0x8] sm:$0xff]   ;;  %v520_v29 = vld [vmem:[#allocation2 + $0x10] sm:$0xff]  }
  0x74   :  { %v523_v13 = vld [vmem:[#allocation2 + $0x28] sm:$0xff]   ;;  %v488_v14 = vld [vmem:[#allocation2] sm:$0xff]   ;;  %v493_v16 = vunpack.c.l.bf16 %v519_v12  ;;  %v494_v21 = vunpack.c.h.bf16 %v519_v12  ;;  %v521_v25 = vld [vmem:[#allocation2 + $0x18] sm:$0xff]   ;;  %v497_v40 = vunpack.c.l.bf16 %v520_v29  ;;  %v498_v49 = vunpack.c.h.bf16 %v520_v29  ;;  %p732_p9 = por %p731_p8, %p730_p7 }
  0x75   :  { %541 = vmatpush3.bf16.msra.mxu0 %v582_v1  ;;  %567 = vmatpush3.bf16.msra.mxu1 %v582_v1  ;;  %v522_v15 = vld [vmem:[#allocation2 + $0x20] sm:$0xff]   ;;  %v509_v17 = vunpack.c.l.bf16 %v523_v13  ;;  %v489_v19 = vunpack.c.l.bf16 %v488_v14  ;;  %v510_v22 = vunpack.c.h.bf16 %v523_v13  ;;  %v490_v23 = vunpack.c.h.bf16 %v488_v14  ;;  %v525_v28 = vld [vmem:[#allocation2 + $0x38] sm:$0xff]   ;;  %v524_v30 = vld [vmem:[#allocation2 + $0x30] sm:$0xff]  }
  0x76   :  { %542 = vmatprep.subr.bf16.mxu0 %v583_v2  ;;  %564 = vmatprep.subr.bf16.mxu1 %v583_v2  ;;  %v464_v18 = vld [vmem:[#allocation5] ss:$0 sm:$0xff]  ;;  %v505_v20 = vunpack.c.l.bf16 %v522_v15  ;;  %v506_v24 = vunpack.c.h.bf16 %v522_v15  ;;  %v892_v31 = vld [vmem:[#allocation7] ss:$0 sm:$0xff]  ;;  %v501_v38 = vunpack.c.l.bf16 %v521_v25  ;;  %v517_v39 = vunpack.c.l.bf16 %v525_v28  ;;  %v896_v46 = vld [vmem:[#allocation11] ss:$0 sm:$0xff]  ;;  %p733_p10 = pnand %p732_p9, %p726_p6 }
  0x77   :  { %v142_v26 = vmul.f32 %v493_v16, %v464_v18  ;;  %v150_v27 = vmul.f32 %v509_v17, %v464_v18  ;;  %v140_v32 = vmul.f32 %v489_v19, %v464_v18  ;;  %v143_v34 = vmul.f32 %v494_v21, %v464_v18 }
  0x78   :  { %v148_v33 = vmul.f32 %v505_v20, %v464_v18  ;;  %v151_v35 = vmul.f32 %v510_v22, %v464_v18  ;;  %v141_v36 = vmul.f32 %v490_v23, %v464_v18  ;;  %v149_v37 = vmul.f32 %v506_v24, %v464_v18 }
  0x79   :  { %543 = vmatpush3.bf16.msra.mxu0 %v583_v2  ;;  %568 = vmatpush3.bf16.msra.mxu1 %v583_v2  ;;  %v513_v41 = vunpack.c.l.bf16 %v524_v30  ;;  %v165_v42 = vadd.f32 %v892_v31, %v142_v26  ;;  %v173_v43 = vadd.f32 %v892_v31, %v150_v27  ;;  %v502_v44 = vunpack.c.h.bf16 %v521_v25 }
  0x7a   :  { %544 = vmatprep.subr.bf16.mxu0 %v584_v5  ;;  %565 = vmatprep.subr.bf16.mxu1 %v584_v5  ;;  %v518_v45 = vunpack.c.h.bf16 %v525_v28  ;;  %v163_v47 = vadd.f32 %v892_v31, %v140_v32  ;;  %v171_v48 = vadd.f32 %v892_v31, %v148_v33  ;;  %v514_v50 = vunpack.c.h.bf16 %v524_v30 }
  0x7b   :  { %v166_v51 = vadd.f32 %v892_v31, %v143_v34  ;;  %v174_v52 = vadd.f32 %v892_v31, %v151_v35  ;;  %v164_v53 = vadd.f32 %v892_v31, %v141_v36  ;;  %v172_v54 = vadd.f32 %v892_v31, %v149_v37 }
  0x7c   :  { %v146_v57 = vmul.f32 %v501_v38, %v464_v18  ;;  %v154_v58 = vmul.f32 %v517_v39, %v464_v18  ;;  %v144_v59 = vmul.f32 %v497_v40, %v464_v18  ;;  %v152_v60 = vmul.f32 %v513_v41, %v464_v18 }
  0x7d   :  { %545 = vmatpush3.bf16.msra.mxu0 %v584_v5  ;;  %569 = vmatpush3.bf16.msra.mxu1 %v584_v5  ;;  %v147_v1 = vmul.f32 %v502_v44, %v464_v18  ;;  %v155_v2 = vmul.f32 %v518_v45, %v464_v18 }
  0x7e   :  { %v169_v29 = vadd.f32 %v892_v31, %v146_v57  ;;  %v177_v30 = vadd.f32 %v892_v31, %v154_v58  ;;  %v167_v36 = vadd.f32 %v892_v31, %v144_v59  ;;  %v175_v37 = vadd.f32 %v892_v31, %v152_v60 }
  0x80   :  { %547 = vmatmul.mubr.msk.bf16.vlgmr.msra.gmra.mrb[0].mxu0 %vm274_vm0, %v587_v6  ;;  %555 = vmatmul.mubr.msk.bf16.vlgmr.msra.gmra.mrb[0].mxu1 %vm274_vm0, %v588_v7  ;;  %v145_v7 = vmul.f32 %v498_v49, %v464_v18 }
  0x81   :  { %550 = vmatprep.mubr.msk.bf16.mxu0 %vm274_vm0, %v589_v8  ;;  %558 = vmatprep.mubr.msk.bf16.mxu1 %vm274_vm0, %v590_v9  ;;  %v153_v8 = vmul.f32 %v514_v50, %v464_v18 }
  0x82   :  { %v168_v49 = vadd.f32 %v892_v31, %v145_v7 }
  0x83   :  { %v176_v50 = vadd.f32 %v892_v31, %v153_v8 }
  0x88   :  { %551 = vmatmul.mubr.msk.bf16.gmra.mrb[4].mxu0 %vm274_vm0, %v591_v10  ;;  %559 = vmatmul.mubr.msk.bf16.gmra.mrb[4].mxu1 %vm274_vm0, %v592_v11 }
 0x153   :  { %v548_v55 = vpop.f32.mrb[0].mxu0  ;;  %v556_v56 = vpop.f32.mrb[0].mxu1 }
 0x154   :  { %v342_v61 = vadd.f32 %v548_v55, %v896_v46  ;;  %v374_v62 = vadd.f32 %v556_v56, %v896_v46  ;;  %v333_v63 = vpop.f32.mrb[1].mxu0  ;;  %v365_v0 = vpop.f32.mrb[1].mxu1 }
 0x155   :  { %v334_v3 = vadd.f32 %v896_v46, %v333_v63  ;;  %v366_v4 = vadd.f32 %v896_v46, %v365_v0  ;;  %v549_v5 = vpop.f32.mrb[2].mxu0  ;;  %v557_v6 = vpop.f32.mrb[2].mxu1 }
 0x156   :  { %v398_v9 = vadd.f32 %v342_v61, %v165_v42  ;;  %v406_v10 = vadd.f32 %v374_v62, %v173_v43  ;;  %v345_v11 = vadd.f32 %v549_v5, %v896_v46  ;;  %v377_v12 = vadd.f32 %v557_v6, %v896_v46  ;;  %v336_v13 = vpop.f32.mrb[3].mxu0  ;;  %v368_v14 = vpop.f32.mrb[3].mxu1 }
 0x157   :  { %v396_v15 = vadd.f32 %v334_v3, %v163_v47  ;;  %v404_v16 = vadd.f32 %v366_v4, %v171_v48  ;;  %v337_v17 = vadd.f32 %v896_v46, %v336_v13  ;;  %v369_v19 = vadd.f32 %v896_v46, %v368_v14 }
 0x158   :  { %v414_v20 = vmax.f32 %v398_v9, 0.0  ;;  %v422_v21 = vmax.f32 %v406_v10, 0.0  ;;  %v399_v22 = vadd.f32 %v345_v11, %v166_v51  ;;  %v407_v23 = vadd.f32 %v377_v12, %v174_v52 }
 0x159   :  { %v412_v24 = vmax.f32 %v396_v15, 0.0  ;;  %v420_v18 = vmax.f32 %v404_v16, 0.0  ;;  %v397_v25 = vadd.f32 %v337_v17, %v164_v53  ;;  %v405_v26 = vadd.f32 %v369_v19, %v172_v54 }
 0x15a   :  { %430 = vst [vmem:[#allocation13 + $0x10] sm:$0xff] %v414_v20  ;;  %438 = vst [vmem:[#allocation13 + $0x50] sm:$0xff] %v422_v21  ;;  %v415_v27 = vmax.f32 %v399_v22, 0.0  ;;  %v423_v28 = vmax.f32 %v407_v23, 0.0  ;;  %v170_v42 = vadd.f32 %v892_v31, %v147_v1  ;;  %v178_v43 = vadd.f32 %v892_v31, %v155_v2 }
 0x15b   :  { %428 = vst [vmem:[#allocation13] sm:$0xff] %v412_v24  ;;  %436 = vst [vmem:[#allocation13 + $0x40] sm:$0xff] %v420_v18  ;;  %v413_v32 = vmax.f32 %v397_v25, 0.0  ;;  %v421_v33 = vmax.f32 %v405_v26, 0.0  ;;  %v552_v34 = vpop.f32.mrb[4].mxu0  ;;  %v560_v35 = vpop.f32.mrb[4].mxu1 }
 0x15c   :  { %431 = vst [vmem:[#allocation13 + $0x18] sm:$0xff] %v415_v27  ;;  %439 = vst [vmem:[#allocation13 + $0x58] sm:$0xff] %v423_v28  ;;  %v358_v38 = vadd.f32 %v552_v34, %v896_v46  ;;  %v390_v39 = vadd.f32 %v560_v35, %v896_v46  ;;  %v349_v40 = vpop.f32.mrb[5].mxu0  ;;  %v381_v41 = vpop.f32.mrb[5].mxu1 }
 0x15d   :  { %429 = vst [vmem:[#allocation13 + $0x8] sm:$0xff] %v413_v32  ;;  %437 = vst [vmem:[#allocation13 + $0x48] sm:$0xff] %v421_v33  ;;  %v350_v44 = vadd.f32 %v896_v46, %v349_v40  ;;  %v382_v45 = vadd.f32 %v896_v46, %v381_v41  ;;  %v553_v47 = vpop.f32.mrb[6].mxu0  ;;  %v561_v48 = vpop.f32.mrb[6].mxu1 }
 0x15e   :  { %v402_v51 = vadd.f32 %v358_v38, %v169_v29  ;;  %v410_v52 = vadd.f32 %v390_v39, %v177_v30  ;;  %v361_v53 = vadd.f32 %v553_v47, %v896_v46  ;;  %v393_v54 = vadd.f32 %v561_v48, %v896_v46  ;;  %v352_v55 = vpop.f32.mrb[7].mxu0  ;;  %v384_v56 = vpop.f32.mrb[7].mxu1 }
 0x15f   :  { %v400_v57 = vadd.f32 %v350_v44, %v167_v36  ;;  %v408_v58 = vadd.f32 %v382_v45, %v175_v37  ;;  %v353_v59 = vadd.f32 %v896_v46, %v352_v55  ;;  %v385_v60 = vadd.f32 %v896_v46, %v384_v56 }
 0x160   :  { %v418_v61 = vmax.f32 %v402_v51, 0.0  ;;  %v426_v62 = vmax.f32 %v410_v52, 0.0  ;;  %v403_v63 = vadd.f32 %v361_v53, %v170_v42  ;;  %v411_v31 = vadd.f32 %v393_v54, %v178_v43 }
 0x161   :  { %v416_v0 = vmax.f32 %v400_v57, 0.0  ;;  %v424_v1 = vmax.f32 %v408_v58, 0.0  ;;  %v401_v2 = vadd.f32 %v353_v59, %v168_v49  ;;  %v409_v3 = vadd.f32 %v385_v60, %v176_v50 }
 0x162   :  { %434 = vst [vmem:[#allocation13 + $0x30] sm:$0xff] %v418_v61  ;;  %442 = vst [vmem:[#allocation13 + $0x70] sm:$0xff] %v426_v62  ;;  %v419_v4 = vmax.f32 %v403_v63, 0.0  ;;  %v427_v5 = vmax.f32 %v411_v31, 0.0 }
 0x163   :  { %432 = vst [vmem:[#allocation13 + $0x20] sm:$0xff] %v416_v0  ;;  %440 = vst [vmem:[#allocation13 + $0x60] sm:$0xff] %v424_v1  ;;  %v417_v6 = vmax.f32 %v401_v2, 0.0  ;;  %v425_v7 = vmax.f32 %v409_v3, 0.0 }
 0x164   :  { %435 = vst [vmem:[#allocation13 + $0x38] sm:$0xff] %v419_v4  ;;  %443 = vst [vmem:[#allocation13 + $0x78] sm:$0xff] %v427_v5 }
 0x165   :  { %433 = vst [vmem:[#allocation13 + $0x28] sm:$0xff] %v417_v6  ;;  %441 = vst [vmem:[#allocation13 + $0x68] sm:$0xff] %v425_v7 }
 0x166   :  { %736 = shalt.err (!%p733_p10)
}
 0x167   :  { %s737_s23 = scalar_lea.hbm %s946_s6, 2048 }
 0x168   :  { %p738_p11 = scmp.ne.s32.totalorder %s946_s6, %s737_s23  ;;  %p741_p12 = scmp.lt.u32.totalorder %s737_s23, %s946_s6 }
 0x16a   :  { %p743_p13 = pnand %p741_p12, %p738_p11 }
 0x16c   :  { %746 = shalt.err (!%p743_p13)
}
 0x16d   :  { %s766_s28 = smov 128   ;;  %s767_s29 = smov 8  }
 0x16e   :  { %455 = dma.vmem_to_hbm [thread:$0]  %s450_s14, 2048, %s946_s6, [#allocation4], %s766_s28, %s766_s28, %s767_s29  }
 0x16f   :  { %755 = dma.done.wait [#allocation4], 2048  }
 0x170   :  { %756 = vsyncadd [#allocation4], 4294965248 }
 0x171   :  { %459 = vsyncpa [#allocation3], 1 }
 0x172   :  { %460 = vsyncpa [#allocation6], 1 }
 0x173   :  { %461 = vsyncpa [#allocation9], 1 }
 0x174   :  { %462 = vsyncpa [#allocation12], 1 }
 0x175   :  { %463 = vsyncpa [#allocation4], 1 }

// kernel: _lambda_.4
= control target key start
LH: loop header
LB: loop body
LE: loop exit
PB: predicated region body
PF: predicated region fallthrough
CT: control target
= control target key end

     0   :  { %12 = vsyncpa [#allocation3], 0  ;;  %s6245_s0 = inlined_call_operand.hbm [shape: bf16[36,18,32], index: 0, kind: input, shape index: {}]   ;;  %s6246_s1 = inlined_call_operand.hbm [shape: f32[1,32], index: 1, kind: input, shape index: {}]   ;;  %s6247_s2 = inlined_call_operand.hbm [shape: f32[1,32], index: 2, kind: input, shape index: {}]   ;;  %s6248_s3 = inlined_call_operand.hbm [shape: bf16[9,32,32], index: 3, kind: input, shape index: {}]   ;;  %s6249_s4 = inlined_call_operand.hbm [shape: bf16[512,32], index: 4, kind: output, shape index: {0}]   ;;  %s6250_s5 = inlined_call_operand.hbm [shape: f32[16,32], index: 5, kind: output, shape index: {1}]   ;;  %s6251_s6 = inlined_call_operand.hbm [shape: f32[16,32], index: 6, kind: output, shape index: {2}]  }
   0x1   :  { %14 = vsyncpa [#allocation3 + $0x1], 0 }
   0x2   :  { %15 = vsyncpa [#allocation6], 0 }
   0x3   :  { %16 = vsyncpa [#allocation9], 0 }
   0x4   :  { %17 = vsyncpa [#allocation4], 0 }
   0x5   :  { %19 = vsyncpa [#allocation4 + $0x1], 0 }
   0x6   :  { %20 = vsyncpa [#allocation12], 0 }
   0x7   :  { %22 = vsyncpa [#allocation12 + $0x1], 0  ;;  %s5004_s21 = smov 0   ;;  %s5006_s22 = smov 0  }
   0x8   :  { %s5008_s23 = smov 0   ;;  %s5010_s24 = smov 0  }
   0x9 LB: > { %s5025_s25 = sadd.s32 4294967295, %s4954_s24   ;;  %s6255_s26 = sadd.s32 4294967294, %s4954_s24   ;;  %s4954_s24 = sphi %s5010_s24, %s6287_s24   ;;  %s4950_s23 = sphi %s5008_s23, %s6286_s23   ;;  %s4946_s22 = sphi %s5006_s22, %s6285_s22   ;;  %s4942_s21 = sphi %s5004_s21, %s6284_s21  }
   0xa   : > { %p48_p0 = scmp.ne.s32.totalorder %s4946_s22, %s4942_s21  ;;  %p6252_p1 = scmp.eq.s32.totalorder %s5025_s25, 0 }
   0xb   : > { %p141_p3 = scmp.eq.s32.totalorder %s6255_s26, 1  ;;  %p3553_p5 = scmp.ge.s32.totalorder %s4954_s24, 1 }
   0xc   : > { %p5036_p4 = por %p6252_p1, %p48_p0  ;;  %p200_p7 = scmp.lt.s32.totalorder %s4954_s24, 3 }
   0xd   : > { %p5041_p6 = por %p141_p3, %p48_p0  ;;  %s4956_s30 = smov [#allocation5]  }
   0xe   : > { %s6261_s27 = scalar_select %p5036_p4, 1, 0 }
   0xf   : > { %s6262_s28 = scalar_select %p5041_p6, 1, 0 }
  0x10   : > { %p5046_p8 = pnand %p3553_p5, %p200_p7  ;;  %s213_s7 = sshll.u32 %s4956_s30, 4  ;;  %s214_s7 = int_to_ptr.vmem [resolvable:$true] %s213_s7 }
  0x11   : > { %s4957_s9 = smov [#allocation7]   ;;  %s4958_s11 = smov [#allocation8]  }
  0x12   : > { %s6263_s29 = scalar_select %p5046_p8, 1, 0 }
  0x13   : > { %p4611_p10 = pneg %p5046_p8  ;;  %s224_s10 = sshll.u32 %s4957_s9, 4  ;;  %s5059_s10 = int_to_ptr.vmem [resolvable:$true] %s224_s10 }
  0x14   : > { %s234_s12 = sshll.u32 %s4958_s11, 4  ;;  %s4706_s15 = scalar_lea.hbm %s6246_s1, 16  ;;  %s5061_s12 = int_to_ptr.vmem [resolvable:$true] %s234_s12 }
  0x15   : > { %p5055_p11 = pnand %p4611_p10, %p6252_p1  ;;  %p4707_p12 = scmp.ne.s32.totalorder %s6246_s1, %s4706_s15 }
  0x16   : > { %p4713_p5 = scmp.lt.u32.totalorder %s4706_s15, %s6246_s1 }
  0x17   : > { %p5071_p13 = pneg %p5055_p11 }
  0x19   : > { %p4709_p0 = pnand %p5071_p13, %p4707_p12 }
  0x1b   : > { %p4710_p3 = pneg %p4709_p0 }
  0x1d   : > { %p4715_p7 = pnand %p4713_p5, %p4710_p3 }
  0x1f   : > { %4718 = shalt.err (!%p4715_p7)
}
  0x20   : > { %s4719_s30 = scalar_lea.vmem %s214_s7, 16  ;;  %s4726_s9 = scalar_lea.vmem %s214_s7, 32 }
  0x21   : > { %p4720_p10 = scmp.ne.s32.totalorder %s214_s7, %s4719_s30  ;;  %p4727_p2 = scmp.lt.s32.totalorder %s214_s7, %s214_s7 }
  0x22   : > { %p4728_p6 = scmp.lt.s32.totalorder %s4726_s9, %s4719_s30 }
  0x23   : > { %p4722_p9 = pnand %p4720_p10, %p5071_p13 }
  0x24   : > { %p4729_p4 = por %p4728_p6, %p4727_p2 }
  0x25   : > { %p4723_p1 = pneg %p4722_p9 }
  0x27   : > { %p4730_p8 = pnand %p4729_p4, %p4723_p1 }
  0x29   : > { %4733 = shalt.err (!%p4730_p8)
}
  0x2a   : > { %4614 = dma.hbm_to_vmem [thread:$0]  (!%p5055_p11), %s6246_s1, 16, %s214_s7, [#allocation6]  }
  0x2b   : > { %s4734_s16 = scalar_lea.hbm %s6247_s2, 16 }
  0x2c   : > { %p4735_p9 = scmp.ne.s32.totalorder %s6247_s2, %s4734_s16  ;;  %p4741_p1 = scmp.lt.u32.totalorder %s4734_s16, %s6247_s2 }
  0x2e   : > { %p4737_p12 = pnand %p4735_p9, %p5071_p13 }
  0x30   : > { %p4738_p2 = pneg %p4737_p12 }
  0x32   : > { %p4743_p4 = pnand %p4741_p1, %p4738_p2 }
  0x34   : > { %4746 = shalt.err (!%p4743_p4)
}
  0x35   : > { %s4747_s7 = scalar_lea.vmem %s5059_s10, 16  ;;  %s4754_s9 = scalar_lea.vmem %s5059_s10, 32 }
  0x36   : > { %p4748_p6 = scmp.ne.s32.totalorder %s5059_s10, %s4747_s7  ;;  %p4755_p3 = scmp.lt.s32.totalorder %s5059_s10, %s5059_s10 }
  0x37   : > { %p4756_p5 = scmp.lt.s32.totalorder %s4754_s9, %s4747_s7 }
  0x38   : > { %p4750_p8 = pnand %p4748_p6, %p5071_p13 }
  0x39   : > { %p4757_p7 = por %p4756_p5, %p4755_p3 }
  0x3a   : > { %p4751_p0 = pneg %p4750_p8 }
  0x3c   : > { %p4758_p10 = pnand %p4757_p7, %p4751_p0 }
  0x3e   : > { %4761 = shalt.err (!%p4758_p10)
}
  0x3f   : > { %4617 = dma.hbm_to_vmem [thread:$0]  (!%p5055_p11), %s6247_s2, 16, %s5059_s10, [#allocation6]  }
  0x40   : > { %s4762_s16 = scalar_lea.hbm %s6248_s3, 2304 }
  0x41   : > { %p4763_p9 = scmp.ne.s32.totalorder %s6248_s3, %s4762_s16  ;;  %p4769_p1 = scmp.lt.u32.totalorder %s4762_s16, %s6248_s3 }
  0x43   : > { %p4765_p12 = pnand %p4763_p9, %p5071_p13 }
  0x45   : > { %p4766_p2 = pneg %p4765_p12 }
  0x47   : > { %p4771_p4 = pnand %p4769_p1, %p4766_p2 }
  0x49   : > { %4774 = shalt.err (!%p4771_p4)
}
  0x4a   : > { %s4775_s10 = scalar_lea.vmem %s5061_s12, 2304  ;;  %p4783_p3 = scmp.lt.s32.totalorder %s5061_s12, %s5061_s12 }
  0x4b   : > { %p4776_p6 = scmp.ne.s32.totalorder %s5061_s12, %s4775_s10  ;;  %p4784_p5 = scmp.lt.s32.totalorder %s4775_s10, %s4775_s10 }
  0x4d   : > { %p4778_p8 = pnand %p4776_p6, %p5071_p13  ;;  %p4785_p7 = por %p4784_p5, %p4783_p3 }
  0x4f   : > { %p4779_p0 = pneg %p4778_p8 }
  0x51   : > { %p4786_p10 = pnand %p4785_p7, %p4779_p0 }
  0x53   : > { %4789 = shalt.err (!%p4786_p10)
}
  0x54   : > { %s6256_s7 = smov 64   ;;  %s6257_s18 = smov 4  }
  0x55   : > { %4620 = dma.hbm_to_vmem [thread:$0]  (!%p5055_p11), %s6248_s3, 2304, %s5061_s12, [#allocation9], %s6256_s7, %s6256_s7, %s6257_s18  }
  0x56   : > { %s5138_s13 = sadd.s32 1, %s4954_s24   ;;  %s35_s15 = sadd.s32 1, %s4950_s23 }
  0x57   : > { %s32_s14 = ssub.s32 %s4954_s24, %s5138_s13  ;;  %p42_p9 = scmp.ne.s32.totalorder %s4950_s23, %s4946_s22 }
  0x58   : > { %p33_p13 = scmp.eq.s32.totalorder %s32_s14, 0  ;;  %p43_p12 = scmp.eq.s32.totalorder %s4954_s24, 0 }
  0x59   : > { %p6266_p1 = scmp.eq.s32.totalorder %s5025_s25, 1  ;;  %p4638_p6 = scmp.lt.s32.totalorder %s4954_s24, 2 }
  0x5a   : > { %s5147_s16 = scalar_select %p33_p13, %s4950_s23, %s35_s15  }
  0x5b   : > { %p44_p2 = por %p43_p12, %p42_p9  ;;  %p5151_p4 = por %p6266_p1, %p42_p9 }
  0x5c   : > { %s248_s17 = sand.u32 1, %s4950_s23   ;;  %s4639_s12 = smul.u32 3456, %s4954_s24 }
  0x5d   : > { %s4588_s19 = smul.u32 216, %s248_s17  ;;  %p5158_p11 = pnand %p4638_p6, %p44_p2 }
  0x5e   : > { %s5165_s9 = scalar_lea.hbm %s6245_s0, %s4639_s12  ;;  %s5169_s15 = scalar_lea.sflag [#allocation3], %s248_s17 }
  0x5f   : > { %s252_s11 = scalar_lea.vmem [#allocation2], %s4588_s19  ;;  %s4790_s26 = scalar_lea.hbm %s5165_s9, 3456 }
  0x60   : > { %s260_s14 = sshll.u32 %s252_s11, 4  ;;  %p4791_p8 = scmp.ne.s32.totalorder %s5165_s9, %s4790_s26  ;;  %s5167_s14 = int_to_ptr.vmem [resolvable:$true] %s260_s14 }
  0x61   : > { %p4792_p0 = pneg %p5158_p11  ;;  %s4795_s10 = scalar_lea.hbm %s6245_s0, 6912 }
  0x62   : > { %p4796_p7 = scmp.lt.u32.totalorder %s5165_s9, %s6245_s0  ;;  %p4797_p10 = scmp.lt.u32.totalorder %s4795_s10, %s4790_s26 }
  0x63   : > { %p4793_p3 = pnand %p4792_p0, %p4791_p8  ;;  %p4799_p9 = scmp.lt.u32.totalorder %s4790_s26, %s5165_s9 }
  0x64   : > { %p4798_p13 = por %p4797_p10, %p4796_p7 }
  0x65   : > { %p4794_p5 = pneg %p4793_p3 }
  0x66   : > { %p4800_p12 = por %p4799_p9, %p4798_p13 }
  0x68   : > { %p4801_p2 = pnand %p4800_p12, %p4794_p5 }
  0x6a   : > { %4804 = shalt.err (!%p4801_p2)
}
  0x6b   : > { %s4805_s17 = scalar_lea.vmem %s5167_s14, 3456  ;;  %s4961_s19 = smov [#allocation2]  }
  0x6c   : > { %p4806_p1 = scmp.ne.s32.totalorder %s5167_s14, %s4805_s17  ;;  %s4810_s11 = sshll.u32 %s4961_s19, 4  ;;  %s4811_s11 = int_to_ptr.vmem [resolvable:$false] %s4810_s11 }
  0x6d   : > { %s4812_s7 = scalar_lea.vmem %s4811_s11, 6912  ;;  %p4813_p3 = scmp.lt.s32.totalorder %s5167_s14, %s4811_s11 }
  0x6e   : > { %p4808_p6 = pnand %p4806_p1, %p4792_p0  ;;  %p4814_p7 = scmp.lt.s32.totalorder %s4812_s7, %s4805_s17 }
  0x70   : > { %p4809_p8 = pneg %p4808_p6  ;;  %p4815_p10 = por %p4814_p7, %p4813_p3 }
  0x72   : > { %p4816_p13 = pnand %p4815_p10, %p4809_p8 }
  0x74   : > { %4819 = shalt.err (!%p4816_p13)
}
  0x75   : > { %s6269_s26 = smov 4   ;;  %s6270_s18 = smov 64  }
  0x76   : > { %4624 = dma.hbm_to_vmem [thread:$0]  (!%p5158_p11), %s5165_s9, 3456, %s5167_s14, %s5169_s15, %s6270_s18, %s6270_s18, %s6269_s26  }
  0x77   : > { %p6271_p0 = scmp.ne.s32.totalorder %s6263_s29, 0 }
  0x79   : > { %272 = sbr.rel (%p6271_p0) target bundleno = 750 (0x2ee), region = 36 }
  0x80   : > { %s5203_s12 = sand.u32 1, %s4946_s22   ;;  %p6272_p5 = scmp.ne.s32.totalorder %s6261_s27, 0 }
  0x81   : > { %s4590_s30 = smul.u32 216, %s5203_s12  ;;  %s275_s10 = scalar_lea.sflag [#allocation3], %s5203_s12 }
  0x83   : > { %s5207_s17 = scalar_lea.vmem [#allocation2], %s4590_s30 }
  0x84   : > { %4921 = dma.done.wait (%p6272_p5), %s275_s10, 3456  }
  0x85   : > { %4923 = vsyncadd (%p6272_p5), %s275_s10, 4294963840  ;;  %p6273_p11 = scmp.eq.s32.totalorder %s5025_s25, 0 }
  0x87   : > { %4925 = dma.done.wait (%p6273_p11), [#allocation6], 32   ;;  %p6274_p9 = pmov %p6273_p11 }
  0x89   : > { %4927 = vsyncadd (%p6274_p9), [#allocation6], 4294967264  ;;  %p6275_p12 = pmov %p6274_p9 }
  0x8a   : > { %p6276_p2 = pmov %p6274_p9 }
  0x8b   : > { %4929 = dma.done.wait (%p6275_p12), [#allocation9], 2304  }
  0x8c   : > { %4931 = vsyncadd (%p6276_p2), [#allocation9], 4294964992  ;;  %vm942_vm0 = vcmask 261120   ;;  %v4962_v0 = vmov 0   ;;  %v386_v2 = vlaneseq  ;;  %v4685_v3 = vld [vmem:[#allocation8 + $0x10] sm:$0xff]   ;;  %v4686_v5 = vld [vmem:[#allocation8 + $0x40] sm:$0xff]  }
  0x8d   : > { %v5221_v1 = vrot.slane %v4962_v0, 1  ;;  %4004 = vmatprep.subr.bf16.mxu1 %v4685_v3  ;;  %v4687_v6 = vld [vmem:[#allocation8 + $0x18] sm:$0xff]   ;;  %4148 = vmatprep.subr.bf16.mxu0 %v4686_v5  ;;  %v4688_v7 = vld [vmem:[#allocation8 + $0x48] sm:$0xff]   ;;  %v5236_v16 = vld [vmem:[#allocation8] sm:$0xff]   ;;  %vm732_vm3 = vsmask.f32 7424 }
  0x8e   : > { %v5225_v4 = vshrl.u32 %v386_v2, 7  ;;  %4005 = vmatpush3.bf16.msra.mxu1 %v4685_v3  ;;  %4149 = vmatpush3.bf16.msra.mxu0 %v4686_v5  ;;  %v335_v8 = vld [vmem:[%s5207_s17 + $0xc] sm:$0xff]   ;;  %v337_v9 = vld [vmem:[%s5207_s17 + $0x14] sm:$0x1]  ;;  %v3834_v21 = vld [vmem:[%s5207_s17 + $0x18] sm:$0xff]   ;;  %vm1389_vm4 = vcmask 1046528  }
  0x8f   : > { %6277 = vst [vmem:[#allocation19_spill] sm:$0xff] %v5221_v1  ;;  %4008 = vmatprep.mubr.msk.bf16.mxu1 %vm942_vm0, %v5221_v1  ;;  %4006 = vmatprep.subr.bf16.mxu1 %v4687_v6  ;;  %v5232_v11 = vld [vmem:[#allocation5] ss:$0 sm:$0xff]  ;;  %v411_v12 = vunpack.c.l.bf16 %v335_v8  ;;  %v412_v13 = vunpack.c.h.bf16 %v335_v8  ;;  %v413_v14 = vunpack.c.l.bf16 %v337_v9  ;;  %v5234_v15 = vld [vmem:[#allocation7] ss:$0 sm:$0xff]  ;;  %v5242_v20 = vld [vmem:[#allocation8 + $0x50] sm:$0xff]   ;;  %v3804_v23 = vunpack.c.l.bf16 %v3834_v21 }
  0x90   : > { %v5230_v10 = vadd.s32 16, %v5225_v4  ;;  %4150 = vmatprep.subr.bf16.mxu0 %v4688_v7  ;;  %vm390_vm1 = vcmp.ge.s32.totalorder %v5225_v4, 1  ;;  %v340_v22 = vld [vmem:[%s5207_s17 + $0x20] sm:$0x1]  ;;  %v3805_v24 = vunpack.c.h.bf16 %v3834_v21  ;;  %v341_v26 = vld [vmem:[%s5207_s17 + $0x24] sm:$0xff]   ;;  %v3835_v56 = vld [vmem:[%s5207_s17 + $0x30] sm:$0xff]  }
  0x91   : > { %v472_v17 = vmul.f32 %v5232_v11, %v411_v12  ;;  %v473_v18 = vmul.f32 %v5232_v11, %v412_v13  ;;  %v474_v19 = vmul.f32 %v5232_v11, %v413_v14  ;;  %v416_v25 = vunpack.c.l.bf16 %v340_v22  ;;  %v343_v27 = vld [vmem:[%s5207_s17 + $0x2c] sm:$0x1]  ;;  %v346_v13 = vld [vmem:[%s5207_s17 + $0x38] sm:$0x1]  ;;  %s3563_s27 = sshll.u32 %s5203_s12, 7  ;;  %s3801_s20 = sshll.u32 %s5025_s25, 11 }
  0x92   : > { %4007 = vmatpush3.bf16.msra.mxu1 %v4687_v6  ;;  %4151 = vmatpush3.bf16.msra.mxu0 %v4688_v7  ;;  %vm401_vm2 = vcmp.le.s32.totalorder %v5230_v10, 16  ;;  %v417_v31 = vunpack.c.l.bf16 %v341_v26  ;;  %v475_v32 = vmul.f32 %v3804_v23, %v5232_v11  ;;  %v476_v33 = vmul.f32 %v3805_v24, %v5232_v11  ;;  %s5985_s29 = scalar_lea.vmem [#allocation10], %s3563_s27  ;;  %s6118_s19 = scalar_lea.hbm %s6249_s4, %s3801_s20 }
  0x93   : > { %4040 = vmatprep.subr.bf16.mxu1 %v5236_v16  ;;  %v533_v28 = vadd.f32 %v5234_v15, %v472_v17  ;;  %v534_v29 = vadd.f32 %v5234_v15, %v473_v18  ;;  %v535_v30 = vadd.f32 %v5234_v15, %v474_v19  ;;  %4184 = vmatprep.subr.bf16.mxu0 %v5242_v20  ;;  %v418_v35 = vunpack.c.h.bf16 %v341_v26  ;;  %v4692_v26 = vld [vmem:[#allocation8 + $0x8] sm:$0xff]   ;;  %s3363_s9 = sshll.u32 %s5985_s29, 4  ;;  %s3340_s11 = scalar_lea.sflag [#allocation4], %s5203_s12  ;;  %s6120_s9 = int_to_ptr.vmem [resolvable:$true] %s3363_s9 }
  0x94   : > { %v477_v34 = vmul.f32 %v5232_v11, %v416_v25  ;;  %v419_v39 = vunpack.c.l.bf16 %v343_v27  ;;  %v536_v40 = vadd.f32 %v5234_v15, %v475_v32  ;;  %v537_v41 = vadd.f32 %v5234_v15, %v476_v33  ;;  %v347_v25 = vld [vmem:[%s5207_s17 + $0x3c] sm:$0xff]   ;;  %s4820_s7 = scalar_lea.vmem %s6120_s9, 2048  ;;  %s4964_s26 = smov [#allocation10]  }
  0x95   : > { %v587_v36 = vmax.f32 %v533_v28, 0.0  ;;  %v588_v37 = vmax.f32 %v534_v29, 0.0  ;;  %v589_v38 = vmax.f32 %v535_v30, 0.0  ;;  %v478_v43 = vmul.f32 %v5232_v11, %v417_v31  ;;  %v349_v31 = vld [vmem:[%s5207_s17 + $0x44] sm:$0x1]  ;;  %p4821_p1 = scmp.ne.s32.totalorder %s6120_s9, %s4820_s7  ;;  %s4824_s18 = sshll.u32 %s4964_s26, 4  ;;  %s4825_s18 = int_to_ptr.vmem [resolvable:$false] %s4824_s18 }
  0x96   : > { %v538_v42 = vadd.f32 %v5234_v15, %v477_v34  ;;  %v479_v46 = vmul.f32 %v5232_v11, %v418_v35  ;;  %v480_v47 = vmul.f32 %v5232_v11, %v419_v39  ;;  %v590_v50 = vmax.f32 %v536_v40, 0.0  ;;  %s4826_s30 = scalar_lea.vmem %s4825_s18, 4096  ;;  %p4827_p3 = scmp.lt.s32.totalorder %s6120_s9, %s4825_s18 }
  0x97   : > { %v641_v44 = vsel %vm390_vm1, %v587_v36, 0.0  ;;  %v643_v45 = vsel %vm401_vm2, %v589_v38, 0.0  ;;  %v591_v51 = vmax.f32 %v537_v41, 0.0  ;;  %v539_v53 = vadd.f32 %v5234_v15, %v478_v43  ;;  %v4691_v36 = vld [vmem:[#allocation8 + $0x58] sm:$0xff]   ;;  %p4822_p6 = pnand %p4821_p1, %p5151_p4  ;;  %p4828_p7 = scmp.lt.s32.totalorder %s4826_s30, %s4820_s7 }
  0x98   : > { %v5267_v48 = vpack.c.bf16 %v588_v37, %v641_v44  ;;  %v5269_v49 = vpack.c.bf16 %v643_v45, %v643_v45  ;;  %v592_v52 = vmax.f32 %v538_v42, 0.0  ;;  %v540_v54 = vadd.f32 %v5234_v15, %v479_v46  ;;  %v3836_v41 = vld [vmem:[%s5207_s17 + $0x48] sm:$0xff]   ;;  %v5316_v46 = vld [vmem:[#allocation8 + $0x20] sm:$0xff]  }
  0x99   : > { %v541_v55 = vadd.f32 %v5234_v15, %v480_v47  ;;  %v644_v60 = vsel %vm390_vm1, %v590_v50, 0.0  ;;  %v593_v63 = vmax.f32 %v539_v53, 0.0  ;;  %v3808_v12 = vunpack.c.l.bf16 %v3835_v56  ;;  %p4823_p8 = pneg %p4822_p6  ;;  %p4829_p10 = por %p4828_p7, %p4827_p3 }
  0x9a   : > { %v746_v57 = vshrl.u32 %v5267_v48, 16  ;;  %v748_v58 = vshll.u32 %v5267_v48, 16  ;;  %v753_v59 = vshll.u32 %v5269_v49, 16  ;;  %v646_v61 = vsel %vm401_vm2, %v592_v52, 0.0 }
  0x9b   : > { %v5282_v62 = vpack.c.bf16 %v591_v51, %v644_v60  ;;  %v594_v0 = vmax.f32 %v540_v54, 0.0  ;;  %v5284_v5 = vpack.c.bf16 %v646_v61, %v646_v61  ;;  %v595_v6 = vmax.f32 %v541_v55, 0.0  ;;  %v5331_v61 = vld [vmem:[#allocation8 + $0x60] sm:$0xff]   ;;  %p4830_p13 = pnand %p4829_p10, %p4823_p8 }
  0x9c   : > { %v750_v2 = vrot.slane %v748_v58, 1  ;;  %v755_v3 = vrot.slane %v753_v59, 1  ;;  %v647_v9 = vsel %vm390_vm1, %v593_v63, 0.0  ;;  %v3809_v24 = vunpack.c.h.bf16 %v3835_v56  ;;  %v352_v56 = vld [vmem:[%s5207_s17 + $0x50] sm:$0x1] }
  0x9d   : > { %v758_v7 = vshrl.u32 %v5282_v62, 16  ;;  %v760_v8 = vshll.u32 %v5282_v62, 16  ;;  %v765_v17 = vshll.u32 %v5284_v5, 16  ;;  %v1397_v18 = vrot.slane %v5284_v5, 1 }
  0x9e   : > { %v751_v14 = vor.u32 %v750_v2, %v746_v57  ;;  %v649_v19 = vsel %vm401_vm2, %v595_v6, 0.0  ;;  %v5295_v22 = vpack.c.bf16 %v594_v0, %v647_v9  ;;  %v422_v29 = vunpack.c.l.bf16 %v346_v13 }
  0x9f   : > { %v762_v21 = vrot.slane %v760_v8, 1  ;;  %v5297_v23 = vpack.c.bf16 %v649_v19, %v649_v19  ;;  %v767_v28 = vrot.slane %v765_v17, 1  ;;  %v481_v30 = vmul.f32 %v3808_v12, %v5232_v11 }
  0xa0   : > { %v756_v27 = vsel %vm732_vm3, %v751_v14, %v755_v3  ;;  %v770_v33 = vshrl.u32 %v5295_v22, 16  ;;  %v772_v34 = vshll.u32 %v5295_v22, 16  ;;  %v482_v37 = vmul.f32 %v3809_v24, %v5232_v11 }
  0xa1   : > { %4009 = vmatmul.mubr.msk.bf16.vlgmr.msra.gmra.mrb[0].mxu1 %vm942_vm0, %v756_v27  ;;  %4152 = vmatprep.mubr.msk.bf16.mxu0 %vm942_vm0, %v756_v27  ;;  %v763_v32 = vor.u32 %v762_v21, %v758_v7  ;;  %v777_v35 = vshll.u32 %v5297_v23, 16  ;;  %v483_v38 = vmul.f32 %v5232_v11, %v422_v29  ;;  %v542_v39 = vadd.f32 %v5234_v15, %v481_v30 }
  0xa2   : > { %4041 = vmatpush3.bf16.msra.mxu1 %v5236_v16  ;;  %v423_v40 = vunpack.c.l.bf16 %v347_v25  ;;  %v774_v43 = vrot.slane %v772_v34, 1  ;;  %v424_v45 = vunpack.c.h.bf16 %v347_v25  ;;  %v543_v16 = vadd.f32 %v5234_v15, %v482_v37 }
  0xa3   : > { %v5314_v42 = vsel %vm732_vm3, %v763_v32, %v767_v28  ;;  %v779_v44 = vrot.slane %v777_v35, 1  ;;  %4042 = vmatprep.subr.bf16.mxu1 %v4692_v26  ;;  %v544_v47 = vadd.f32 %v5234_v15, %v483_v38  ;;  %v596_v50 = vmax.f32 %v542_v39, 0.0 }
  0xa4   : > { %4153 = vmatmul.mubr.msk.bf16.vlgmr.msra.gmra.mrb[0].mxu0 %vm942_vm0, %v5314_v42  ;;  %4012 = vmatprep.mubr.msk.bf16.mxu1 %vm942_vm0, %v5314_v42  ;;  %v425_v51 = vunpack.c.l.bf16 %v349_v31  ;;  %v775_v52 = vor.u32 %v774_v43, %v770_v33  ;;  %v484_v53 = vmul.f32 %v5232_v11, %v423_v40  ;;  %v485_v54 = vmul.f32 %v5232_v11, %v424_v45  ;;  %v353_v33 = vld [vmem:[%s5207_s17 + $0x54] sm:$0xff]   ;;  %v355_v43 = vld [vmem:[%s5207_s17 + $0x5c] sm:$0x1] }
  0xa5   : > { %4185 = vmatpush3.bf16.msra.mxu0 %v5242_v20  ;;  %v3812_v55 = vunpack.c.l.bf16 %v3836_v41  ;;  %v597_v57 = vmax.f32 %v543_v16, 0.0  ;;  %v598_v58 = vmax.f32 %v544_v47, 0.0  ;;  %v650_v59 = vsel %vm390_vm1, %v596_v50, 0.0 }
  0xa6   : > { %v486_v60 = vmul.f32 %v5232_v11, %v425_v51  ;;  %4186 = vmatprep.subr.bf16.mxu0 %v4691_v36  ;;  %4043 = vmatpush3.bf16.msra.mxu1 %v4692_v26  ;;  %v5334_v20 = vsel %vm732_vm3, %v775_v52, %v779_v44  ;;  %v545_v63 = vadd.f32 %v5234_v15, %v484_v53  ;;  %v3813_v2 = vunpack.c.h.bf16 %v3836_v41 }
  0xa7   : > { %v546_v0 = vadd.f32 %v5234_v15, %v485_v54  ;;  %4076 = vmatprep.subr.bf16.mxu1 %v5316_v46  ;;  %4156 = vmatprep.mubr.msk.bf16.mxu0 %vm942_vm0, %v5334_v20  ;;  %v652_v3 = vsel %vm401_vm2, %v598_v58, 0.0  ;;  %v5343_v6 = vpack.c.bf16 %v597_v57, %v650_v59  ;;  %v428_v8 = vunpack.c.l.bf16 %v352_v56  ;;  %v3837_v54 = vld [vmem:[%s5207_s17 + $0x60] sm:$0xff]  }
  0xa8   : > { %v547_v7 = vadd.f32 %v5234_v15, %v486_v60  ;;  %v5348_v9 = vpack.c.bf16 %v652_v3, %v652_v3  ;;  %v599_v12 = vmax.f32 %v545_v63, 0.0  ;;  %v487_v14 = vmul.f32 %v3812_v55, %v5232_v11 }
  0xa9   : > { %4013 = vmatmul.mubr.msk.bf16.gmra.mrb[4].mxu1 %vm942_vm0, %v5334_v20  ;;  %v600_v13 = vmax.f32 %v546_v0, 0.0  ;;  %4187 = vmatpush3.bf16.msra.mxu0 %v4691_v36  ;;  %v782_v17 = vshrl.u32 %v5343_v6, 16  ;;  %v784_v19 = vshll.u32 %v5343_v6, 16  ;;  %v488_v24 = vmul.f32 %v3813_v2, %v5232_v11  ;;  %v358_v2 = vld [vmem:[%s5207_s17 + $0x68] sm:$0x1] }
  0xaa   : > { %v601_v21 = vmax.f32 %v547_v7, 0.0  ;;  %4220 = vmatprep.subr.bf16.mxu0 %v5331_v61  ;;  %v789_v25 = vshll.u32 %v5348_v9, 16  ;;  %v653_v26 = vsel %vm390_vm1, %v599_v12, 0.0  ;;  %v489_v27 = vmul.f32 %v5232_v11, %v428_v8 }
  0xab   : > { %v548_v28 = vadd.f32 %v5234_v15, %v487_v14  ;;  %v786_v29 = vrot.slane %v784_v19, 1  ;;  %v5362_v31 = vpack.c.bf16 %v600_v13, %v653_v26  ;;  %v549_v32 = vadd.f32 %v5234_v15, %v488_v24 }
  0xac   : > { %v655_v30 = vsel %vm401_vm2, %v601_v21, 0.0  ;;  %v791_v34 = vrot.slane %v789_v25, 1  ;;  %v550_v36 = vadd.f32 %v5234_v15, %v489_v27  ;;  %v429_v47 = vunpack.c.l.bf16 %v353_v33  ;;  %v359_v27 = vld [vmem:[%s5207_s17 + $0x6c] sm:$0xff]  }
  0xad   : > { %v5366_v35 = vpack.c.bf16 %v655_v30, %v655_v30  ;;  %v602_v37 = vmax.f32 %v548_v28, 0.0  ;;  %v787_v38 = vor.u32 %v786_v29, %v782_v17  ;;  %v794_v39 = vshrl.u32 %v5362_v31, 16 }
  0xae   : > { %v796_v40 = vshll.u32 %v5362_v31, 16  ;;  %v603_v41 = vmax.f32 %v549_v32, 0.0  ;;  %v604_v45 = vmax.f32 %v550_v36, 0.0  ;;  %v430_v53 = vunpack.c.h.bf16 %v353_v33 }
  0xaf   : > { %v801_v44 = vshll.u32 %v5366_v35, 16  ;;  %v656_v16 = vsel %vm390_vm1, %v602_v37, 0.0  ;;  %v5376_v50 = vsel %vm732_vm3, %v787_v38, %v791_v34  ;;  %v431_v57 = vunpack.c.l.bf16 %v355_v43  ;;  %v361_v38 = vld [vmem:[%s5207_s17 + $0x74] sm:$0x1] }
  0xb0   : > { %v798_v51 = vrot.slane %v796_v40, 1  ;;  %v5378_v52 = vpack.c.bf16 %v603_v41, %v656_v16  ;;  %4157 = vmatmul.mubr.msk.bf16.gmra.mrb[4].mxu0 %vm942_vm0, %v5376_v50  ;;  %4016 = vmatprep.mubr.msk.bf16.mxu1 %vm942_vm0, %v5376_v50  ;;  %v658_v56 = vsel %vm401_vm2, %v604_v45, 0.0  ;;  %v490_v58 = vmul.f32 %v5232_v11, %v429_v47 }
  0xb1   : > { %v803_v55 = vrot.slane %v801_v44, 1  ;;  %v5388_v60 = vpack.c.bf16 %v658_v56, %v658_v56  ;;  %v491_v3 = vmul.f32 %v5232_v11, %v430_v53  ;;  %v492_v7 = vmul.f32 %v5232_v11, %v431_v57 }
  0xb2   : > { %v799_v59 = vor.u32 %v798_v51, %v794_v39  ;;  %v806_v63 = vshrl.u32 %v5378_v52, 16  ;;  %v808_v0 = vshll.u32 %v5378_v52, 16  ;;  %v551_v8 = vadd.f32 %v5234_v15, %v490_v58 }
  0xb3   : > { %v3816_v12 = vunpack.c.l.bf16 %v3837_v54  ;;  %v813_v17 = vshll.u32 %v5388_v60, 16  ;;  %v3817_v19 = vunpack.c.h.bf16 %v3837_v54  ;;  %v552_v21 = vadd.f32 %v5234_v15, %v491_v3 }
  0xb4   : > { %v5397_v13 = vsel %vm732_vm3, %v799_v59, %v803_v55  ;;  %v810_v14 = vrot.slane %v808_v0, 1  ;;  %v553_v24 = vadd.f32 %v5234_v15, %v492_v7  ;;  %v605_v25 = vmax.f32 %v551_v8, 0.0 }
  0xb5   : > { %4017 = vmatmul.mubr.msk.bf16.gmra.mrb[8].mxu1 %vm942_vm0, %v5397_v13  ;;  %4160 = vmatprep.mubr.msk.bf16.mxu0 %vm942_vm0, %v5397_v13  ;;  %v434_v26 = vunpack.c.l.bf16 %v358_v2  ;;  %v815_v29 = vrot.slane %v813_v17, 1  ;;  %v493_v30 = vmul.f32 %v3816_v12, %v5232_v11  ;;  %v494_v32 = vmul.f32 %v3817_v19, %v5232_v11 }
  0xb6   : > { %v811_v28 = vor.u32 %v810_v14, %v806_v63  ;;  %v606_v33 = vmax.f32 %v552_v21, 0.0  ;;  %v607_v34 = vmax.f32 %v553_v24, 0.0  ;;  %v659_v36 = vsel %vm390_vm1, %v605_v25, 0.0 }
  0xb7   : > { %v495_v37 = vmul.f32 %v5232_v11, %v434_v26  ;;  %v554_v40 = vadd.f32 %v5234_v15, %v493_v30  ;;  %v555_v41 = vadd.f32 %v5234_v15, %v494_v32  ;;  %v435_v43 = vunpack.c.l.bf16 %v359_v27 }
  0xb8   : > { %v5414_v39 = vsel %vm732_vm3, %v811_v28, %v815_v29  ;;  %v661_v44 = vsel %vm401_vm2, %v607_v34, 0.0  ;;  %v5424_v45 = vpack.c.bf16 %v606_v33, %v659_v36  ;;  %v436_v47 = vunpack.c.h.bf16 %v359_v27  ;;  %v3838_v34 = vld [vmem:[%s5207_s17 + $0x78] sm:$0xff]  }
  0xb9   : > { %4161 = vmatmul.mubr.msk.bf16.gmra.mrb[8].mxu0 %vm942_vm0, %v5414_v39  ;;  %4020 = vmatprep.mubr.msk.bf16.mxu1 %vm942_vm0, %v5414_v39  ;;  %v556_v16 = vadd.f32 %v5234_v15, %v495_v37  ;;  %v5427_v51 = vpack.c.bf16 %v661_v44, %v661_v44  ;;  %v608_v53 = vmax.f32 %v554_v40, 0.0  ;;  %v609_v54 = vmax.f32 %v555_v41, 0.0 }
  0xba   : > { %v437_v55 = vunpack.c.l.bf16 %v361_v38  ;;  %v818_v56 = vshrl.u32 %v5424_v45, 16  ;;  %v820_v57 = vshll.u32 %v5424_v45, 16  ;;  %v496_v59 = vmul.f32 %v5232_v11, %v435_v43 }
  0xbb   : > { %v610_v58 = vmax.f32 %v556_v16, 0.0  ;;  %v825_v63 = vshll.u32 %v5427_v51, 16  ;;  %v662_v0 = vsel %vm390_vm1, %v608_v53, 0.0  ;;  %v497_v2 = vmul.f32 %v5232_v11, %v436_v47  ;;  %v364_v47 = vld [vmem:[%s5207_s17 + $0x80] sm:$0x1] }
  0xbc   : > { %v498_v3 = vmul.f32 %v5232_v11, %v437_v55  ;;  %v822_v7 = vrot.slane %v820_v57, 1  ;;  %v5439_v12 = vpack.c.bf16 %v609_v54, %v662_v0  ;;  %v557_v14 = vadd.f32 %v5234_v15, %v496_v59  ;;  %v367_v0 = vld [vmem:[%s5207_s17 + $0x8c] sm:$0x1] }
  0xbd   : > { %v664_v8 = vsel %vm401_vm2, %v610_v58, 0.0  ;;  %v827_v17 = vrot.slane %v825_v63, 1  ;;  %v558_v21 = vadd.f32 %v5234_v15, %v497_v2  ;;  %v1393_v33 = vrot.slane %v5267_v48, 1 }
  0xbe   : > { %v5442_v19 = vpack.c.bf16 %v664_v8, %v664_v8  ;;  %v559_v24 = vadd.f32 %v5234_v15, %v498_v3  ;;  %v823_v25 = vor.u32 %v822_v7, %v818_v56  ;;  %v830_v26 = vshrl.u32 %v5439_v12, 16  ;;  %v365_v56 = vld [vmem:[%s5207_s17 + $0x84] sm:$0xff]  }
  0xbf   : > { %v832_v27 = vshll.u32 %v5439_v12, 16  ;;  %v611_v28 = vmax.f32 %v557_v14, 0.0  ;;  %v612_v30 = vmax.f32 %v558_v21, 0.0  ;;  %v1394_v40 = vrot.slane %v5269_v49, 1 }
  0xc0   : > { %v837_v29 = vshll.u32 %v5442_v19, 16  ;;  %v613_v32 = vmax.f32 %v559_v24, 0.0  ;;  %v5452_v36 = vsel %vm732_vm3, %v823_v25, %v827_v17  ;;  %v1396_v16 = vrot.slane %v5282_v62, 1 }
  0xc1   : > { %v834_v37 = vrot.slane %v832_v27, 1  ;;  %v665_v38 = vsel %vm390_vm1, %v611_v28, 0.0  ;;  %4021 = vmatmul.mubr.msk.bf16.gmra.mrb[12].mxu1 %vm942_vm0, %v5452_v36  ;;  %4164 = vmatprep.mubr.msk.bf16.mxu0 %vm942_vm0, %v5452_v36  ;;  %v5470_v49 = vsel %vm1389_vm4, %v1393_v33, %v1394_v40  ;;  %v3820_v55 = vunpack.c.l.bf16 %v3838_v34 }
  0xc2   : > { %v839_v41 = vrot.slane %v837_v29, 1  ;;  %v667_v43 = vsel %vm401_vm2, %v613_v32, 0.0  ;;  %v5463_v44 = vpack.c.bf16 %v612_v30, %v665_v38  ;;  %v5478_v59 = vsel %vm1389_vm4, %v1396_v16, %v1397_v18 }
  0xc3   : > { %v835_v53 = vor.u32 %v834_v37, %v830_v26  ;;  %v5467_v54 = vpack.c.bf16 %v667_v43, %v667_v43  ;;  %v3821_v63 = vunpack.c.h.bf16 %v3838_v34  ;;  %v440_v7 = vunpack.c.l.bf16 %v364_v47 }
  0xc4   : > { %v842_v57 = vshrl.u32 %v5463_v44, 16  ;;  %v844_v58 = vshll.u32 %v5463_v44, 16  ;;  %v499_v8 = vmul.f32 %v3820_v55, %v5232_v11  ;;  %v441_v14 = vunpack.c.l.bf16 %v365_v56 }
  0xc5   : > { %v5482_v2 = vsel %vm732_vm3, %v835_v53, %v839_v41  ;;  %v849_v3 = vshll.u32 %v5467_v54, 16  ;;  %v500_v18 = vmul.f32 %v3821_v63, %v5232_v11  ;;  %v442_v17 = vunpack.c.h.bf16 %v365_v56 }
  0xc6   : > { %4165 = vmatmul.mubr.msk.bf16.gmra.mrb[12].mxu0 %vm942_vm0, %v5482_v2  ;;  %4024 = vmatprep.mubr.msk.bf16.mxu1 %vm942_vm0, %v5482_v2  ;;  %v846_v5 = vrot.slane %v844_v58, 1  ;;  %v501_v24 = vmul.f32 %v5232_v11, %v440_v7  ;;  %v560_v25 = vadd.f32 %v5234_v15, %v499_v8  ;;  %v443_v26 = vunpack.c.l.bf16 %v367_v0  ;;  %v3839_v0 = vld [vmem:[%s5207_s17 + $0x90] sm:$0xff]  }
  0xc7   : > { %v851_v21 = vrot.slane %v849_v3, 1  ;;  %4188 = vmatprep.mubr.msk.bf16.mxu0 %vm942_vm0, %v5470_v49  ;;  %v561_v28 = vadd.f32 %v5234_v15, %v500_v18  ;;  %v502_v29 = vmul.f32 %v5232_v11, %v441_v14  ;;  %v503_v30 = vmul.f32 %v5232_v11, %v442_v17  ;;  %v4695_v3 = vld [vmem:[#allocation8 + $0x68] sm:$0xff]  }
  0xc8   : > { %v847_v27 = vor.u32 %v846_v5, %v842_v57  ;;  %v562_v32 = vadd.f32 %v5234_v15, %v501_v24  ;;  %v614_v33 = vmax.f32 %v560_v25, 0.0  ;;  %v504_v34 = vmul.f32 %v5232_v11, %v443_v26  ;;  %v370_v24 = vld [vmem:[%s5207_s17 + $0x98] sm:$0x1] }
  0xc9   : > { %v1399_v37 = vrot.slane %v5295_v22, 1  ;;  %v615_v40 = vmax.f32 %v561_v28, 0.0  ;;  %v563_v41 = vadd.f32 %v5234_v15, %v502_v29  ;;  %v564_v43 = vadd.f32 %v5234_v15, %v503_v30 }
  0xca   : > { %v5502_v38 = vsel %vm732_vm3, %v847_v27, %v851_v21  ;;  %v616_v16 = vmax.f32 %v562_v32, 0.0  ;;  %v668_v47 = vsel %vm390_vm1, %v614_v33, 0.0  ;;  %v565_v53 = vadd.f32 %v5234_v15, %v504_v34  ;;  %v5545_v33 = vld [vmem:[#allocation8 + $0x70] sm:$0xff]  }
  0xcb   : > { %4025 = vmatmul.mubr.msk.bf16.gmra.mrb[16].mxu1 %vm942_vm0, %v5502_v38  ;;  %v1400_v55 = vrot.slane %v5297_v23, 1  ;;  %v5512_v56 = vpack.c.bf16 %v615_v40, %v668_v47  ;;  %v617_v57 = vmax.f32 %v563_v41, 0.0  ;;  %v618_v58 = vmax.f32 %v564_v43, 0.0 }
  0xcc   : > { %v1402_v63 = vrot.slane %v5343_v6, 1  ;;  %v670_v7 = vsel %vm401_vm2, %v616_v16, 0.0  ;;  %v619_v8 = vmax.f32 %v565_v53, 0.0  ;;  %v1403_v18 = vrot.slane %v5348_v9, 1 }
  0xcd   : > { %v5519_v5 = vsel %vm1389_vm4, %v1399_v37, %v1400_v55  ;;  %v5524_v23 = vpack.c.bf16 %v670_v7, %v670_v7  ;;  %v854_v14 = vshrl.u32 %v5512_v56, 16  ;;  %v856_v17 = vshll.u32 %v5512_v56, 16  ;;  %v373_v55 = vld [vmem:[%s5207_s17 + $0xa4] sm:$0x1] }
  0xce   : > { %4189 = vmatmul.mubr.msk.bf16.vlgmr.msra.gmra.mrb[0].mxu0 %vm942_vm0, %v5478_v59  ;;  %v671_v21 = vsel %vm390_vm1, %v617_v57, 0.0  ;;  %v673_v25 = vsel %vm401_vm2, %v619_v8, 0.0  ;;  %v5539_v26 = vsel %vm1389_vm4, %v1402_v63, %v1403_v18  ;;  %v3824_v27 = vunpack.c.l.bf16 %v3839_v0 }
  0xcf   : > { %4221 = vmatpush3.bf16.msra.mxu0 %v5331_v61  ;;  %v5534_v9 = vpack.c.bf16 %v618_v58, %v671_v21  ;;  %4192 = vmatprep.mubr.msk.bf16.mxu0 %vm942_vm0, %v5519_v5  ;;  %v858_v28 = vrot.slane %v856_v17, 1  ;;  %v861_v29 = vshll.u32 %v5524_v23, 16  ;;  %v5542_v30 = vpack.c.bf16 %v673_v25, %v673_v25  ;;  %v371_v61 = vld [vmem:[%s5207_s17 + $0x9c] sm:$0xff]  }
  0xd0   : > { %v3825_v32 = vunpack.c.h.bf16 %v3839_v0  ;;  %4222 = vmatprep.subr.bf16.mxu0 %v4695_v3  ;;  %v446_v40 = vunpack.c.l.bf16 %v370_v24  ;;  %v505_v41 = vmul.f32 %v3824_v27, %v5232_v11  ;;  %v447_v0 = vunpack.c.l.bf16 %v371_v61 }
  0xd1   : > { %v866_v34 = vshrl.u32 %v5534_v9, 16  ;;  %v868_v37 = vshll.u32 %v5534_v9, 16  ;;  %v859_v43 = vor.u32 %v858_v28, %v854_v14  ;;  %v863_v16 = vrot.slane %v861_v29, 1 }
  0xd2   : > { %v873_v47 = vshll.u32 %v5542_v30, 16  ;;  %v506_v53 = vmul.f32 %v3825_v32, %v5232_v11  ;;  %v507_v58 = vmul.f32 %v5232_v11, %v446_v40  ;;  %v566_v63 = vadd.f32 %v5234_v15, %v505_v41 }
  0xd3   : > { %v870_v57 = vrot.slane %v868_v37, 1  ;;  %4223 = vmatpush3.bf16.msra.mxu0 %v4695_v3  ;;  %v5556_v7 = vsel %vm732_vm3, %v859_v43, %v863_v16  ;;  %v448_v14 = vunpack.c.h.bf16 %v371_v61  ;;  %v449_v25 = vunpack.c.l.bf16 %v373_v55 }
  0xd4   : > { %v875_v8 = vrot.slane %v873_v47, 1  ;;  %v567_v18 = vadd.f32 %v5234_v15, %v506_v53  ;;  %4256 = vmatprep.subr.bf16.mxu0 %v5545_v33  ;;  %4028 = vmatprep.mubr.msk.bf16.mxu1 %vm942_vm0, %v5556_v7  ;;  %v568_v21 = vadd.f32 %v5234_v15, %v507_v58  ;;  %v620_v24 = vmax.f32 %v566_v63, 0.0  ;;  %v3840_v58 = vld [vmem:[%s5207_s17 + $0xa8] sm:$0xff]  }
  0xd5   : > { %v871_v17 = vor.u32 %v870_v57, %v866_v34  ;;  %v508_v27 = vmul.f32 %v5232_v11, %v447_v0  ;;  %v509_v28 = vmul.f32 %v5232_v11, %v448_v14  ;;  %v1405_v29 = vrot.slane %v5362_v31, 1  ;;  %v376_v14 = vld [vmem:[%s5207_s17 + $0xb0] sm:$0x1] }
  0xd6   : > { %4193 = vmatmul.mubr.msk.bf16.gmra.mrb[4].mxu0 %vm942_vm0, %v5539_v26  ;;  %v621_v3 = vmax.f32 %v567_v18, 0.0  ;;  %v622_v61 = vmax.f32 %v568_v21, 0.0  ;;  %v674_v34 = vsel %vm390_vm1, %v620_v24, 0.0  ;;  %v510_v37 = vmul.f32 %v5232_v11, %v449_v25 }
  0xd7   : > { %v5569_v32 = vsel %vm732_vm3, %v871_v17, %v875_v8  ;;  %v569_v41 = vadd.f32 %v5234_v15, %v508_v27  ;;  %v570_v43 = vadd.f32 %v5234_v15, %v509_v28  ;;  %v1406_v16 = vrot.slane %v5366_v35, 1 }
  0xd8   : > { %6278 = vst [vmem:[#allocation20_spill] sm:$0xff] %v5569_v32  ;;  %4029 = vmatmul.mubr.msk.bf16.gmra.mrb[20].mxu1 %vm942_vm0, %v5569_v32  ;;  %v5576_v40 = vpack.c.bf16 %v621_v3, %v674_v34  ;;  %v676_v47 = vsel %vm401_vm2, %v622_v61, 0.0  ;;  %v571_v53 = vadd.f32 %v5234_v15, %v510_v37  ;;  %v1408_v55 = vrot.slane %v5378_v52, 1  ;;  %v377_v37 = vld [vmem:[%s5207_s17 + $0xb4] sm:$0xff]  }
  0xd9   : > { %v1409_v57 = vrot.slane %v5388_v60, 1  ;;  %v5587_v63 = vpack.c.bf16 %v676_v47, %v676_v47  ;;  %v623_v18 = vmax.f32 %v569_v41, 0.0  ;;  %v624_v35 = vmax.f32 %v570_v43, 0.0 }
  0xda   : > { %v878_v0 = vshrl.u32 %v5576_v40, 16  ;;  %v880_v8 = vshll.u32 %v5576_v40, 16  ;;  %v625_v17 = vmax.f32 %v571_v53, 0.0  ;;  %v5593_v21 = vsel %vm1389_vm4, %v1405_v29, %v1406_v16 }
  0xdb   : > { %v5596_v24 = vsel %vm1389_vm4, %v1408_v55, %v1409_v57  ;;  %v885_v60 = vshll.u32 %v5587_v63, 16  ;;  %v677_v3 = vsel %vm390_vm1, %v623_v18, 0.0  ;;  %4196 = vmatprep.mubr.msk.bf16.mxu0 %vm942_vm0, %v5593_v21  ;;  %v3828_v27 = vunpack.c.l.bf16 %v3840_v58 }
  0xdc   : > { %v882_v25 = vrot.slane %v880_v8, 1  ;;  %v679_v28 = vsel %vm401_vm2, %v625_v17, 0.0  ;;  %v5605_v61 = vpack.c.bf16 %v624_v35, %v677_v3  ;;  %v3829_v29 = vunpack.c.h.bf16 %v3840_v58  ;;  %v379_v58 = vld [vmem:[%s5207_s17 + $0xbc] sm:$0x1] }
  0xdd   : > { %v452_v34 = vunpack.c.l.bf16 %v376_v14  ;;  %v887_v43 = vrot.slane %v885_v60, 1  ;;  %v5608_v16 = vpack.c.bf16 %v679_v28, %v679_v28  ;;  %v511_v47 = vmul.f32 %v3828_v27, %v5232_v11 }
  0xde   : > { %v883_v41 = vor.u32 %v882_v25, %v878_v0  ;;  %4197 = vmatmul.mubr.msk.bf16.gmra.mrb[8].mxu0 %vm942_vm0, %v5596_v24  ;;  %v890_v53 = vshrl.u32 %v5605_v61, 16  ;;  %v892_v55 = vshll.u32 %v5605_v61, 16  ;;  %v512_v57 = vmul.f32 %v3829_v29, %v5232_v11 }
  0xdf   : > { %v513_v8 = vmul.f32 %v5232_v11, %v452_v34  ;;  %v897_v0 = vshll.u32 %v5608_v16, 16  ;;  %v572_v14 = vadd.f32 %v5234_v15, %v511_v47  ;;  %v453_v35 = vunpack.c.l.bf16 %v377_v37 }
  0xe0   : > { %v5619_v18 = vsel %vm732_vm3, %v883_v41, %v887_v43  ;;  %v894_v17 = vrot.slane %v892_v55, 1  ;;  %v573_v25 = vadd.f32 %v5234_v15, %v512_v57  ;;  %v454_v3 = vunpack.c.h.bf16 %v377_v37 }
  0xe1   : > { %4032 = vmatprep.mubr.msk.bf16.mxu1 %vm942_vm0, %v5619_v18  ;;  %v574_v60 = vadd.f32 %v5234_v15, %v513_v8  ;;  %v899_v27 = vrot.slane %v897_v0, 1  ;;  %v626_v28 = vmax.f32 %v572_v14, 0.0  ;;  %v455_v29 = vunpack.c.l.bf16 %v379_v58 }
  0xe2   : > { %v514_v34 = vmul.f32 %v5232_v11, %v453_v35  ;;  %v895_v41 = vor.u32 %v894_v17, %v890_v53  ;;  %v627_v43 = vmax.f32 %v573_v25, 0.0  ;;  %v515_v47 = vmul.f32 %v5232_v11, %v454_v3 }
  0xe3   : > { %v628_v1 = vmax.f32 %v574_v60, 0.0  ;;  %v680_v32 = vsel %vm390_vm1, %v626_v28, 0.0  ;;  %v516_v55 = vmul.f32 %v5232_v11, %v455_v29  ;;  %v1411_v8 = vrot.slane %v5424_v45, 1 }
  0xe4   : > { %v575_v57 = vadd.f32 %v5234_v15, %v514_v34  ;;  %v5635_v37 = vsel %vm732_vm3, %v895_v41, %v899_v27  ;;  %v5639_v53 = vpack.c.bf16 %v627_v43, %v680_v32  ;;  %v576_v0 = vadd.f32 %v5234_v15, %v515_v47 }
  0xe5   : > { %v682_v58 = vsel %vm401_vm2, %v628_v1, 0.0  ;;  %4033 = vmatmul.mubr.msk.bf16.gmra.mrb[24].mxu1 %vm942_vm0, %v5635_v37  ;;  %v577_v35 = vadd.f32 %v5234_v15, %v516_v55  ;;  %v1412_v25 = vrot.slane %v5427_v51, 1  ;;  %v1414_v1 = vrot.slane %v5439_v12, 1 }
  0xe6   : > { %v5644_v14 = vpack.c.bf16 %v682_v58, %v682_v58  ;;  %v629_v17 = vmax.f32 %v575_v57, 0.0  ;;  %v902_v60 = vshrl.u32 %v5639_v53, 16  ;;  %v904_v3 = vshll.u32 %v5639_v53, 16 }
  0xe7   : > { %v630_v27 = vmax.f32 %v576_v0, 0.0  ;;  %v631_v28 = vmax.f32 %v577_v35, 0.0  ;;  %v5655_v34 = vsel %vm1389_vm4, %v1411_v8, %v1412_v25  ;;  %v1415_v51 = vrot.slane %v5442_v19, 1 }
  0xe8   : > { %v909_v32 = vshll.u32 %v5644_v14, 16  ;;  %v683_v29 = vsel %vm390_vm1, %v629_v17, 0.0  ;;  %v906_v41 = vrot.slane %v904_v3, 1  ;;  %4200 = vmatprep.mubr.msk.bf16.mxu0 %vm942_vm0, %v5655_v34  ;;  %v1417_v47 = vrot.slane %v5463_v44, 1 }
  0xe9   : > { %v5657_v43 = vpack.c.bf16 %v630_v27, %v683_v29  ;;  %v685_v57 = vsel %vm401_vm2, %v631_v28, 0.0  ;;  %v1418_v58 = vrot.slane %v5467_v54, 1  ;;  %v5671_v25 = vsel %vm1389_vm4, %v1414_v1, %v1415_v51 }
  0xea   : > { %v911_v55 = vrot.slane %v909_v32, 1  ;;  %v907_v0 = vor.u32 %v906_v41, %v902_v60  ;;  %v5666_v8 = vpack.c.bf16 %v685_v57, %v685_v57  ;;  %4201 = vmatmul.mubr.msk.bf16.gmra.mrb[12].mxu0 %vm942_vm0, %v5671_v25  ;;  %v1420_v60 = vrot.slane %v5512_v56, 1  ;;  %v3841_v32 = vld [vmem:[%s5207_s17 + $0xc0] sm:$0xff]  }
  0xeb   : > { %v914_v35 = vshrl.u32 %v5657_v43, 16  ;;  %v916_v17 = vshll.u32 %v5657_v43, 16  ;;  %v5674_v19 = vsel %vm1389_vm4, %v1417_v47, %v1418_v58  ;;  %v1421_v1 = vrot.slane %v5524_v23, 1  ;;  %v382_v47 = vld [vmem:[%s5207_s17 + $0xc8] sm:$0x1] }
  0xec   : > { %v5677_v3 = vsel %vm732_vm3, %v907_v0, %v911_v55  ;;  %v921_v54 = vshll.u32 %v5666_v8, 16  ;;  %4204 = vmatprep.mubr.msk.bf16.mxu0 %vm942_vm0, %v5674_v19  ;;  %v1423_v41 = vrot.slane %v5534_v9, 1  ;;  %v1424_v51 = vrot.slane %v5542_v30, 1 }
  0xed   : > { %v918_v27 = vrot.slane %v916_v17, 1  ;;  %4036 = vmatprep.mubr.msk.bf16.mxu1 %vm942_vm0, %v5677_v3  ;;  %v3832_v57 = vunpack.c.l.bf16 %v3841_v32  ;;  %v5698_v58 = vsel %vm1389_vm4, %v1420_v60, %v1421_v1  ;;  %v3833_v0 = vunpack.c.h.bf16 %v3841_v32 }
  0xee   : > { %v923_v29 = vrot.slane %v921_v54, 1  ;;  %v458_v23 = vunpack.c.l.bf16 %v382_v47  ;;  %v4963_v17 = vmov 0.0|0.0   ;;  %v1426_v54 = vrot.slane %v5576_v40, 1 }
  0xef   : > { %v919_v28 = vor.u32 %v918_v27, %v914_v35  ;;  %v5702_v35 = vsel %vm1389_vm4, %v1423_v41, %v1424_v51  ;;  %v517_v30 = vmul.f32 %v3832_v57, %v5232_v11  ;;  %v1427_v60 = vrot.slane %v5587_v63, 1  ;;  %v4696_v51 = vld [vmem:[#allocation8 + $0x28] sm:$0xff]   ;;  %v4703_v57 = vld [vmem:[#allocation7] ss:$0 sm:$0xff] }
  0xf0   : > { %v519_v27 = vmul.f32 %v5232_v11, %v458_v23  ;;  %v518_v1 = vmul.f32 %v3833_v0, %v5232_v11  ;;  %v1429_v32 = vrot.slane %v5605_v61, 1  ;;  %v1432_v0 = vrot.slane %v5639_v53, 1 }
  0xf1   : > { %v5693_v55 = vsel %vm732_vm3, %v919_v28, %v923_v29  ;;  %v1430_v28 = vrot.slane %v5608_v16, 1  ;;  %v578_v29 = vadd.f32 %v5234_v15, %v517_v30  ;;  %v5720_v47 = vsel %vm1389_vm4, %v1426_v54, %v1427_v60 }
  0xf2   : > { %4037 = vmatmul.mubr.msk.bf16.gmra.mrb[28].mxu1 %vm942_vm0, %v5693_v55  ;;  %4205 = vmatmul.mubr.msk.bf16.gmra.mrb[16].mxu0 %vm942_vm0, %v5698_v58  ;;  %v580_v41 = vadd.f32 %v5234_v15, %v519_v27  ;;  %v579_v23 = vadd.f32 %v4703_v57, %v518_v1  ;;  %v4698_v15 = vld [vmem:[#allocation8 + $0x30] sm:$0xff]   ;;  %v1435_v27 = vrot.slane %v5657_v43, 1  ;;  %v1436_v54 = vrot.slane %v5666_v8, 1  ;;  %v4700_v57 = vld [vmem:[#allocation8 + $0x38] sm:$0xff]  }
  0xf3   : > { %4044 = vmatprep.mubr.bf16.mxu1 %v4963_v17  ;;  %4208 = vmatprep.mubr.msk.bf16.mxu0 %vm942_vm0, %v5702_v35  ;;  %v5726_v11 = vsel %vm1389_vm4, %v1429_v32, %v1430_v28  ;;  %v632_v63 = vmax.f32 %v578_v29, 0.0  ;;  %vm3134_vm5 = vcmask 257024  }
  0xf4   : > { %v634_v16 = vmax.f32 %v580_v41, 0.0  ;;  %v633_v30 = vmax.f32 %v579_v23, 0.0  ;;  %v5752_v4 = vsel %vm1389_vm4, %v1435_v27, %v1436_v54  ;;  %v4699_v41 = vld [vmem:[#allocation8 + $0x78] sm:$0xff]   ;;  %v4704_v23 = vld [vmem:[#allocation8 + $0x40] sm:$0xff]  }
  0xf5   : > { %v686_v60 = vsel %vm390_vm1, %v632_v63, 0.0 }
  0xf6   : > { %v688_v1 = vsel %vm401_vm2, %v634_v16, 0.0 }
  0xf7   : > { %v5747_v28 = vpack.c.bf16 %v688_v1, %v688_v1 }
  0xf9   : > { %v2136_v8 = vrot.slane %v5747_v28, 1 }
  0xfa   : > { %4045 = vmatmul.mubr.msk.bf16.vlgmr.msra.gmra.mrb[0].mxu1 %vm942_vm0, %v5267_v48  ;;  %4209 = vmatmul.mubr.msk.bf16.gmra.mrb[20].mxu0 %vm942_vm0, %v5720_v47 }
  0xfb   : > { %4077 = vmatpush3.bf16.msra.mxu1 %v5316_v46  ;;  %4048 = vmatprep.mubr.msk.bf16.mxu1 %vm942_vm0, %v5282_v62  ;;  %v1433_v46 = vrot.slane %v5644_v14, 1  ;;  %v5745_v14 = vpack.c.bf16 %v633_v30, %v686_v60 }
  0xfc   : > { %4078 = vmatprep.subr.bf16.mxu1 %v4696_v51  ;;  %4212 = vmatprep.mubr.msk.bf16.mxu0 %vm942_vm0, %v5726_v11 }
  0xfd   : > { %v5743_v32 = vsel %vm1389_vm4, %v1432_v0, %v1433_v46  ;;  %v2135_v10 = vrot.slane %v5745_v14, 1 }
  0xff   : > { %4079 = vmatpush3.bf16.msra.mxu1 %v4696_v51  ;;  %v5763_v29 = vsel %vm1389_vm4, %v2135_v10, %v2136_v8  ;;  %v4701_v51 = vld [vmem:[#allocation8 + $0x80] sm:$0xff]  }
 0x100   : > { %4112 = vmatprep.subr.bf16.mxu1 %v4698_v15 }
 0x102   : > { %4049 = vmatmul.mubr.msk.bf16.gmra.mrb[4].mxu1 %vm942_vm0, %v5295_v22  ;;  %4213 = vmatmul.mubr.msk.bf16.gmra.mrb[24].mxu0 %vm942_vm0, %v5743_v32 }
 0x103   : > { %4052 = vmatprep.mubr.msk.bf16.mxu1 %vm942_vm0, %v5343_v6  ;;  %4216 = vmatprep.mubr.msk.bf16.mxu0 %vm942_vm0, %v5752_v4 }
 0x10a   : > { %4053 = vmatmul.mubr.msk.bf16.gmra.mrb[8].mxu1 %vm942_vm0, %v5362_v31  ;;  %4217 = vmatmul.mubr.msk.bf16.gmra.mrb[28].mxu0 %vm942_vm0, %v5763_v29 }
 0x10b   : > { %4056 = vmatprep.mubr.msk.bf16.mxu1 %vm942_vm0, %v5378_v52  ;;  %4224 = vmatprep.mubr.msk.bf16.mxu0 %vm942_vm0, %v5282_v62 }
 0x112   : > { %4057 = vmatmul.mubr.msk.bf16.gmra.mrb[12].mxu1 %vm942_vm0, %v5424_v45  ;;  %4225 = vmatmul.mubr.msk.bf16.vlgmr.msra.gmra.mrb[0].mxu0 %vm942_vm0, %v5295_v22 }
 0x113   : > { %4060 = vmatprep.mubr.msk.bf16.mxu1 %vm942_vm0, %v5439_v12  ;;  %4257 = vmatpush3.bf16.msra.mxu0 %v5545_v33  ;;  %v5805_v33 = vrot.slane %v4963_v17, 1 }
 0x114   : > { %4228 = vmatprep.mubr.msk.bf16.mxu0 %vm942_vm0, %v5343_v6  ;;  %4258 = vmatprep.subr.bf16.mxu0 %v4699_v41 }
 0x117   : > { %4259 = vmatpush3.bf16.msra.mxu0 %v4699_v41 }
 0x118   : > { %4292 = vmatprep.subr.bf16.mxu0 %v4701_v51 }
 0x11a   : > { %4061 = vmatmul.mubr.msk.bf16.gmra.mrb[16].mxu1 %vm942_vm0, %v5463_v44  ;;  %4229 = vmatmul.mubr.msk.bf16.gmra.mrb[4].mxu0 %vm942_vm0, %v5362_v31 }
 0x11b   : > { %4064 = vmatprep.mubr.msk.bf16.mxu1 %vm942_vm0, %v5512_v56  ;;  %4232 = vmatprep.mubr.msk.bf16.mxu0 %vm942_vm0, %v5378_v52 }
 0x122   : > { %4065 = vmatmul.mubr.msk.bf16.gmra.mrb[20].mxu1 %vm942_vm0, %v5534_v9  ;;  %4233 = vmatmul.mubr.msk.bf16.gmra.mrb[8].mxu0 %vm942_vm0, %v5424_v45 }
 0x123   : > { %4068 = vmatprep.mubr.msk.bf16.mxu1 %vm942_vm0, %v5576_v40  ;;  %4236 = vmatprep.mubr.msk.bf16.mxu0 %vm942_vm0, %v5439_v12 }
 0x12a   : > { %4069 = vmatmul.mubr.msk.bf16.gmra.mrb[24].mxu1 %vm942_vm0, %v5605_v61  ;;  %4237 = vmatmul.mubr.msk.bf16.gmra.mrb[12].mxu0 %vm942_vm0, %v5463_v44 }
 0x12b   : > { %4072 = vmatprep.mubr.msk.bf16.mxu1 %vm942_vm0, %v5639_v53  ;;  %4240 = vmatprep.mubr.msk.bf16.mxu0 %vm942_vm0, %v5512_v56 }
 0x132   : > { %4073 = vmatmul.mubr.msk.bf16.gmra.mrb[28].mxu1 %vm942_vm0, %v5657_v43  ;;  %4241 = vmatmul.mubr.msk.bf16.gmra.mrb[16].mxu0 %vm942_vm0, %v5534_v9 }
 0x133   : > { %4080 = vmatprep.mubr.msk.bf16.mxu1 %vm942_vm0, %v5805_v33  ;;  %4244 = vmatprep.mubr.msk.bf16.mxu0 %vm942_vm0, %v5576_v40 }
 0x13a   : > { %4081 = vmatmul.mubr.msk.bf16.vlgmr.msra.gmra.mrb[0].mxu1 %vm942_vm0, %v5470_v49  ;;  %4245 = vmatmul.mubr.msk.bf16.gmra.mrb[20].mxu0 %vm942_vm0, %v5605_v61  ;;  %v4702_v49 = vld [vmem:[#allocation8 + $0x88] sm:$0xff]  }
 0x13b   : > { %4113 = vmatpush3.bf16.msra.mxu1 %v4698_v15  ;;  %4084 = vmatprep.mubr.msk.bf16.mxu1 %vm942_vm0, %v5478_v59 }
 0x13c   : > { %4114 = vmatprep.subr.bf16.mxu1 %v4700_v57  ;;  %4248 = vmatprep.mubr.msk.bf16.mxu0 %vm942_vm0, %v5639_v53 }
 0x13f   : > { %4115 = vmatpush3.bf16.msra.mxu1 %v4700_v57 }
 0x140   : > { %4328 = vmatprep.subr.bf16.mxu1 %v4704_v23 }
 0x142   : > { %4085 = vmatmul.mubr.msk.bf16.gmra.mrb[4].mxu1 %vm942_vm0, %v5519_v5  ;;  %4249 = vmatmul.mubr.msk.bf16.gmra.mrb[24].mxu0 %vm942_vm0, %v5657_v43 }
 0x143   : > { %4088 = vmatprep.mubr.msk.bf16.mxu1 %vm942_vm0, %v5539_v26  ;;  %4252 = vmatprep.mubr.msk.bf16.mxu0 %vm942_vm0, %v5745_v14 }
 0x14a   : > { %4089 = vmatmul.mubr.msk.bf16.gmra.mrb[8].mxu1 %vm942_vm0, %v5593_v21  ;;  %4253 = vmatmul.mubr.bf16.gmra.mrb[28].mxu0 %v4963_v17 }
 0x14b   : > { %4092 = vmatprep.mubr.msk.bf16.mxu1 %vm942_vm0, %v5596_v24  ;;  %4260 = vmatprep.mubr.msk.bf16.mxu0 %vm942_vm0, %v5314_v42  ;;  %v6279_v42 = vld [vmem:[#allocation20_spill] sm:$0xff] }
 0x152   : > { %4093 = vmatmul.mubr.msk.bf16.gmra.mrb[12].mxu1 %vm942_vm0, %v5655_v34  ;;  %4261 = vmatmul.mubr.msk.bf16.vlgmr.msra.gmra.mrb[0].mxu0 %vm942_vm0, %v5334_v20  ;;  %v1911_v20 = vshll.u32 %v5745_v14, 16 }
 0x153   : > { %4096 = vmatprep.mubr.msk.bf16.mxu1 %vm942_vm0, %v5671_v25  ;;  %4293 = vmatpush3.bf16.msra.mxu0 %v4701_v51 }
 0x154   : > { %4264 = vmatprep.mubr.msk.bf16.mxu0 %vm942_vm0, %v5376_v50  ;;  %4294 = vmatprep.subr.bf16.mxu0 %v4702_v49  ;;  %v1909_v50 = vshrl.u32 %v5745_v14, 16 }
 0x157   : > { %4295 = vmatpush3.bf16.msra.mxu0 %v4702_v49 }
 0x15a   : > { %4097 = vmatmul.mubr.msk.bf16.gmra.mrb[16].mxu1 %vm942_vm0, %v5674_v19  ;;  %4265 = vmatmul.mubr.msk.bf16.gmra.mrb[4].mxu0 %vm942_vm0, %v5397_v13  ;;  %v1913_v13 = vrot.slane %v1911_v20, 1 }
 0x15b   : > { %4100 = vmatprep.mubr.msk.bf16.mxu1 %vm942_vm0, %v5698_v58  ;;  %4268 = vmatprep.mubr.msk.bf16.mxu0 %vm942_vm0, %v5414_v39  ;;  %v4705_v39 = vld [vmem:[#allocation8 + $0x48] sm:$0xff]  }
 0x162   : > { %4101 = vmatmul.mubr.msk.bf16.gmra.mrb[20].mxu1 %vm942_vm0, %v5702_v35  ;;  %4269 = vmatmul.mubr.msk.bf16.gmra.mrb[8].mxu0 %vm942_vm0, %v5452_v36  ;;  %v1914_v36 = vor.u32 %v1913_v13, %v1909_v50 }
 0x163   : > { %4104 = vmatprep.mubr.msk.bf16.mxu1 %vm942_vm0, %v5720_v47  ;;  %4272 = vmatprep.mubr.msk.bf16.mxu0 %vm942_vm0, %v5482_v2 }
 0x16a   : > { %4105 = vmatmul.mubr.msk.bf16.gmra.mrb[24].mxu1 %vm942_vm0, %v5726_v11  ;;  %4273 = vmatmul.mubr.msk.bf16.gmra.mrb[12].mxu0 %vm942_vm0, %v5502_v38 }
 0x16b   : > { %4108 = vmatprep.mubr.msk.bf16.mxu1 %vm942_vm0, %v5743_v32  ;;  %4276 = vmatprep.mubr.msk.bf16.mxu0 %vm942_vm0, %v5556_v7 }
 0x172   : > { %4109 = vmatmul.mubr.msk.bf16.gmra.mrb[28].mxu1 %vm942_vm0, %v5752_v4  ;;  %4277 = vmatmul.mubr.msk.bf16.gmra.mrb[16].mxu0 %vm942_vm0, %v6279_v42 }
 0x173   : > { %4116 = vmatprep.mubr.msk.bf16.mxu1 %vm942_vm0, %v5267_v48  ;;  %4280 = vmatprep.mubr.msk.bf16.mxu0 %vm942_vm0, %v5619_v18  ;;  %v1916_v48 = vshll.u32 %v5747_v28, 16 }
 0x175   : > { %v1918_v2 = vrot.slane %v1916_v48, 1 }
 0x17a   : > { %4117 = vmatmul.mubr.msk.bf16.vlgmr.msra.gmra.mrb[0].mxu1 %vm942_vm0, %v5282_v62  ;;  %4281 = vmatmul.mubr.msk.bf16.gmra.mrb[20].mxu0 %vm942_vm0, %v5635_v37  ;;  %v1919_v62 = vsel %vm732_vm3, %v1914_v36, %v1918_v2 }
 0x17b   : > { %4330 = vmatpush3.bf16.msra.mxu1 %v4704_v23  ;;  %4120 = vmatprep.mubr.msk.bf16.mxu1 %vm942_vm0, %v5295_v22  ;;  %v6280_v22 = vld [vmem:[#allocation19_spill] sm:$0xff] }
 0x17c   : > { %4329 = vmatprep.subr.bf16.mxu1 %v4705_v39  ;;  %4284 = vmatprep.mubr.msk.bf16.mxu0 %vm942_vm0, %v5677_v3 }
 0x17f   : > { %4331 = vmatpush3.bf16.msra.mxu1 %v4705_v39 }
 0x182   : > { %4121 = vmatmul.mubr.msk.bf16.gmra.mrb[4].mxu1 %vm942_vm0, %v5343_v6  ;;  %4285 = vmatmul.mubr.msk.bf16.gmra.mrb[24].mxu0 %vm942_vm0, %v5693_v55 }
 0x183   : > { %4124 = vmatprep.mubr.msk.bf16.mxu1 %vm942_vm0, %v5362_v31  ;;  %4288 = vmatprep.mubr.msk.bf16.mxu0 %vm942_vm0, %v1919_v62 }
 0x18a   : > { %4125 = vmatmul.mubr.msk.bf16.gmra.mrb[8].mxu1 %vm942_vm0, %v5378_v52  ;;  %4289 = vmatmul.mubr.msk.bf16.gmra.mrb[28].mxu0 %vm942_vm0, %v6280_v22 }
 0x18b   : > { %4128 = vmatprep.mubr.msk.bf16.mxu1 %vm942_vm0, %v5424_v45  ;;  %4296 = vmatprep.mubr.msk.bf16.mxu0 %vm942_vm0, %v5478_v59 }
 0x192   : > { %4129 = vmatmul.mubr.msk.bf16.gmra.mrb[12].mxu1 %vm942_vm0, %v5439_v12  ;;  %4297 = vmatmul.mubr.msk.bf16.vlgmr.msra.gmra.mrb[0].mxu0 %vm942_vm0, %v5519_v5 }
 0x193   : > { %4132 = vmatprep.mubr.msk.bf16.mxu1 %vm942_vm0, %v5463_v44  ;;  %4300 = vmatprep.mubr.msk.bf16.mxu0 %vm942_vm0, %v5539_v26 }
 0x19a   : > { %4133 = vmatmul.mubr.msk.bf16.gmra.mrb[16].mxu1 %vm942_vm0, %v5512_v56  ;;  %4301 = vmatmul.mubr.msk.bf16.gmra.mrb[4].mxu0 %vm942_vm0, %v5593_v21 }
 0x19b   : > { %4136 = vmatprep.mubr.msk.bf16.mxu1 %vm942_vm0, %v5534_v9  ;;  %4304 = vmatprep.mubr.msk.bf16.mxu0 %vm942_vm0, %v5596_v24 }
 0x1a2   : > { %4137 = vmatmul.mubr.msk.bf16.gmra.mrb[20].mxu1 %vm942_vm0, %v5576_v40  ;;  %4305 = vmatmul.mubr.msk.bf16.gmra.mrb[8].mxu0 %vm942_vm0, %v5655_v34 }
 0x1a3   : > { %4140 = vmatprep.mubr.msk.bf16.mxu1 %vm942_vm0, %v5605_v61  ;;  %4308 = vmatprep.mubr.msk.bf16.mxu0 %vm942_vm0, %v5671_v25 }
 0x1aa   : > { %4141 = vmatmul.mubr.msk.bf16.gmra.mrb[24].mxu1 %vm942_vm0, %v5639_v53  ;;  %4309 = vmatmul.mubr.msk.bf16.gmra.mrb[12].mxu0 %vm942_vm0, %v5674_v19 }
 0x1ab   : > { %4144 = vmatprep.mubr.msk.bf16.mxu1 %vm942_vm0, %v5657_v43  ;;  %4312 = vmatprep.mubr.msk.bf16.mxu0 %vm942_vm0, %v5698_v58 }
 0x1b2   : > { %4145 = vmatmul.mubr.msk.bf16.gmra.mrb[28].mxu1 %vm942_vm0, %v5745_v14  ;;  %4313 = vmatmul.mubr.msk.bf16.gmra.mrb[16].mxu0 %vm942_vm0, %v5702_v35 }
 0x1b3   : > { %4168 = vmatprep.mubr.msk.bf16.mxu1 %vm942_vm0, %v5502_v38  ;;  %4316 = vmatprep.mubr.msk.bf16.mxu0 %vm942_vm0, %v5720_v47 }
 0x1ba   : > { %4169 = vmatmul.mubr.msk.bf16.vlgmr.msra.gmra.mrb[16].mxu1 %vm942_vm0, %v5556_v7  ;;  %4317 = vmatmul.mubr.msk.bf16.gmra.mrb[20].mxu0 %vm942_vm0, %v5726_v11 }
 0x1bb   : > { %4172 = vmatprep.mubr.msk.bf16.mxu1 %vm942_vm0, %v6279_v42  ;;  %4320 = vmatprep.mubr.msk.bf16.mxu0 %vm942_vm0, %v5743_v32 }
 0x1c2   : > { %4173 = vmatmul.mubr.msk.bf16.gmra.mrb[20].mxu1 %vm942_vm0, %v5619_v18  ;;  %4321 = vmatmul.mubr.msk.bf16.gmra.mrb[24].mxu0 %vm942_vm0, %v5752_v4 }
 0x1c3   : > { %4176 = vmatprep.mubr.msk.bf16.mxu1 %vm942_vm0, %v5635_v37  ;;  %4324 = vmatprep.mubr.msk.bf16.mxu0 %vm942_vm0, %v5763_v29 }
 0x1ca   : > { %4177 = vmatmul.mubr.msk.bf16.gmra.mrb[24].mxu1 %vm942_vm0, %v5677_v3  ;;  %4325 = vmatmul.mubr.msk.bf16.gmra.mrb[28].mxu0 %vm942_vm0, %v5805_v33 }
 0x1cb   : > { %4180 = vmatprep.mubr.msk.bf16.mxu1 %vm942_vm0, %v5693_v55 }
 0x1d2   : > { %4181 = vmatmul.mubr.msk.bf16.gmra.mrb[28].mxu1 %vm942_vm0, %v1919_v62 }
 0x24d   : > { %v4118_v6 = vpop.f32.mrb[0].mxu1 }
 0x24e   : > { %v1750_v31 = vpop.f32.mrb[1].mxu1 }
 0x24f   : > { %v4119_v52 = vpop.f32.mrb[2].mxu1 }
 0x250   : > { %v1753_v45 = vpop.f32.mrb[3].mxu1 }
 0x255   : > { %v4122_v12 = vpop.f32.mrb[4].mxu1 }
 0x256   : > { %v1766_v44 = vpop.f32.mrb[5].mxu1 }
 0x257   : > { %v4123_v59 = vpop.f32.mrb[6].mxu1 }
 0x258   : > { %v1769_v38 = vpop.f32.mrb[7].mxu1 }
 0x25d   : > { %v5968_v56 = vpop.f32.mrb[8].mxu1 }
 0x25e   : > { %v5970_v5 = vpop.f32.mrb[9].mxu1 }
 0x25f   : > { %v5972_v9 = vpop.f32.mrb[10].mxu1 }
 0x260   : > { %v5974_v26 = vpop.f32.mrb[11].mxu1 }
 0x265   : > { %v5976_v7 = vpop.f32.mrb[12].mxu1  ;;  %v4298_v61 = vpop.f32.mrb[0].mxu0 }
 0x266   : > { %v5978_v40 = vpop.f32.mrb[13].mxu1  ;;  %v4332_v18 = vadd.f32 %v4298_v61, %v4118_v6  ;;  %v2847_v37 = vpop.f32.mrb[1].mxu0 }
 0x267   : > { %v5980_v21 = vpop.f32.mrb[14].mxu1  ;;  %v4333_v53 = vadd.f32 %v2847_v37, %v1750_v31  ;;  %v4299_v34 = vpop.f32.mrb[2].mxu0 }
 0x268   : > { %v5983_v24 = vpop.f32.mrb[15].mxu1  ;;  %v3771_v43 = vpack.c.bf16 %v4332_v18, %v4332_v18  ;;  %v4334_v25 = vadd.f32 %v4299_v34, %v4119_v52  ;;  %v2850_v19 = vpop.f32.mrb[3].mxu0  ;;  %v3239_v17 = vmul.f32 %v4332_v18, %v4332_v18  ;;  %v3170_v46 = vsel %vm942_vm0, %v4332_v18, 0.0 }
 0x269   : > { %v3769_v3 = vpack.c.bf16 %v4333_v53, %v4333_v53  ;;  %v3237_v55 = vmul.f32 %v4333_v53, %v4333_v53  ;;  %v4335_v58 = vadd.f32 %v2850_v19, %v1753_v45  ;;  %v3167_v47 = vsel %vm942_vm0, %v4333_v53, 0.0 }
 0x26a   : > { %3137 = vst.msk [vmem:[%s5985_s29 + $0x8] sm:$0xf] %vm3134_vm5, %v3771_v43  ;;  %v3772_v35 = vpack.c.bf16 %v4334_v25, %v4334_v25  ;;  %v3240_v15 = vmul.f32 %v4334_v25, %v4334_v25  ;;  %v3272_v28 = vsel %vm942_vm0, %v3239_v17, 0.0  ;;  %v3172_v8 = vsel %vm942_vm0, %v4334_v25, 0.0 }
 0x26b   : > { %3135 = vst.msk [vmem:[%s5985_s29] sm:$0xf] %vm3134_vm5, %v3769_v3  ;;  %v3770_v11 = vpack.c.bf16 %v4335_v58, %v4335_v58  ;;  %v3168_v63 = vsel %vm942_vm0, %v4335_v58, 0.0  ;;  %v3238_v16 = vmul.f32 %v4335_v58, %v4335_v58  ;;  %v3269_v30 = vsel %vm942_vm0, %v3237_v55, 0.0 }
 0x26c   : > { %3138 = vst.msk [vmem:[%s5985_s29 + $0xc] sm:$0xf] %vm3134_vm5, %v3772_v35  ;;  %v3169_v0 = vadd.f32 %v3168_v63, %v3167_v47  ;;  %v3274_v29 = vsel %vm942_vm0, %v3240_v15, 0.0 }
 0x26d   : > { %3136 = vst.msk [vmem:[%s5985_s29 + $0x4] sm:$0xf] %vm3134_vm5, %v3770_v11  ;;  %v3270_v27 = vsel %vm942_vm0, %v3238_v16, 0.0  ;;  %v4302_v54 = vpop.f32.mrb[4].mxu0 }
 0x26e   : > { %v3171_v60 = vadd.f32 %v3170_v46, %v3169_v0  ;;  %v3271_v1 = vadd.f32 %v3270_v27, %v3269_v30  ;;  %v4336_v32 = vadd.f32 %v4302_v54, %v4122_v12  ;;  %v2863_v14 = vpop.f32.mrb[5].mxu0 }
 0x26f   : > { %v4337_v4 = vadd.f32 %v2863_v14, %v1766_v44  ;;  %v4303_v10 = vpop.f32.mrb[6].mxu0 }
 0x270   : > { %v3273_v41 = vadd.f32 %v3272_v28, %v3271_v1  ;;  %v3775_v51 = vpack.c.bf16 %v4336_v32, %v4336_v32  ;;  %v2866_v33 = vpop.f32.mrb[7].mxu0  ;;  %v3173_v23 = vadd.f32 %v3172_v8, %v3171_v60  ;;  %v4338_v50 = vadd.f32 %v4303_v10, %v4123_v59 }
 0x271   : > { %v3773_v57 = vpack.c.bf16 %v4337_v4, %v4337_v4  ;;  %v3174_v49 = vsel %vm942_vm0, %v4337_v4, 0.0  ;;  %v3241_v42 = vmul.f32 %v4337_v4, %v4337_v4  ;;  %v4339_v13 = vadd.f32 %v2866_v33, %v1769_v38 }
 0x272   : > { %3141 = vst.msk [vmem:[%s5985_s29 + $0x18] sm:$0xf] %vm3134_vm5, %v3775_v51  ;;  %v3275_v20 = vadd.f32 %v3274_v29, %v3273_v41  ;;  %v3175_v48 = vadd.f32 %v3174_v49, %v3173_v23  ;;  %v3243_v36 = vmul.f32 %v4336_v32, %v4336_v32  ;;  %v3776_v62 = vpack.c.bf16 %v4338_v50, %v4338_v50 }
 0x273   : > { %3139 = vst.msk [vmem:[%s5985_s29 + $0x10] sm:$0xf] %vm3134_vm5, %v3773_v57  ;;  %v3276_v39 = vsel %vm942_vm0, %v3241_v42, 0.0  ;;  %v3774_v22 = vpack.c.bf16 %v4339_v13, %v4339_v13  ;;  %v3176_v6 = vsel %vm942_vm0, %v4339_v13, 0.0  ;;  %v3242_v31 = vmul.f32 %v4339_v13, %v4339_v13 }
 0x274   : > { %v3277_v2 = vadd.f32 %v3276_v39, %v3275_v20  ;;  %3142 = vst.msk [vmem:[%s5985_s29 + $0x1c] sm:$0xf] %vm3134_vm5, %v3776_v62  ;;  %v3177_v45 = vadd.f32 %v3176_v6, %v3175_v48  ;;  %v3178_v59 = vsel %vm942_vm0, %v4336_v32, 0.0  ;;  %v3244_v38 = vmul.f32 %v4338_v50, %v4338_v50 }
 0x275   : > { %v4306_v52 = vpop.f32.mrb[8].mxu0  ;;  %3140 = vst.msk [vmem:[%s5985_s29 + $0x14] sm:$0xf] %vm3134_vm5, %v3774_v22  ;;  %v3278_v61 = vsel %vm942_vm0, %v3242_v31, 0.0  ;;  %v3280_v53 = vsel %vm942_vm0, %v3243_v36, 0.0 }
 0x276   : > { %v4340_v12 = vadd.f32 %v4306_v52, %v5968_v56  ;;  %v2879_v44 = vpop.f32.mrb[9].mxu0  ;;  %v3179_v34 = vadd.f32 %v3178_v59, %v3177_v45  ;;  %v3279_v43 = vadd.f32 %v3278_v61, %v3277_v2  ;;  %v3180_v56 = vsel %vm942_vm0, %v4338_v50, 0.0 }
 0x277   : > { %v4341_v18 = vadd.f32 %v2879_v44, %v5970_v5  ;;  %v4307_v37 = vpop.f32.mrb[10].mxu0  ;;  %v3282_v11 = vsel %vm942_vm0, %v3244_v38, 0.0 }
 0x278   : > { %v3779_v25 = vpack.c.bf16 %v4340_v12, %v4340_v12  ;;  %v2882_v19 = vpop.f32.mrb[11].mxu0  ;;  %v3281_v17 = vadd.f32 %v3280_v53, %v3279_v43  ;;  %v3181_v35 = vadd.f32 %v3180_v56, %v3179_v34  ;;  %v4342_v5 = vadd.f32 %v4307_v37, %v5972_v9 }
 0x279   : > { %v3777_v3 = vpack.c.bf16 %v4341_v18, %v4341_v18  ;;  %v3182_v55 = vsel %vm942_vm0, %v4341_v18, 0.0  ;;  %v3245_v58 = vmul.f32 %v4341_v18, %v4341_v18  ;;  %v4343_v47 = vadd.f32 %v2882_v19, %v5974_v26 }
 0x27a   : > { %3145 = vst.msk [vmem:[%s5985_s29 + $0x28] sm:$0xf] %vm3134_vm5, %v3779_v25  ;;  %v3247_v16 = vmul.f32 %v4340_v12, %v4340_v12  ;;  %v3183_v15 = vadd.f32 %v3182_v55, %v3181_v35  ;;  %v3283_v0 = vadd.f32 %v3282_v11, %v3281_v17  ;;  %v3780_v46 = vpack.c.bf16 %v4342_v5, %v4342_v5 }
 0x27b   : > { %3143 = vst.msk [vmem:[%s5985_s29 + $0x20] sm:$0xf] %vm3134_vm5, %v3777_v3  ;;  %v3284_v63 = vsel %vm942_vm0, %v3245_v58, 0.0  ;;  %v3778_v30 = vpack.c.bf16 %v4343_v47, %v4343_v47  ;;  %v3184_v27 = vsel %vm942_vm0, %v4343_v47, 0.0  ;;  %v3246_v54 = vmul.f32 %v4343_v47, %v4343_v47 }
 0x27c   : > { %v3285_v1 = vadd.f32 %v3284_v63, %v3283_v0  ;;  %3146 = vst.msk [vmem:[%s5985_s29 + $0x2c] sm:$0xf] %vm3134_vm5, %v3780_v46  ;;  %v3185_v9 = vadd.f32 %v3184_v27, %v3183_v15  ;;  %v3186_v14 = vsel %vm942_vm0, %v4340_v12, 0.0  ;;  %v3248_v28 = vmul.f32 %v4342_v5, %v4342_v5 }
 0x27d   : > { %v4310_v60 = vpop.f32.mrb[12].mxu0  ;;  %3144 = vst.msk [vmem:[%s5985_s29 + $0x24] sm:$0xf] %vm3134_vm5, %v3778_v30  ;;  %v3286_v4 = vsel %vm942_vm0, %v3246_v54, 0.0  ;;  %v3288_v29 = vsel %vm942_vm0, %v3247_v16, 0.0 }
 0x27e   : > { %v4344_v26 = vadd.f32 %v4310_v60, %v5976_v7  ;;  %v2895_v32 = vpop.f32.mrb[13].mxu0  ;;  %v3187_v41 = vadd.f32 %v3186_v14, %v3185_v9  ;;  %v3287_v51 = vadd.f32 %v3286_v4, %v3285_v1  ;;  %v3188_v7 = vsel %vm942_vm0, %v4342_v5, 0.0 }
 0x27f   : > { %v4345_v10 = vadd.f32 %v2895_v32, %v5978_v40  ;;  %v4311_v8 = vpop.f32.mrb[14].mxu0  ;;  %v3290_v48 = vsel %vm942_vm0, %v3248_v28, 0.0 }
 0x280   : > { %v3783_v33 = vpack.c.bf16 %v4344_v26, %v4344_v26  ;;  %v2898_v57 = vpop.f32.mrb[15].mxu0  ;;  %v3289_v20 = vadd.f32 %v3288_v29, %v3287_v51  ;;  %v3189_v50 = vadd.f32 %v3188_v7, %v3187_v41  ;;  %v4346_v40 = vadd.f32 %v4311_v8, %v5980_v21 }
 0x281   : > { %v3781_v23 = vpack.c.bf16 %v4345_v10, %v4345_v10  ;;  %v3190_v49 = vsel %vm942_vm0, %v4345_v10, 0.0  ;;  %v3249_v42 = vmul.f32 %v4345_v10, %v4345_v10  ;;  %v4347_v13 = vadd.f32 %v2898_v57, %v5983_v24 }
 0x282   : > { %3149 = vst.msk [vmem:[%s5985_s29 + $0x38] sm:$0xf] %vm3134_vm5, %v3783_v33  ;;  %v3191_v36 = vadd.f32 %v3190_v49, %v3189_v50  ;;  %v3291_v2 = vadd.f32 %v3290_v48, %v3289_v20  ;;  %v3784_v62 = vpack.c.bf16 %v4346_v40, %v4346_v40  ;;  %v3251_v22 = vmul.f32 %v4344_v26, %v4344_v26 }
 0x283   : > { %3147 = vst.msk [vmem:[%s5985_s29 + $0x30] sm:$0xf] %vm3134_vm5, %v3781_v23  ;;  %v3292_v39 = vsel %vm942_vm0, %v3249_v42, 0.0  ;;  %v3782_v6 = vpack.c.bf16 %v4347_v13, %v4347_v13  ;;  %v3192_v31 = vsel %vm942_vm0, %v4347_v13, 0.0  ;;  %v3250_v52 = vmul.f32 %v4347_v13, %v4347_v13 }
 0x284   : > { %v3293_v12 = vadd.f32 %v3292_v39, %v3291_v2  ;;  %3150 = vst.msk [vmem:[%s5985_s29 + $0x3c] sm:$0xf] %vm3134_vm5, %v3784_v62  ;;  %v3193_v21 = vadd.f32 %v3192_v31, %v3191_v36  ;;  %v3194_v44 = vsel %vm942_vm0, %v4344_v26, 0.0  ;;  %v3252_v59 = vmul.f32 %v4346_v40, %v4346_v40 }
 0x285   : > { %v4314_v45 = vpop.f32.mrb[16].mxu0  ;;  %3148 = vst.msk [vmem:[%s5985_s29 + $0x34] sm:$0xf] %vm3134_vm5, %v3782_v6  ;;  %v3294_v38 = vsel %vm942_vm0, %v3250_v52, 0.0  ;;  %v3296_v34 = vsel %vm942_vm0, %v3251_v22, 0.0  ;;  %v3196_v43 = vsel %vm942_vm0, %v4346_v40, 0.0 }
 0x286   : > { %v2911_v24 = vpop.f32.mrb[17].mxu0  ;;  %v3195_v18 = vadd.f32 %v3194_v44, %v3193_v21  ;;  %v3295_v37 = vadd.f32 %v3294_v38, %v3293_v12  ;;  %v3298_v3 = vsel %vm942_vm0, %v3252_v59, 0.0 }
 0x287   : > { %v4315_v61 = vpop.f32.mrb[18].mxu0 }
 0x288   : > { %v2914_v53 = vpop.f32.mrb[19].mxu0  ;;  %v3297_v25 = vadd.f32 %v3296_v34, %v3295_v37  ;;  %v3197_v56 = vadd.f32 %v3196_v43, %v3195_v18 }
 0x28a   : > { %v3299_v5 = vadd.f32 %v3298_v3, %v3297_v25 }
 0x28d   : > { %v4170_v19 = vpop.f32.mrb[16].mxu1  ;;  %v4318_v16 = vpop.f32.mrb[20].mxu0 }
 0x28e   : > { %v2038_v55 = vpop.f32.mrb[17].mxu1  ;;  %v4348_v58 = vadd.f32 %v4314_v45, %v4170_v19  ;;  %v2927_v27 = vpop.f32.mrb[21].mxu0 }
 0x28f   : > { %v4171_v17 = vpop.f32.mrb[18].mxu1  ;;  %v4349_v35 = vadd.f32 %v2911_v24, %v2038_v55  ;;  %v4319_v1 = vpop.f32.mrb[22].mxu0 }
 0x290   : > { %v3787_v47 = vpack.c.bf16 %v4348_v58, %v4348_v58  ;;  %v2041_v11 = vpop.f32.mrb[19].mxu1  ;;  %v4350_v63 = vadd.f32 %v4315_v61, %v4171_v17  ;;  %v2930_v14 = vpop.f32.mrb[23].mxu0  ;;  %v3255_v28 = vmul.f32 %v4348_v58, %v4348_v58  ;;  %v3202_v29 = vsel %vm942_vm0, %v4348_v58, 0.0 }
 0x291   : > { %v3785_v15 = vpack.c.bf16 %v4349_v35, %v4349_v35  ;;  %v3198_v0 = vsel %vm942_vm0, %v4349_v35, 0.0  ;;  %v3253_v46 = vmul.f32 %v4349_v35, %v4349_v35  ;;  %v4351_v30 = vadd.f32 %v2914_v53, %v2041_v11 }
 0x292   : > { %3153 = vst.msk [vmem:[%s5985_s29 + $0x48] sm:$0xf] %vm3134_vm5, %v3787_v47  ;;  %v3199_v54 = vadd.f32 %v3198_v0, %v3197_v56  ;;  %v3788_v60 = vpack.c.bf16 %v4350_v63, %v4350_v63  ;;  %v3256_v51 = vmul.f32 %v4350_v63, %v4350_v63  ;;  %v3204_v49 = vsel %vm942_vm0, %v4350_v63, 0.0 }
 0x293   : > { %3151 = vst.msk [vmem:[%s5985_s29 + $0x40] sm:$0xf] %vm3134_vm5, %v3785_v15  ;;  %v3300_v9 = vsel %vm942_vm0, %v3253_v46, 0.0  ;;  %v3786_v26 = vpack.c.bf16 %v4351_v30, %v4351_v30  ;;  %v3200_v32 = vsel %vm942_vm0, %v4351_v30, 0.0  ;;  %v3254_v8 = vmul.f32 %v4351_v30, %v4351_v30 }
 0x294   : > { %v3301_v4 = vadd.f32 %v3300_v9, %v3299_v5  ;;  %3154 = vst.msk [vmem:[%s5985_s29 + $0x4c] sm:$0xf] %vm3134_vm5, %v3788_v60  ;;  %v3201_v10 = vadd.f32 %v3200_v32, %v3199_v54  ;;  %v3304_v40 = vsel %vm942_vm0, %v3255_v28, 0.0  ;;  %v3306_v52 = vsel %vm942_vm0, %v3256_v51, 0.0 }
 0x295   : > { %3152 = vst.msk [vmem:[%s5985_s29 + $0x44] sm:$0xf] %vm3134_vm5, %v3786_v26  ;;  %v4174_v41 = vpop.f32.mrb[20].mxu1  ;;  %v3302_v57 = vsel %vm942_vm0, %v3254_v8, 0.0  ;;  %v4322_v36 = vpop.f32.mrb[24].mxu0 }
 0x296   : > { %v3203_v33 = vadd.f32 %v3202_v29, %v3201_v10  ;;  %v2054_v7 = vpop.f32.mrb[21].mxu1  ;;  %v4352_v23 = vadd.f32 %v4318_v16, %v4174_v41  ;;  %v3303_v42 = vadd.f32 %v3302_v57, %v3301_v4  ;;  %v2943_v31 = vpop.f32.mrb[25].mxu0 }
 0x297   : > { %v4175_v20 = vpop.f32.mrb[22].mxu1  ;;  %v4353_v50 = vadd.f32 %v2927_v27, %v2054_v7  ;;  %v4323_v24 = vpop.f32.mrb[26].mxu0 }
 0x298   : > { %v3791_v13 = vpack.c.bf16 %v4352_v23, %v4352_v23  ;;  %v3205_v48 = vadd.f32 %v3204_v49, %v3203_v33  ;;  %v2057_v39 = vpop.f32.mrb[23].mxu1  ;;  %v3305_v2 = vadd.f32 %v3304_v40, %v3303_v42  ;;  %v4354_v12 = vadd.f32 %v4319_v1, %v4175_v20  ;;  %v2946_v38 = vpop.f32.mrb[27].mxu0 }
 0x299   : > { %v3789_v62 = vpack.c.bf16 %v4353_v50, %v4353_v50  ;;  %v3206_v22 = vsel %vm942_vm0, %v4353_v50, 0.0  ;;  %v3257_v6 = vmul.f32 %v4353_v50, %v4353_v50  ;;  %v4355_v21 = vadd.f32 %v2930_v14, %v2057_v39 }
 0x29a   : > { %3157 = vst.msk [vmem:[%s5985_s29 + $0x58] sm:$0xf] %vm3134_vm5, %v3791_v13  ;;  %v3207_v45 = vadd.f32 %v3206_v22, %v3205_v48  ;;  %v3307_v44 = vadd.f32 %v3306_v52, %v3305_v2  ;;  %v3259_v61 = vmul.f32 %v4352_v23, %v4352_v23  ;;  %v3792_v18 = vpack.c.bf16 %v4354_v12, %v4354_v12 }
 0x29b   : > { %3155 = vst.msk [vmem:[%s5985_s29 + $0x50] sm:$0xf] %vm3134_vm5, %v3789_v62  ;;  %v3308_v59 = vsel %vm942_vm0, %v3257_v6, 0.0  ;;  %v3790_v37 = vpack.c.bf16 %v4355_v21, %v4355_v21  ;;  %v3208_v34 = vsel %vm942_vm0, %v4355_v21, 0.0  ;;  %v3258_v43 = vmul.f32 %v4355_v21, %v4355_v21 }
 0x29c   : > { %v3309_v53 = vadd.f32 %v3308_v59, %v3307_v44  ;;  %3158 = vst.msk [vmem:[%s5985_s29 + $0x5c] sm:$0xf] %vm3134_vm5, %v3792_v18  ;;  %v3209_v19 = vadd.f32 %v3208_v34, %v3207_v45  ;;  %v3210_v55 = vsel %vm942_vm0, %v4352_v23, 0.0  ;;  %v3260_v58 = vmul.f32 %v4354_v12, %v4354_v12 }
 0x29d   : > { %v4178_v25 = vpop.f32.mrb[24].mxu1  ;;  %3156 = vst.msk [vmem:[%s5985_s29 + $0x54] sm:$0xf] %vm3134_vm5, %v3790_v37  ;;  %v3310_v17 = vsel %vm942_vm0, %v3258_v43, 0.0  ;;  %v3312_v47 = vsel %vm942_vm0, %v3259_v61, 0.0  ;;  %v4326_v0 = vpop.f32.mrb[28].mxu0 }
 0x29e   : > { %v2070_v56 = vpop.f32.mrb[25].mxu1  ;;  %v4356_v3 = vadd.f32 %v4322_v36, %v4178_v25  ;;  %v3211_v11 = vadd.f32 %v3210_v55, %v3209_v19  ;;  %v3311_v63 = vadd.f32 %v3310_v17, %v3309_v53  ;;  %v3212_v46 = vsel %vm942_vm0, %v4354_v12, 0.0  ;;  %v2959_v60 = vpop.f32.mrb[29].mxu0 }
 0x29f   : > { %v4179_v35 = vpop.f32.mrb[26].mxu1  ;;  %v4357_v5 = vadd.f32 %v2943_v31, %v2070_v56  ;;  %v4327_v14 = vpop.f32.mrb[30].mxu0  ;;  %v3314_v28 = vsel %vm942_vm0, %v3260_v58, 0.0 }
 0x2a0   : > { %v3795_v16 = vpack.c.bf16 %v4356_v3, %v4356_v3  ;;  %v2073_v15 = vpop.f32.mrb[27].mxu1  ;;  %v3313_v1 = vadd.f32 %v3312_v47, %v3311_v63  ;;  %v3213_v9 = vadd.f32 %v3212_v46, %v3211_v11  ;;  %v4358_v26 = vadd.f32 %v4323_v24, %v4179_v35  ;;  %v2962_v10 = vpop.f32.mrb[31].mxu0 }
 0x2a1   : > { %v3793_v30 = vpack.c.bf16 %v4357_v5, %v4357_v5  ;;  %v3214_v27 = vsel %vm942_vm0, %v4357_v5, 0.0  ;;  %v3261_v54 = vmul.f32 %v4357_v5, %v4357_v5  ;;  %v4359_v32 = vadd.f32 %v2946_v38, %v2073_v15 }
 0x2a2   : > { %3161 = vst.msk [vmem:[%s5985_s29 + $0x68] sm:$0xf] %vm3134_vm5, %v3795_v16  ;;  %v3263_v8 = vmul.f32 %v4356_v3, %v4356_v3  ;;  %v3215_v29 = vadd.f32 %v3214_v27, %v3213_v9  ;;  %v3315_v41 = vadd.f32 %v3314_v28, %v3313_v1  ;;  %v3796_v51 = vpack.c.bf16 %v4358_v26, %v4358_v26 }
 0x2a3   : > { %3159 = vst.msk [vmem:[%s5985_s29 + $0x60] sm:$0xf] %vm3134_vm5, %v3793_v30  ;;  %v3316_v4 = vsel %vm942_vm0, %v3261_v54, 0.0  ;;  %v3794_v33 = vpack.c.bf16 %v4359_v32, %v4359_v32  ;;  %v3216_v57 = vsel %vm942_vm0, %v4359_v32, 0.0  ;;  %v3262_v7 = vmul.f32 %v4359_v32, %v4359_v32 }
 0x2a4   : > { %v3317_v49 = vadd.f32 %v3316_v4, %v3315_v41  ;;  %3162 = vst.msk [vmem:[%s5985_s29 + $0x6c] sm:$0xf] %vm3134_vm5, %v3796_v51  ;;  %v3217_v42 = vadd.f32 %v3216_v57, %v3215_v29  ;;  %v3218_v40 = vsel %vm942_vm0, %v4356_v3, 0.0  ;;  %v3264_v13 = vmul.f32 %v4358_v26, %v4358_v26 }
 0x2a5   : > { %v4182_v23 = vpop.f32.mrb[28].mxu1  ;;  %3160 = vst.msk [vmem:[%s5985_s29 + $0x64] sm:$0xf] %vm3134_vm5, %v3794_v33  ;;  %v3318_v48 = vsel %vm942_vm0, %v3262_v7, 0.0  ;;  %v3320_v2 = vsel %vm942_vm0, %v3263_v8, 0.0  ;;  %v3220_v52 = vsel %vm942_vm0, %v4358_v26, 0.0 }
 0x2a6   : > { %v2086_v20 = vpop.f32.mrb[29].mxu1  ;;  %v4360_v50 = vadd.f32 %v4326_v0, %v4182_v23  ;;  %v3219_v62 = vadd.f32 %v3218_v40, %v3217_v42  ;;  %v3319_v22 = vadd.f32 %v3318_v48, %v3317_v49  ;;  %v3322_v61 = vsel %vm942_vm0, %v3264_v13, 0.0 }
 0x2a7   : > { %v4183_v39 = vpop.f32.mrb[30].mxu1  ;;  %v4361_v36 = vadd.f32 %v2959_v60, %v2086_v20 }
 0x2a8   : > { %v3799_v6 = vpack.c.bf16 %v4360_v50, %v4360_v50  ;;  %v2089_v31 = vpop.f32.mrb[31].mxu1  ;;  %v3321_v24 = vadd.f32 %v3320_v2, %v3319_v22  ;;  %v3221_v44 = vadd.f32 %v3220_v52, %v3219_v62  ;;  %v4362_v59 = vadd.f32 %v4327_v14, %v4183_v39 }
 0x2a9   : > { %v3797_v45 = vpack.c.bf16 %v4361_v36, %v4361_v36  ;;  %v3222_v12 = vsel %vm942_vm0, %v4361_v36, 0.0  ;;  %v3265_v21 = vmul.f32 %v4361_v36, %v4361_v36  ;;  %v4363_v38 = vadd.f32 %v2962_v10, %v2089_v31 }
 0x2aa   : > { %3165 = vst.msk [vmem:[%s5985_s29 + $0x78] sm:$0xf] %vm3134_vm5, %v3799_v6  ;;  %v3223_v37 = vadd.f32 %v3222_v12, %v3221_v44  ;;  %v3323_v53 = vadd.f32 %v3322_v61, %v3321_v24  ;;  %v3800_v34 = vpack.c.bf16 %v4362_v59, %v4362_v59  ;;  %v3267_v43 = vmul.f32 %v4360_v50, %v4360_v50 }
 0x2ab   : > { %3163 = vst.msk [vmem:[%s5985_s29 + $0x70] sm:$0xf] %vm3134_vm5, %v3797_v45  ;;  %v3324_v18 = vsel %vm942_vm0, %v3265_v21, 0.0  ;;  %v3798_v25 = vpack.c.bf16 %v4363_v38, %v4363_v38  ;;  %v3224_v19 = vsel %vm942_vm0, %v4363_v38, 0.0  ;;  %v3266_v56 = vmul.f32 %v4363_v38, %v4363_v38 }
 0x2ac   : > { %v3325_v3 = vadd.f32 %v3324_v18, %v3323_v53  ;;  %3166 = vst.msk [vmem:[%s5985_s29 + $0x7c] sm:$0xf] %vm3134_vm5, %v3800_v34  ;;  %v3225_v55 = vadd.f32 %v3224_v19, %v3223_v37  ;;  %v3226_v58 = vsel %vm942_vm0, %v4360_v50, 0.0  ;;  %v3268_v17 = vmul.f32 %v4362_v59, %v4362_v59 }
 0x2ad   : > { %3164 = vst.msk [vmem:[%s5985_s29 + $0x74] sm:$0xf] %vm3134_vm5, %v3798_v25  ;;  %v3326_v35 = vsel %vm942_vm0, %v3266_v56, 0.0 }
 0x2ae   : > { %v3227_v5 = vadd.f32 %v3226_v58, %v3225_v55  ;;  %v3327_v47 = vadd.f32 %v3326_v35, %v3325_v3 }
 0x2af   : > { %4833 = shalt.err (!%p4830_p13)
}
 0x2b0   : > { %s4834_s10 = scalar_lea.hbm %s6118_s19, 2048  ;;  %s4838_s29 = scalar_lea.hbm %s6249_s4, 4096 }
 0x2b1   : > { %p4835_p0 = scmp.ne.s32.totalorder %s6118_s19, %s4834_s10  ;;  %p4839_p9 = scmp.lt.u32.totalorder %s6118_s19, %s6249_s4 }
 0x2b2   : > { %p4840_p12 = scmp.lt.u32.totalorder %s4838_s29, %s4834_s10  ;;  %p4842_p1 = scmp.lt.u32.totalorder %s4834_s10, %s6118_s19 }
 0x2b3   : > { %p4836_p5 = pnand %p4835_p0, %p5151_p4 }
 0x2b4   : > { %p4841_p2 = por %p4840_p12, %p4839_p9 }
 0x2b5   : > { %p4837_p11 = pneg %p4836_p5 }
 0x2b6   : > { %p4843_p6 = por %p4842_p1, %p4841_p2 }
 0x2b8   : > { %p4844_p8 = pnand %p4843_p6, %p4837_p11 }
 0x2ba   : > { %4847 = shalt.err (!%p4844_p8)
}
 0x2bb   : > { %s4965_s15 = smov 64   ;;  %s4966_s7 = smov 4   ;;  %v3328_v11 = vsel %vm942_vm0, %v3267_v43, 0.0  ;;  %v3228_v63 = vsel %vm942_vm0, %v4362_v59, 0.0  ;;  %v3330_v0 = vsel %vm942_vm0, %v3268_v17, 0.0 }
 0x2bc   : > { %4605 = dma.vmem_to_hbm [thread:$0]  (%p5151_p4), %s6120_s9, 2048, %s6118_s19, %s3340_s11, %s4965_s15, %s4965_s15, %s4966_s7   ;;  %v3229_v16 = vadd.f32 %v3228_v63, %v3227_v5  ;;  %v3329_v15 = vadd.f32 %v3328_v11, %v3327_v47 }
 0x2bd   : > { %s3564_s26 = sshll.u32 %s5203_s12, 3  ;;  %s3344_s18 = sand.u32 1, %s5025_s25  }
 0x2be   : > { %v3230_v46 = vrot.slane %v3229_v16, 4  ;;  %v3331_v30 = vadd.f32 %v3330_v0, %v3329_v15  ;;  %s3765_s9 = sshll.u32 %s5025_s25, 7  ;;  %s321_s19 = scalar_lea.vmem [#allocation11], %s3564_s26 }
 0x2bf   : > { %s3379_s11 = sshll.u32 %s321_s19, 4  ;;  %s6159_s30 = scalar_lea.vmem [#allocation13], %s3564_s26  ;;  %s6167_s11 = int_to_ptr.vmem [resolvable:$true] %s3379_s11 }
 0x2c0   : > { %v3231_v27 = vadd.f32 %v3230_v46, %v3229_v16  ;;  %v3332_v54 = vrot.slane %v3331_v30, 4  ;;  %s3392_s10 = sshll.u32 %s6159_s30, 4  ;;  %s6165_s27 = scalar_lea.hbm %s6250_s5, %s3765_s9  ;;  %s6175_s10 = int_to_ptr.vmem [resolvable:$true] %s3392_s10 }
 0x2c1   : > { %s6173_s20 = scalar_lea.hbm %s6251_s6, %s3765_s9  ;;  %s6177_s14 = scalar_lea.sflag [#allocation12], %s3344_s18 }
 0x2c2   : > { %v3232_v60 = vrot.slane %v3231_v27, 2  ;;  %v3333_v1 = vadd.f32 %v3332_v54, %v3331_v30  ;;  %s4848_s15 = scalar_lea.vmem %s6167_s11, 128  ;;  %s4967_s7 = smov [#allocation11]  }
 0x2c3   : > { %p4849_p3 = scmp.ne.s32.totalorder %s6167_s11, %s4848_s15  ;;  %s4852_s26 = sshll.u32 %s4967_s7, 4  ;;  %s4853_s26 = int_to_ptr.vmem [resolvable:$false] %s4852_s26 }
 0x2c4   : > { %v3233_v9 = vadd.f32 %v3232_v60, %v3231_v27  ;;  %v3334_v26 = vrot.slane %v3333_v1, 2  ;;  %s4854_s12 = scalar_lea.vmem %s4853_s26, 256  ;;  %p4855_p13 = scmp.lt.s32.totalorder %s6167_s11, %s4853_s26 }
 0x2c5   : > { %p4850_p7 = pnand %p4849_p3, %p5151_p4  ;;  %p4856_p0 = scmp.lt.s32.totalorder %s4854_s12, %s4848_s15 }
 0x2c6   : > { %v3335_v32 = vadd.f32 %v3334_v26, %v3333_v1  ;;  %v3234_v14 = vrot.slane %v3233_v9, 1 }
 0x2c7   : > { %p4851_p10 = pneg %p4850_p7  ;;  %p4857_p5 = por %p4856_p0, %p4855_p13 }
 0x2c8   : > { %v3336_v28 = vrot.slane %v3335_v32, 1  ;;  %v3235_v4 = vadd.f32 %v3234_v14, %v3233_v9 }
 0x2c9   : > { %p4858_p11 = pnand %p4857_p5, %p4851_p10 }
 0x2ca   : > { %3236 = vst.msk [vmem:[%s321_s19] sm:$0xff] %vm942_vm0, %v3235_v4  ;;  %v3337_v10 = vadd.f32 %v3336_v28, %v3335_v32 }
 0x2cb   : > { %4861 = shalt.err (!%p4858_p11)
}
 0x2cc   : > { %s4862_s18 = scalar_lea.hbm %s6165_s27, 128  ;;  %s4866_s17 = scalar_lea.hbm %s6250_s5, 256 }
 0x2cd   : > { %p4863_p9 = scmp.ne.s32.totalorder %s6165_s27, %s4862_s18  ;;  %p4867_p1 = scmp.lt.u32.totalorder %s6165_s27, %s6250_s5 }
 0x2ce   : > { %p4868_p6 = scmp.lt.u32.totalorder %s4866_s17, %s4862_s18  ;;  %p4870_p3 = scmp.lt.u32.totalorder %s4862_s18, %s6165_s27 }
 0x2cf   : > { %p4864_p12 = pnand %p4863_p9, %p5151_p4 }
 0x2d0   : > { %p4869_p8 = por %p4868_p6, %p4867_p1 }
 0x2d1   : > { %p4865_p2 = pneg %p4864_p12 }
 0x2d2   : > { %p4871_p7 = por %p4870_p3, %p4869_p8 }
 0x2d4   : > { %p4872_p10 = pnand %p4871_p7, %p4865_p2 }
 0x2d6   : > { %4875 = shalt.err (!%p4872_p10)
}
 0x2d7   : > { %4606 = dma.vmem_to_hbm [thread:$0]  (%p5151_p4), %s6167_s11, 128, %s6165_s27, %s6177_s14   ;;  %3338 = vst.msk [vmem:[%s6159_s30] sm:$0xff] %vm942_vm0, %v3337_v10 }
 0x2d8   : > { %s4876_s15 = scalar_lea.vmem %s6175_s10, 128  ;;  %s4968_s7 = smov [#allocation13]  }
 0x2d9   : > { %p4877_p13 = scmp.ne.s32.totalorder %s6175_s10, %s4876_s15  ;;  %s4880_s26 = sshll.u32 %s4968_s7, 4  ;;  %s4881_s26 = int_to_ptr.vmem [resolvable:$false] %s4880_s26 }
 0x2da   : > { %s4882_s12 = scalar_lea.vmem %s4881_s26, 256  ;;  %p4883_p11 = scmp.lt.s32.totalorder %s6175_s10, %s4881_s26 }
 0x2db   : > { %p4878_p0 = pnand %p4877_p13, %p5151_p4  ;;  %p4884_p9 = scmp.lt.s32.totalorder %s4882_s12, %s4876_s15 }
 0x2dd   : > { %p4879_p5 = pneg %p4878_p0  ;;  %p4885_p12 = por %p4884_p9, %p4883_p11 }
 0x2df   : > { %p4886_p2 = pnand %p4885_p12, %p4879_p5 }
 0x2e1   : > { %4889 = shalt.err (!%p4886_p2)
}
 0x2e2   : > { %s4890_s11 = scalar_lea.hbm %s6173_s20, 128  ;;  %s4894_s18 = scalar_lea.hbm %s6251_s6, 256 }
 0x2e3   : > { %p4891_p1 = scmp.ne.s32.totalorder %s6173_s20, %s4890_s11  ;;  %p4895_p3 = scmp.lt.u32.totalorder %s6173_s20, %s6251_s6 }
 0x2e4   : > { %p4896_p7 = scmp.lt.u32.totalorder %s4894_s18, %s4890_s11  ;;  %p4898_p13 = scmp.lt.u32.totalorder %s4890_s11, %s6173_s20 }
 0x2e5   : > { %p4892_p6 = pnand %p4891_p1, %p5151_p4 }
 0x2e6   : > { %p4897_p10 = por %p4896_p7, %p4895_p3 }
 0x2e7   : > { %p4893_p8 = pneg %p4892_p6 }
 0x2e8   : > { %p4899_p0 = por %p4898_p13, %p4897_p10 }
 0x2ea   : > { %p4900_p5 = pnand %p4899_p0, %p4893_p8 }
 0x2ec   : > { %4903 = shalt.err (!%p4900_p5)
}
 0x2ed   : > { %4607 = dma.vmem_to_hbm [thread:$0]  (%p5151_p4), %s6175_s10, 128, %s6173_s20, %s6177_s14  }
 0x2ee PF: > { %s3404_s17 = sand.u32 1, %s4942_s21   ;;  %p6281_p11 = scmp.ne.s32.totalorder %s6262_s28, 0 }
 0x2ef   : > { %p6282_p9 = scmp.ge.s32.totalorder %s4954_s24, 2  ;;  %s3405_s25 = scalar_lea.sflag [#allocation4], %s3404_s17 }
 0x2f1   : > { %p4626_p12 = pnand %p6282_p9, %p6281_p11 }
 0x2f3   : > { %4933 = dma.done.wait (!%p4626_p12), %s3405_s25, 2048  }
 0x2f4   : > { %4935 = vsyncadd (!%p4626_p12), %s3405_s25, 4294965248  ;;  %s6283_s29 = sadd.s32 4294967294, %s4954_s24  }
 0x2f5   : > { %s3413_s15 = sand.u32 1, %s6283_s29  }
 0x2f6   : > { %s3414_s7 = scalar_lea.sflag [#allocation12], %s3413_s15 }
 0x2f7   : > { %4937 = dma.done.wait (!%p4626_p12), %s3414_s7, 256  }
 0x2f8   : > { %4939 = vsyncadd (!%p4626_p12), %s3414_s7, 4294967040  ;;  %p25_p4 = scmp.ge.s32.totalorder %s5138_s13, 4   ;;  %s6284_s21 = smov %s4946_s22 }
 0x2f9   : > { %s6285_s22 = smov %s4950_s23  ;;  %s6286_s23 = smov %s5147_s16 }
 0x2fa   : > { %s6287_s24 = smov %s5138_s13  ;;  %27 = sbr.rel (!%p25_p4) target bundleno = 9 (0x9), region = 133 }
 0x301   :  { %3428 = vsyncpa [#allocation3], 1 }
 0x302   :  { %3430 = vsyncpa [#allocation3 + $0x1], 1 }
 0x303   :  { %3431 = vsyncpa [#allocation6], 1 }
 0x304   :  { %3432 = vsyncpa [#allocation9], 1 }
 0x305   :  { %3433 = vsyncpa [#allocation4], 1 }
 0x306   :  { %3435 = vsyncpa [#allocation4 + $0x1], 1 }
 0x307   :  { %3436 = vsyncpa [#allocation12], 1 }
 0x308   :  { %3438 = vsyncpa [#allocation12 + $0x1], 1 }

// kernel: _lambda_.3
= control target key start
LH: loop header
LB: loop body
LE: loop exit
PB: predicated region body
PF: predicated region fallthrough
CT: control target
= control target key end

     0   :  { %10 = vsyncpa [#allocation3], 0  ;;  %s7161_s0 = inlined_call_operand.hbm [shape: bf16[36,18,16], index: 0, kind: input, shape index: {}]   ;;  %s7162_s1 = inlined_call_operand.hbm [shape: bf16[9,16,32], index: 1, kind: input, shape index: {}]   ;;  %s7163_s2 = inlined_call_operand.hbm [shape: bf16[36,18,32], index: 2, kind: output, shape index: {0}]   ;;  %s7164_s3 = inlined_call_operand.hbm [shape: f32[16,32], index: 3, kind: output, shape index: {1}]   ;;  %s7165_s4 = inlined_call_operand.hbm [shape: f32[16,32], index: 4, kind: output, shape index: {2}]  }
   0x1   :  { %12 = vsyncpa [#allocation3 + $0x1], 0 }
   0x2   :  { %13 = vsyncpa [#allocation6], 0 }
   0x3   :  { %14 = vsyncpa [#allocation4], 0 }
   0x4   :  { %16 = vsyncpa [#allocation4 + $0x1], 0 }
   0x5   :  { %17 = vsyncpa [#allocation9], 0 }
   0x6   :  { %19 = vsyncpa [#allocation9 + $0x1], 0  ;;  %s5400_s15 = smov 0   ;;  %s5402_s16 = smov 0  }
   0x7   :  { %s5404_s17 = smov 0   ;;  %s5406_s18 = smov 0  }
   0x8 LB: > { %s5421_s19 = sadd.s32 4294967295, %s5363_s18   ;;  %s7169_s20 = sadd.s32 4294967294, %s5363_s18   ;;  %s5363_s18 = sphi %s5406_s18, %s7264_s18   ;;  %s5359_s17 = sphi %s5404_s17, %s7263_s17   ;;  %s5355_s16 = sphi %s5402_s16, %s7262_s16   ;;  %s5351_s15 = sphi %s5400_s15, %s7261_s15  }
   0x9   : > { %p45_p0 = scmp.ne.s32.totalorder %s5355_s16, %s5351_s15  ;;  %p7166_p1 = scmp.eq.s32.totalorder %s5421_s19, 0 }
   0xa   : > { %p96_p3 = scmp.eq.s32.totalorder %s7169_s20, 1  ;;  %p3965_p5 = scmp.ge.s32.totalorder %s5363_s18, 1 }
   0xb   : > { %p5432_p4 = por %p7166_p1, %p45_p0  ;;  %p155_p7 = scmp.lt.s32.totalorder %s5363_s18, 3 }
   0xc   : > { %p5437_p6 = por %p96_p3, %p45_p0  ;;  %s5365_s24 = smov [#allocation5]  }
   0xd   : > { %s7199_s21 = scalar_select %p5432_p4, 1, 0 }
   0xe   : > { %s7200_s22 = scalar_select %p5437_p6, 1, 0 }
   0xf   : > { %p5442_p8 = pnand %p3965_p5, %p155_p7  ;;  %s167_s25 = sshll.u32 %s5365_s24, 4  ;;  %s168_s25 = int_to_ptr.vmem [resolvable:$true] %s167_s25 }
  0x10   : > { %s5456_s27 = sadd.s32 1, %s5363_s18   ;;  %s5175_s5 = scalar_lea.hbm %s7162_s1, 1152 }
  0x11   : > { %s7201_s23 = scalar_select %p5442_p8, 1, 0 }
  0x12   : > { %p5082_p9 = pneg %p5442_p8  ;;  %s29_s28 = ssub.s32 %s5363_s18, %s5456_s27 }
  0x13   : > { %p5176_p12 = scmp.ne.s32.totalorder %s7162_s1, %s5175_s5  ;;  %p5182_p5 = scmp.lt.u32.totalorder %s5175_s5, %s7162_s1 }
  0x14   : > { %p5451_p11 = pnand %p5082_p9, %p7166_p1 }
  0x16   : > { %p5177_p13 = pneg %p5451_p11 }
  0x18   : > { %p5178_p0 = pnand %p5177_p13, %p5176_p12 }
  0x1a   : > { %p5179_p3 = pneg %p5178_p0 }
  0x1c   : > { %p5184_p7 = pnand %p5182_p5, %p5179_p3 }
  0x1e   : > { %5187 = shalt.err (!%p5184_p7)
}
  0x1f   : > { %s5188_s10 = scalar_lea.vmem %s168_s25, 1152  ;;  %p5196_p2 = scmp.lt.s32.totalorder %s168_s25, %s168_s25 }
  0x20   : > { %p5189_p9 = scmp.ne.s32.totalorder %s168_s25, %s5188_s10  ;;  %p5197_p6 = scmp.lt.s32.totalorder %s5188_s10, %s5188_s10 }
  0x22   : > { %p5191_p10 = pnand %p5189_p9, %p5177_p13  ;;  %p5198_p4 = por %p5197_p6, %p5196_p2 }
  0x24   : > { %p5192_p1 = pneg %p5191_p10 }
  0x26   : > { %p5199_p8 = pnand %p5198_p4, %p5192_p1 }
  0x28   : > { %5202 = shalt.err (!%p5199_p8)
}
  0x29   : > { %s5366_s11 = smov 64   ;;  %s5367_s12 = smov 4  }
  0x2a   : > { %5085 = dma.hbm_to_vmem [thread:$0]  (!%p5451_p11), %s7162_s1, 1152, %s168_s25, [#allocation6], %s5366_s11, %s5366_s11, %s5367_s12  }
  0x2b   : > { %p30_p1 = scmp.eq.s32.totalorder %s29_s28, 0  ;;  %s32_s24 = sadd.s32 1, %s5359_s17 }
  0x2c   : > { %p39_p2 = scmp.ne.s32.totalorder %s5359_s17, %s5355_s16  ;;  %p40_p4 = scmp.eq.s32.totalorder %s5363_s18, 0 }
  0x2d   : > { %s5484_s29 = scalar_select %p30_p1, %s5359_s17, %s32_s24  }
  0x2e   : > { %p41_p6 = por %p40_p4, %p39_p2  ;;  %p7203_p8 = scmp.eq.s32.totalorder %s5421_s19, 1 }
  0x2f   : > { %p5101_p12 = scmp.lt.s32.totalorder %s5363_s18, 2  ;;  %s181_s26 = sand.u32 1, %s5359_s17  }
  0x30   : > { %p5488_p10 = por %p7203_p8, %p39_p2  ;;  %s5066_s5 = smul.u32 216, %s181_s26 }
  0x31   : > { %s5102_s6 = smul.u32 3456, %s5363_s18  ;;  %p5495_p13 = pnand %p5101_p12, %p41_p6 }
  0x32   : > { %s185_s9 = scalar_lea.vmem [#allocation2], %s5066_s5  ;;  %s5506_s13 = scalar_lea.sflag [#allocation3], %s181_s26 }
  0x33   : > { %s5502_s8 = scalar_lea.hbm %s7161_s0, %s5102_s6  ;;  %s193_s10 = sshll.u32 %s185_s9, 4  ;;  %s5504_s10 = int_to_ptr.vmem [resolvable:$true] %s193_s10 }
  0x34   : > { %s5203_s14 = scalar_lea.hbm %s5502_s8, 3456  ;;  %p5205_p0 = pneg %p5495_p13 }
  0x35   : > { %p5204_p11 = scmp.ne.s32.totalorder %s5502_s8, %s5203_s14  ;;  %s5208_s25 = scalar_lea.hbm %s7161_s0, 6912 }
  0x36   : > { %p5209_p7 = scmp.lt.u32.totalorder %s5502_s8, %s7161_s0  ;;  %p5210_p9 = scmp.lt.u32.totalorder %s5208_s25, %s5203_s14 }
  0x37   : > { %p5206_p3 = pnand %p5205_p0, %p5204_p11  ;;  %p5212_p2 = scmp.lt.u32.totalorder %s5203_s14, %s5502_s8 }
  0x38   : > { %p5211_p1 = por %p5210_p9, %p5209_p7 }
  0x39   : > { %p5207_p5 = pneg %p5206_p3 }
  0x3a   : > { %p5213_p4 = por %p5212_p2, %p5211_p1 }
  0x3c   : > { %p5214_p6 = pnand %p5213_p4, %p5207_p5 }
  0x3e   : > { %5217 = shalt.err (!%p5214_p6)
}
  0x3f   : > { %s5218_s26 = scalar_lea.vmem %s5504_s10, 3456  ;;  %s5368_s5 = smov [#allocation2]  }
  0x40   : > { %p5219_p8 = scmp.ne.s32.totalorder %s5504_s10, %s5218_s26  ;;  %s5223_s9 = sshll.u32 %s5368_s5, 4  ;;  %s5224_s9 = int_to_ptr.vmem [resolvable:$false] %s5223_s9 }
  0x41   : > { %s5225_s20 = scalar_lea.vmem %s5224_s9, 6912  ;;  %p5226_p3 = scmp.lt.s32.totalorder %s5504_s10, %s5224_s9 }
  0x42   : > { %p5221_p12 = pnand %p5219_p8, %p5205_p0  ;;  %p5227_p7 = scmp.lt.s32.totalorder %s5225_s20, %s5218_s26 }
  0x44   : > { %p5222_p11 = pneg %p5221_p12  ;;  %p5228_p9 = por %p5227_p7, %p5226_p3 }
  0x46   : > { %p5229_p1 = pnand %p5228_p9, %p5222_p11 }
  0x48   : > { %5232 = shalt.err (!%p5229_p1)
}
  0x49   : > { %5089 = dma.hbm_to_vmem [thread:$0]  (!%p5495_p13), %s5502_s8, 3456, %s5504_s10, %s5506_s13, %s5366_s11, %s5366_s11, %s5367_s12  }
  0x4a   : > { %p7206_p0 = scmp.ne.s32.totalorder %s7201_s23, 0 }
  0x4c   : > { %205 = sbr.rel (%p7206_p0) target bundleno = 735 (0x2df), region = 28 }
  0x53   : > { %s5540_s14 = sand.u32 1, %s5355_s16   ;;  %p7207_p5 = scmp.ne.s32.totalorder %s7199_s21, 0 }
  0x54   : > { %s5068_s24 = smul.u32 216, %s5540_s14  ;;  %s208_s6 = scalar_lea.sflag [#allocation3], %s5540_s14 }
  0x56   : > { %s5546_s7 = scalar_lea.vmem [#allocation2], %s5068_s24 }
  0x57   : > { %5334 = dma.done.wait (%p7207_p5), %s208_s6, 3456  }
  0x58   : > { %5336 = vsyncadd (%p7207_p5), %s208_s6, 4294963840  ;;  %p7208_p13 = scmp.eq.s32.totalorder %s5421_s19, 0 }
  0x5a   : > { %5338 = dma.done.wait (%p7208_p13), [#allocation6], 1152   ;;  %p7209_p2 = pmov %p7208_p13 }
  0x5b   : > { %vm309_vm0 = vsmask.f32 3328  ;;  %vm310_vm1 = vsmask.f32 7440  ;;  %v5144_v0 = vld [vmem:[#allocation5 + $0x8] sm:$0xff]   ;;  %v5145_v1 = vld [vmem:[#allocation5 + $0x20] sm:$0xff]  }
  0x5c   : > { %5340 = vsyncadd (%p7209_p2), [#allocation6], 4294966144  ;;  %4502 = vmatprep.subr.bf16.mxu1 %v5144_v0  ;;  %v5557_v2 = vld [vmem:[%s5546_s7] sm:$0xf]  ;;  %v5560_v3 = vld [vmem:[%s5546_s7 + $0x4] sm:$0xf]  ;;  %4638 = vmatprep.subr.bf16.mxu0 %v5145_v1 }
  0x5d   : > { %v255_v4 = vld [vmem:[%s5546_s7 + $0x8] sm:$0x1]  ;;  %4503 = vmatpush3.bf16.msra.mxu1 %v5144_v0  ;;  %v313_v5 = vshrl.u32 %v5557_v2, 16  ;;  %v316_v6 = vshll.u32 %v5557_v2, 16  ;;  %v322_v7 = vshll.u32 %v5560_v3, 16  ;;  %v326_v8 = vshrl.u32 %v5560_v3, 16  ;;  %4639 = vmatpush3.bf16.msra.mxu0 %v5145_v1  ;;  %vm5587_vm3 = vmor %vm309_vm0, %vm310_vm1 }
  0x5e   : > { %v332_v9 = vshll.u32 %v255_v4, 16  ;;  %vm753_vm2 = vcmask 130048   ;;  %v5567_v10 = vld [vmem:[#allocation5] sm:$0xff]   ;;  %v5569_v11 = vld [vmem:[#allocation5 + $0x28] sm:$0xff]   ;;  %v5572_v16 = vld [vmem:[%s5546_s7 + $0xc] sm:$0xf] }
  0x5f   : > { %v315_v12 = vrot.slane %v313_v5, 4  ;;  %v318_v13 = vrot.slane %v316_v6, 5  ;;  %v324_v14 = vrot.slane %v322_v7, 5  ;;  %v328_v15 = vrot.slane %v326_v8, 4  ;;  %4536 = vmatprep.subr.bf16.mxu1 %v5567_v10  ;;  %v5576_v18 = vld [vmem:[%s5546_s7 + $0x10] sm:$0xf]  ;;  %4672 = vmatprep.subr.bf16.mxu0 %v5569_v11 }
  0x60   : > { %v334_v17 = vrot.slane %v332_v9, 5  ;;  %v5579_v19 = vld [vmem:[%s5546_s7 + $0x14] sm:$0x1]  ;;  %v337_v20 = vshrl.u32 %v5572_v16, 16  ;;  %v340_v23 = vshll.u32 %v5572_v16, 16  ;;  %v346_v24 = vshll.u32 %v5576_v18, 16 }
  0x61   : > { %v319_v21 = vor.u32 %v318_v13, %v315_v12  ;;  %v329_v22 = vor.u32 %v328_v15, %v324_v14  ;;  %v350_v27 = vshrl.u32 %v5576_v18, 16  ;;  %v356_v28 = vshll.u32 %v5579_v19, 16  ;;  %v5598_v30 = vld [vmem:[%s5546_s7 + $0x18] sm:$0xf]  ;;  %v5601_v35 = vld [vmem:[%s5546_s7 + $0x1c] sm:$0xf] }
  0x62   : > { %v339_v26 = vrot.slane %v337_v20, 4  ;;  %v5595_v29 = vcombine.low %v5572_v16, %v5576_v18  ;;  %v342_v33 = vrot.slane %v340_v23, 5  ;;  %v348_v34 = vrot.slane %v346_v24, 5  ;;  %v5605_v39 = vld [vmem:[%s5546_s7 + $0x20] sm:$0x1]  ;;  %s6451_s21 = scalar_lea.vmem [#allocation7], %s5068_s24 }
  0x63   : > { %v320_v31 = vrot.slane %v319_v21, 4  ;;  %v330_v32 = vrot.slane %v329_v22, 4  ;;  %v352_v36 = vrot.slane %v350_v27, 4  ;;  %v358_v37 = vrot.slane %v356_v28, 5  ;;  %v5615_v49 = vld [vmem:[%s5546_s7 + $0x24] sm:$0xf] }
  0x64   : > { %v1289_v38 = vrot.slane %v5579_v19, 5  ;;  %v361_v40 = vshrl.u32 %v5598_v30, 16  ;;  %v343_v43 = vor.u32 %v342_v33, %v339_v26  ;;  %v364_v44 = vshll.u32 %v5598_v30, 16  ;;  %v5620_v54 = vld [vmem:[%s5546_s7 + $0x28] sm:$0xf]  ;;  %s5104_s23 = smul.u32 3456, %s5421_s19 }
  0x65   : > { %v325_v41 = vsel %vm5587_vm3, %v320_v31, %v324_v14  ;;  %v335_v42 = vsel %vm5587_vm3, %v330_v32, %v334_v17  ;;  %v353_v46 = vor.u32 %v352_v36, %v348_v34  ;;  %v370_v48 = vshll.u32 %v5601_v35, 16  ;;  %v5628_v63 = vld [vmem:[%s5546_s7 + $0x2c] sm:$0x1]  ;;  %v5636_v6 = vld [vmem:[%s5546_s7 + $0x30] sm:$0xf]  ;;  %s3794_s11 = sshll.u32 %s6451_s21, 4  ;;  %s7031_s11 = int_to_ptr.vmem [resolvable:$true] %s3794_s11 }
  0x66   : > { %v3973_v45 = vcombine.low %v325_v41, %v335_v42  ;;  %v363_v47 = vrot.slane %v361_v40, 4  ;;  %v344_v50 = vrot.slane %v343_v43, 4  ;;  %v366_v51 = vrot.slane %v364_v44, 5  ;;  %v5640_v13 = vld [vmem:[%s5546_s7 + $0x34] sm:$0xf]  ;;  %v5642_v14 = vld [vmem:[#allocation5 + $0x10] sm:$0xff]   ;;  %s7024_s10 = scalar_lea.hbm %s7163_s2, %s5104_s23 }
  0x67   : > { %v374_v52 = vshrl.u32 %v5601_v35, 16  ;;  %v380_v53 = vshll.u32 %v5605_v39, 16  ;;  %v354_v55 = vrot.slane %v353_v46, 4  ;;  %v372_v56 = vrot.slane %v370_v48, 5  ;;  %v5650_v26 = vld [vmem:[%s5546_s7 + $0x38] sm:$0x1] }
  0x68   : > { %4504 = vmatprep.mubr.msk.bf16.mxu1 %vm753_vm2, %v3973_v45  ;;  %v1293_v57 = vrot.slane %v5601_v35, 5  ;;  %v1296_v58 = vrot.slane %v5605_v39, 5  ;;  %v349_v59 = vsel %vm5587_vm3, %v344_v50, %v348_v34  ;;  %v367_v60 = vor.u32 %v366_v51, %v363_v47  ;;  %v5657_v34 = vld [vmem:[%s5546_s7 + $0x3c] sm:$0xf]  ;;  %v5663_v42 = vld [vmem:[%s5546_s7 + $0x40] sm:$0xf] }
  0x69   : > { %v376_v61 = vrot.slane %v374_v52, 4  ;;  %v382_v62 = vrot.slane %v380_v53, 5  ;;  %v359_v0 = vsel %vm5587_vm3, %v354_v55, %v358_v37  ;;  %v385_v1 = vshrl.u32 %v5615_v49, 16  ;;  %v5669_v46 = vld [vmem:[%s5546_s7 + $0x44] sm:$0x1]  ;;  %s3971_s13 = sshll.u32 %s5540_s14, 3 }
  0x6a   : > { %v388_v4 = vshll.u32 %v5615_v49, 16  ;;  %v394_v5 = vshll.u32 %v5620_v54, 16  ;;  %v3974_v7 = vcombine.low %v349_v59, %v359_v0  ;;  %v368_v8 = vrot.slane %v367_v60, 4  ;;  %v5671_v47 = vld [vmem:[#allocation5 + $0x30] sm:$0xff]   ;;  %s3770_s25 = scalar_lea.sflag [#allocation4], %s5540_s14  ;;  %s5233_s28 = scalar_lea.vmem %s7031_s11, 3456 }
  0x6b   : > { %v377_v9 = vor.u32 %v376_v61, %v372_v56  ;;  %v398_v12 = vshrl.u32 %v5620_v54, 16  ;;  %v387_v15 = vrot.slane %v385_v1, 4  ;;  %v404_v21 = vshll.u32 %v5628_v63, 16  ;;  %v5676_v53 = vld [vmem:[%s5546_s7 + $0x48] sm:$0xf]  ;;  %p5234_p4 = scmp.ne.s32.totalorder %s7031_s11, %s5233_s28  ;;  %s5370_s26 = smov [#allocation7]  }
  0x6c   : > { %v390_v17 = vrot.slane %v388_v4, 5  ;;  %v396_v20 = vrot.slane %v394_v5, 5  ;;  %4640 = vmatprep.mubr.msk.bf16.mxu0 %vm753_vm2, %v3974_v7  ;;  %4505 = vmatmul.mubr.msk.bf16.vlgmr.msra.gmra.mrb[0].mxu1 %vm753_vm2, %v3974_v7  ;;  %v373_v22 = vsel %vm5587_vm3, %v368_v8, %v372_v56  ;;  %v409_v27 = vshrl.u32 %v5636_v6, 16  ;;  %v5690_v4 = vld [vmem:[%s5546_s7 + $0x4c] sm:$0xf]  ;;  %s5237_s5 = sshll.u32 %s5370_s26, 4  ;;  %s5238_s5 = int_to_ptr.vmem [resolvable:$false] %s5237_s5 }
  0x6d   : > { %v378_v23 = vrot.slane %v377_v9, 4  ;;  %v400_v24 = vrot.slane %v398_v12, 4  ;;  %4537 = vmatpush3.bf16.msra.mxu1 %v5567_v10  ;;  %v406_v31 = vrot.slane %v404_v21, 5  ;;  %v412_v32 = vshll.u32 %v5636_v6, 16  ;;  %p5235_p6 = pnand %p5234_p4, %p5488_p10  ;;  %s5239_s9 = scalar_lea.vmem %s5238_s5, 6912 }
  0x6e   : > { %v391_v28 = vor.u32 %v390_v17, %v387_v15  ;;  %v418_v33 = vshll.u32 %v5640_v13, 16  ;;  %v411_v40 = vrot.slane %v409_v27, 4  ;;  %v422_v41 = vshrl.u32 %v5640_v13, 16  ;;  %4570 = vmatprep.subr.bf16.mxu1 %v5642_v14  ;;  %v5710_v27 = vld [vmem:[%s5546_s7 + $0x54] sm:$0xf]  ;;  %p5240_p12 = scmp.lt.s32.totalorder %s7031_s11, %s5238_s5  ;;  %p5241_p11 = scmp.lt.s32.totalorder %s5239_s9, %s5233_s28 }
  0x6f   : > { %v383_v36 = vsel %vm5587_vm3, %v378_v23, %v382_v62  ;;  %v401_v37 = vor.u32 %v400_v24, %v396_v20  ;;  %v414_v44 = vrot.slane %v412_v32, 5  ;;  %v428_v51 = vshll.u32 %v5650_v26, 16  ;;  %p5236_p8 = pneg %p5235_p6 }
  0x70   : > { %v5666_v10 = vcombine.low %v373_v22, %v383_v36  ;;  %v392_v43 = vrot.slane %v391_v28, 4  ;;  %v420_v45 = vrot.slane %v418_v33, 5  ;;  %v424_v50 = vrot.slane %v422_v41, 4  ;;  %v5705_v22 = vld [vmem:[%s5546_s7 + $0x50] sm:$0x1]  ;;  %p5242_p3 = por %p5241_p11, %p5240_p12 }
  0x71   : > { %v402_v48 = vrot.slane %v401_v37, 4  ;;  %v433_v52 = vshrl.u32 %v5657_v34, 16  ;;  %v415_v56 = vor.u32 %v414_v44, %v411_v40  ;;  %v436_v59 = vshll.u32 %v5657_v34, 16  ;;  %v5715_v36 = vld [vmem:[%s5546_s7 + $0x58] sm:$0xf] }
  0x72   : > { %7212 = vst [vmem:[#allocation15_spill] sm:$0xff] %v5666_v10  ;;  %4641 = vmatmul.mubr.msk.bf16.vlgmr.msra.gmra.mrb[0].mxu0 %vm753_vm2, %v5666_v10  ;;  %4508 = vmatprep.mubr.msk.bf16.mxu1 %vm753_vm2, %v5666_v10  ;;  %v397_v55 = vsel %vm5587_vm3, %v392_v43, %v396_v20  ;;  %v442_v60 = vshll.u32 %v5663_v42, 16  ;;  %v425_v62 = vor.u32 %v424_v50, %v420_v45  ;;  %v430_v0 = vrot.slane %v428_v51, 5  ;;  %p5243_p7 = pnand %p5242_p3, %p5236_p8 }
  0x73   : > { %4673 = vmatpush3.bf16.msra.mxu0 %v5569_v11  ;;  %v407_v61 = vsel %vm5587_vm3, %v402_v48, %v406_v31  ;;  %v435_v1 = vrot.slane %v433_v52, 4  ;;  %v416_v7 = vrot.slane %v415_v56, 4  ;;  %v438_v8 = vrot.slane %v436_v59, 5 }
  0x74   : > { %v5692_v5 = vcombine.low %v397_v55, %v407_v61  ;;  %v444_v9 = vrot.slane %v442_v60, 5  ;;  %4706 = vmatprep.subr.bf16.mxu0 %v5671_v47  ;;  %v426_v12 = vrot.slane %v425_v62, 4  ;;  %v446_v11 = vshrl.u32 %v5663_v42, 16  ;;  %v5729_v55 = vld [vmem:[%s5546_s7 + $0x5c] sm:$0x1] }
  0x75   : > { %v452_v15 = vshll.u32 %v5669_v46, 16  ;;  %v457_v17 = vshrl.u32 %v5676_v53, 16  ;;  %v421_v20 = vsel %vm5587_vm3, %v416_v7, %v420_v45  ;;  %v439_v21 = vor.u32 %v438_v8, %v435_v1  ;;  %v5734_v60 = vld [vmem:[%s5546_s7 + $0x60] sm:$0xf] }
  0x76   : > { %7213 = vst [vmem:[#allocation16_spill] sm:$0xff] %v5692_v5  ;;  %4644 = vmatprep.mubr.msk.bf16.mxu0 %vm753_vm2, %v5692_v5  ;;  %4509 = vmatmul.mubr.msk.bf16.gmra.mrb[4].mxu1 %vm753_vm2, %v5692_v5  ;;  %v460_v23 = vshll.u32 %v5676_v53, 16  ;;  %v466_v24 = vshll.u32 %v5690_v4, 16  ;;  %v431_v28 = vsel %vm5587_vm3, %v426_v12, %v430_v0  ;;  %v448_v31 = vrot.slane %v446_v11, 4 }
  0x77   : > { %v454_v32 = vrot.slane %v452_v15, 5  ;;  %v459_v33 = vrot.slane %v457_v17, 4  ;;  %vm1274_vm4 = vcmask 1042432   ;;  %vm1275_vm5 = vcmask 1046532  }
  0x78   : > { %v5717_v37 = vcombine.low %v421_v20, %v431_v28  ;;  %v440_v40 = vrot.slane %v439_v21, 4  ;;  %v462_v41 = vrot.slane %v460_v23, 5  ;;  %v468_v43 = vrot.slane %v466_v24, 5  ;;  %v5741_v20 = vld [vmem:[%s5546_s7 + $0x64] sm:$0xf]  ;;  %vm5774_vm6 = vmor %vm1274_vm4, %vm1275_vm5 }
  0x79   : > { %v449_v44 = vor.u32 %v448_v31, %v444_v9  ;;  %v470_v45 = vshrl.u32 %v5690_v4, 16  ;;  %v476_v48 = vshll.u32 %v5705_v22, 16  ;;  %v481_v50 = vshrl.u32 %v5710_v27, 16 }
  0x7a   : > { %7214 = vst [vmem:[#allocation17_spill] sm:$0xff] %v5717_v37  ;;  %4645 = vmatmul.mubr.msk.bf16.gmra.mrb[4].mxu0 %vm753_vm2, %v5717_v37  ;;  %4512 = vmatprep.mubr.msk.bf16.mxu1 %vm753_vm2, %v5717_v37  ;;  %v445_v51 = vsel %vm5587_vm3, %v440_v40, %v444_v9  ;;  %v463_v52 = vor.u32 %v462_v41, %v459_v33  ;;  %v484_v56 = vshll.u32 %v5710_v27, 16  ;;  %v490_v59 = vshll.u32 %v5715_v36, 16  ;;  %v5749_v33 = vld [vmem:[%s5546_s7 + $0x68] sm:$0x1] }
  0x7b   : > { %v450_v61 = vrot.slane %v449_v44, 4  ;;  %v472_v62 = vrot.slane %v470_v45, 4  ;;  %v478_v0 = vrot.slane %v476_v48, 5  ;;  %v483_v1 = vrot.slane %v481_v50, 4  ;;  %v5917_v37 = vld [vmem:[%s5546_s7 + $0x9c] sm:$0xf] }
  0x7c   : > { %v464_v7 = vrot.slane %v463_v52, 4  ;;  %v486_v8 = vrot.slane %v484_v56, 5  ;;  %v492_v12 = vrot.slane %v490_v59, 5  ;;  %v494_v9 = vshrl.u32 %v5715_v36, 16 }
  0x7d   : > { %v455_v11 = vsel %vm5587_vm3, %v450_v61, %v454_v32  ;;  %v473_v15 = vor.u32 %v472_v62, %v468_v43  ;;  %v500_v17 = vshll.u32 %v5729_v55, 16  ;;  %v505_v21 = vshrl.u32 %v5734_v60, 16  ;;  %v5766_v62 = vld [vmem:[%s5546_s7 + $0x70] sm:$0xf] }
  0x7e   : > { %v5744_v23 = vcombine.low %v445_v51, %v455_v11  ;;  %v469_v24 = vsel %vm5587_vm3, %v464_v7, %v468_v43  ;;  %v487_v28 = vor.u32 %v486_v8, %v483_v1  ;;  %v496_v31 = vrot.slane %v494_v9, 4  ;;  %v5759_v51 = vld [vmem:[%s5546_s7 + $0x6c] sm:$0xf] }
  0x7f   : > { %v474_v40 = vrot.slane %v473_v15, 4  ;;  %v502_v32 = vrot.slane %v500_v17, 5  ;;  %v507_v41 = vrot.slane %v505_v21, 4  ;;  %v508_v44 = vshll.u32 %v5734_v60, 16  ;;  %v5786_v21 = vld [vmem:[%s5546_s7 + $0x74] sm:$0x1] }
  0x80   : > { %7215 = vst [vmem:[#allocation18_spill] sm:$0xff] %v5744_v23  ;;  %4648 = vmatprep.mubr.msk.bf16.mxu0 %vm753_vm2, %v5744_v23  ;;  %4513 = vmatmul.mubr.msk.bf16.gmra.mrb[8].mxu1 %vm753_vm2, %v5744_v23  ;;  %v488_v45 = vrot.slane %v487_v28, 4  ;;  %v497_v48 = vor.u32 %v496_v31, %v492_v12  ;;  %v514_v43 = vshll.u32 %v5741_v20, 16  ;;  %v518_v50 = vshrl.u32 %v5741_v20, 16 }
  0x81   : > { %v479_v52 = vsel %vm5587_vm3, %v474_v40, %v478_v0  ;;  %v510_v56 = vrot.slane %v508_v44, 5  ;;  %v524_v59 = vshll.u32 %v5749_v33, 16  ;;  %v4040_v61 = vrot.slane %v5572_v16, 9 }
  0x82   : > { %v5768_v1 = vcombine.low %v469_v24, %v479_v52  ;;  %v493_v7 = vsel %vm5587_vm3, %v488_v45, %v492_v12  ;;  %v498_v8 = vrot.slane %v497_v48, 4  ;;  %v516_v9 = vrot.slane %v514_v43, 5 }
  0x83   : > { %v511_v0 = vor.u32 %v510_v56, %v507_v41  ;;  %v520_v15 = vrot.slane %v518_v50, 4  ;;  %v526_v17 = vrot.slane %v524_v59, 5  ;;  %v1286_v16 = vrot.slane %v5576_v18, 5  ;;  %v5796_v50 = vld [vmem:[%s5546_s7 + $0x78] sm:$0xf] }
  0x84   : > { %7216 = vst [vmem:[#allocation19_spill] sm:$0xff] %v5768_v1  ;;  %4649 = vmatmul.mubr.msk.bf16.gmra.mrb[8].mxu0 %vm753_vm2, %v5768_v1  ;;  %4516 = vmatprep.mubr.msk.bf16.mxu1 %vm753_vm2, %v5768_v1  ;;  %v503_v12 = vsel %vm5587_vm3, %v498_v8, %v502_v32  ;;  %v529_v24 = vshrl.u32 %v5759_v51, 16  ;;  %v532_v28 = vshll.u32 %v5759_v51, 16  ;;  %v538_v31 = vshll.u32 %v5766_v62, 16  ;;  %v5805_v8 = vld [vmem:[%s5546_s7 + $0x7c] sm:$0xf] }
  0x85   : > { %v5791_v18 = vcombine.low %v493_v7, %v503_v12  ;;  %v512_v40 = vrot.slane %v511_v0, 4  ;;  %v521_v41 = vor.u32 %v520_v15, %v516_v9  ;;  %v1287_v44 = vsel %vm5774_vm6, %v4040_v61, %v1286_v16  ;;  %v5808_v61 = vld [vmem:[%s5546_s7 + $0x80] sm:$0x1] }
  0x86   : > { %v1288_v45 = vrot.slane %v1286_v16, 4  ;;  %v531_v48 = vrot.slane %v529_v24, 4  ;;  %v534_v32 = vrot.slane %v532_v28, 5  ;;  %v540_v43 = vrot.slane %v538_v31, 5 }
  0x87   : > { %7219 = vst [vmem:[#allocation20_spill] sm:$0xff] %v5791_v18  ;;  %4652 = vmatprep.mubr.msk.bf16.mxu0 %vm753_vm2, %v5791_v18  ;;  %v517_v52 = vsel %vm5587_vm3, %v512_v40, %v516_v9  ;;  %v522_v56 = vrot.slane %v521_v41, 4  ;;  %v542_v59 = vshrl.u32 %v5766_v62, 16  ;;  %v548_v7 = vshll.u32 %v5786_v21, 16 }
  0x88   : > { %4517 = vmatmul.mubr.msk.bf16.gmra.mrb[12].mxu1 %vm753_vm2, %v5791_v18  ;;  %v1290_v0 = vsel %vm5774_vm6, %v1288_v45, %v1289_v38  ;;  %v535_v15 = vor.u32 %v534_v32, %v531_v48  ;;  %v4041_v9 = vrot.slane %v5598_v30, 9  ;;  %v1295_v16 = vrot.slane %v1293_v57, 4 }
  0x89   : > { %v527_v12 = vsel %vm5587_vm3, %v522_v56, %v526_v17  ;;  %v5821_v24 = vcombine.low %v1287_v44, %v1290_v0  ;;  %v544_v28 = vrot.slane %v542_v59, 4  ;;  %v550_v31 = vrot.slane %v548_v7, 5 }
  0x8a   : > { %v5823_v40 = vcombine.low %v517_v52, %v527_v12  ;;  %v536_v19 = vrot.slane %v535_v15, 4  ;;  %v1294_v38 = vsel %vm5774_vm6, %v4041_v9, %v1293_v57  ;;  %v1297_v41 = vsel %vm5774_vm6, %v1295_v16, %v1296_v58  ;;  %v5847_v52 = vld [vmem:[%s5546_s7 + $0x84] sm:$0xf]  ;;  %v5854_v12 = vld [vmem:[%s5546_s7 + $0x88] sm:$0xf] }
  0x8b   : > { %7220 = vst [vmem:[#allocation21_spill] sm:$0xff] %v5821_v24  ;;  %v545_v45 = vor.u32 %v544_v28, %v540_v43  ;;  %v5833_v17 = vcombine.low %v1294_v38, %v1297_v41  ;;  %v553_v44 = vshrl.u32 %v5796_v50, 16  ;;  %v556_v48 = vshll.u32 %v5796_v50, 16  ;;  %v5860_v41 = vld [vmem:[%s5546_s7 + $0x8c] sm:$0x1] }
  0x8c   : > { %7221 = vst [vmem:[#allocation22_spill] sm:$0xff] %v5823_v40  ;;  %4653 = vmatmul.mubr.msk.bf16.gmra.mrb[12].mxu0 %vm753_vm2, %v5823_v40  ;;  %4520 = vmatprep.mubr.msk.bf16.mxu1 %vm753_vm2, %v5823_v40  ;;  %v541_v39 = vsel %vm5587_vm3, %v536_v19, %v540_v43  ;;  %v562_v57 = vshll.u32 %v5805_v8, 16  ;;  %v566_v58 = vshrl.u32 %v5805_v8, 16  ;;  %v572_v32 = vshll.u32 %v5808_v61, 16 }
  0x8d   : > { %7222 = vst [vmem:[#allocation23_spill] sm:$0xff] %v5833_v17  ;;  %4674 = vmatprep.mubr.msk.bf16.mxu0 %vm753_vm2, %v5821_v24  ;;  %v546_v56 = vrot.slane %v545_v45, 4  ;;  %v555_v59 = vrot.slane %v553_v44, 4  ;;  %v558_v7 = vrot.slane %v556_v48, 5  ;;  %v4042_v0 = vrot.slane %v5615_v49, 9 }
  0x8e   : > { %v564_v15 = vrot.slane %v562_v57, 5  ;;  %v568_v9 = vrot.slane %v566_v58, 4  ;;  %v574_v43 = vrot.slane %v572_v32, 5  ;;  %v1300_v16 = vrot.slane %v5620_v54, 5 }
  0x8f   : > { %v551_v28 = vsel %vm5587_vm3, %v546_v56, %v550_v31  ;;  %v559_v19 = vor.u32 %v558_v7, %v555_v59  ;;  %v1303_v38 = vrot.slane %v5628_v63, 5  ;;  %v577_v45 = vshrl.u32 %v5847_v52, 16 }
  0x90   : > { %v5863_v44 = vcombine.low %v541_v39, %v551_v28  ;;  %v569_v48 = vor.u32 %v568_v9, %v564_v15  ;;  %v1301_v57 = vsel %vm5774_vm6, %v4042_v0, %v1300_v16  ;;  %v1302_v58 = vrot.slane %v1300_v16, 4  ;;  %v5875_v0 = vld [vmem:[#allocation5 + $0x38] sm:$0xff]  }
  0x91   : > { %v560_v32 = vrot.slane %v559_v19, 4  ;;  %v579_v40 = vrot.slane %v577_v45, 4  ;;  %v580_v31 = vshll.u32 %v5847_v52, 16  ;;  %v586_v56 = vshll.u32 %v5854_v12, 16  ;;  %7224 = vst [vmem:[#allocation25_spill] sm:$0xff] %v5875_v0 }
  0x92   : > { %7223 = vst [vmem:[#allocation24_spill] sm:$0xff] %v5863_v44  ;;  %4521 = vmatmul.mubr.msk.bf16.gmra.mrb[16].mxu1 %vm753_vm2, %v5863_v44  ;;  %v570_v63 = vrot.slane %v569_v48, 4  ;;  %v1304_v39 = vsel %vm5774_vm6, %v1302_v58, %v1303_v38  ;;  %v590_v59 = vshrl.u32 %v5854_v12, 16  ;;  %v596_v7 = vshll.u32 %v5860_v41, 16  ;;  %v5882_v45 = vld [vmem:[%s5546_s7 + $0x90] sm:$0xf] }
  0x93   : > { %v565_v9 = vsel %vm5587_vm3, %v560_v32, %v564_v15  ;;  %v5879_v16 = vcombine.low %v1301_v57, %v1304_v39  ;;  %v582_v28 = vrot.slane %v580_v31, 5  ;;  %v588_v19 = vrot.slane %v586_v56, 5  ;;  %v5885_v48 = vld [vmem:[%s5546_s7 + $0x94] sm:$0xf]  ;;  %v5900_v39 = vld [vmem:[%s5546_s7 + $0x98] sm:$0x1] }
  0x94   : > { %4675 = vmatmul.mubr.msk.bf16.vlgmr.msra.gmra.mrb[0].mxu0 %vm753_vm2, %v5833_v17  ;;  %v575_v38 = vsel %vm5587_vm3, %v570_v63, %v574_v43  ;;  %v592_v58 = vrot.slane %v590_v59, 4  ;;  %v598_v44 = vrot.slane %v596_v7, 5  ;;  %v4043_v18 = vrot.slane %v5636_v6, 9 }
  0x95   : > { %7225 = vst [vmem:[#allocation26_spill] sm:$0xff] %v5879_v16  ;;  %4707 = vmatpush3.bf16.msra.mxu0 %v5671_v47  ;;  %v5893_v15 = vcombine.low %v565_v9, %v575_v38  ;;  %4678 = vmatprep.mubr.msk.bf16.mxu0 %vm753_vm2, %v5879_v16  ;;  %v583_v57 = vor.u32 %v582_v28, %v579_v40  ;;  %v1307_v32 = vrot.slane %v5640_v13, 5  ;;  %v1310_v31 = vrot.slane %v5650_v26, 5 }
  0x96   : > { %v593_v56 = vor.u32 %v592_v58, %v588_v19  ;;  %v601_v43 = vshrl.u32 %v5882_v45, 16  ;;  %v604_v63 = vshll.u32 %v5882_v45, 16  ;;  %v610_v47 = vshll.u32 %v5885_v48, 16  ;;  %4740 = vmatprep.subr.bf16.mxu0 %v5875_v0 }
  0x97   : > { %7226 = vst [vmem:[#allocation27_spill] sm:$0xff] %v5893_v15  ;;  %4524 = vmatprep.mubr.msk.bf16.mxu1 %vm753_vm2, %v5893_v15  ;;  %v584_v40 = vrot.slane %v583_v57, 4  ;;  %v1308_v59 = vsel %vm5774_vm6, %v4043_v18, %v1307_v32  ;;  %v1309_v26 = vrot.slane %v1307_v32, 4  ;;  %v614_v7 = vshrl.u32 %v5885_v48, 16 }
  0x98   : > { %v594_v9 = vrot.slane %v593_v56, 4  ;;  %v603_v28 = vrot.slane %v601_v43, 4  ;;  %v606_v38 = vrot.slane %v604_v63, 5  ;;  %v612_v58 = vrot.slane %v610_v47, 5  ;;  %v5925_v63 = vld [vmem:[%s5546_s7 + $0xa0] sm:$0xf] }
  0x99   : > { %v589_v1 = vsel %vm5587_vm3, %v584_v40, %v588_v19  ;;  %v1311_v23 = vsel %vm5774_vm6, %v1309_v26, %v1310_v31  ;;  %v616_v15 = vrot.slane %v614_v7, 4  ;;  %v620_v57 = vshll.u32 %v5900_v39, 16 }
  0x9a   : > { %v599_v18 = vsel %vm5587_vm3, %v594_v9, %v598_v44  ;;  %v5921_v32 = vcombine.low %v1308_v59, %v1311_v23  ;;  %v607_v56 = vor.u32 %v606_v38, %v603_v28  ;;  %v4044_v43 = vrot.slane %v5657_v34, 9  ;;  %v5934_v44 = vld [vmem:[%s5546_s7 + $0xa4] sm:$0x1] }
  0x9b   : > { %v5927_v19 = vcombine.low %v589_v1, %v599_v18  ;;  %v617_v47 = vor.u32 %v616_v15, %v612_v58  ;;  %v622_v31 = vrot.slane %v620_v57, 5  ;;  %v1314_v40 = vrot.slane %v5663_v42, 5 }
  0x9c   : > { %7227 = vst [vmem:[#allocation28_spill] sm:$0xff] %v5921_v32  ;;  %4679 = vmatmul.mubr.msk.bf16.gmra.mrb[4].mxu0 %vm753_vm2, %v5921_v32  ;;  %v608_v26 = vrot.slane %v607_v56, 4  ;;  %v1317_v7 = vrot.slane %v5669_v46, 5  ;;  %v625_v23 = vshrl.u32 %v5917_v37, 16  ;;  %v628_v59 = vshll.u32 %v5917_v37, 16 }
  0x9d   : > { %7228 = vst [vmem:[#allocation29_spill] sm:$0xff] %v5927_v19  ;;  %4525 = vmatmul.mubr.msk.bf16.gmra.mrb[20].mxu1 %vm753_vm2, %v5927_v19  ;;  %v618_v1 = vrot.slane %v617_v47, 4  ;;  %v1315_v15 = vsel %vm5774_vm6, %v4044_v43, %v1314_v40  ;;  %v1316_v9 = vrot.slane %v1314_v40, 4  ;;  %v634_v28 = vshll.u32 %v5925_v63, 16  ;;  %v5952_v40 = vld [vmem:[%s5546_s7 + $0xa8] sm:$0xf] }
  0x9e   : > { %v613_v46 = vsel %vm5587_vm3, %v608_v26, %v612_v58  ;;  %v627_v38 = vrot.slane %v625_v23, 4  ;;  %v630_v57 = vrot.slane %v628_v59, 5  ;;  %v638_v18 = vshrl.u32 %v5925_v63, 16  ;;  %v5959_v23 = vld [vmem:[%s5546_s7 + $0xac] sm:$0xf] }
  0x9f   : > { %v623_v56 = vsel %vm5587_vm3, %v618_v1, %v622_v31  ;;  %v1318_v47 = vsel %vm5774_vm6, %v1316_v9, %v1317_v7  ;;  %v636_v19 = vrot.slane %v634_v28, 5  ;;  %v644_v43 = vshll.u32 %v5934_v44, 16  ;;  %v5969_v28 = vld [vmem:[%s5546_s7 + $0xb0] sm:$0x1] }
  0xa0   : > { %v5954_v5 = vcombine.low %v613_v46, %v623_v56  ;;  %v5956_v10 = vcombine.low %v1315_v15, %v1318_v47  ;;  %v631_v58 = vor.u32 %v630_v57, %v627_v38  ;;  %v640_v26 = vrot.slane %v638_v18, 4 }
  0xa1   : > { %v646_v59 = vrot.slane %v644_v43, 5  ;;  %v4045_v31 = vrot.slane %v5676_v53, 9  ;;  %v1321_v1 = vrot.slane %v5690_v4, 5  ;;  %v1324_v7 = vrot.slane %v5705_v22, 5 }
  0xa2   : > { %7229 = vst [vmem:[#allocation30_spill] sm:$0xff] %v5954_v5  ;;  %7230 = vst [vmem:[#allocation31_spill] sm:$0xff] %v5956_v10  ;;  %4528 = vmatprep.mubr.msk.bf16.mxu1 %vm753_vm2, %v5954_v5  ;;  %4682 = vmatprep.mubr.msk.bf16.mxu0 %vm753_vm2, %v5956_v10  ;;  %v632_v9 = vrot.slane %v631_v58, 4  ;;  %v641_v15 = vor.u32 %v640_v26, %v636_v19  ;;  %v649_v46 = vshrl.u32 %v5952_v40, 16  ;;  %v652_v38 = vshll.u32 %v5952_v40, 16 }
  0xa3   : > { %v1322_v57 = vsel %vm5774_vm6, %v4045_v31, %v1321_v1  ;;  %v1323_v18 = vrot.slane %v1321_v1, 4  ;;  %v658_v22 = vshll.u32 %v5959_v23, 16  ;;  %v662_v56 = vshrl.u32 %v5959_v23, 16  ;;  %v5983_v1 = vld [vmem:[%s5546_s7 + $0xb4] sm:$0xf] }
  0xa4   : > { %v637_v47 = vsel %vm5587_vm3, %v632_v9, %v636_v19  ;;  %v642_v43 = vrot.slane %v641_v15, 4  ;;  %v651_v58 = vrot.slane %v649_v46, 4  ;;  %v654_v26 = vrot.slane %v652_v38, 5  ;;  %v5991_v9 = vld [vmem:[%s5546_s7 + $0xb8] sm:$0xf] }
  0xa5   : > { %v1325_v5 = vsel %vm5774_vm6, %v1323_v18, %v1324_v7  ;;  %v660_v10 = vrot.slane %v658_v22, 5  ;;  %v664_v32 = vrot.slane %v662_v56, 4  ;;  %v668_v31 = vshll.u32 %v5969_v28, 16 }
  0xa6   : > { %v647_v16 = vsel %vm5587_vm3, %v642_v43, %v646_v59  ;;  %v5987_v17 = vcombine.low %v1322_v57, %v1325_v5  ;;  %v655_v24 = vor.u32 %v654_v26, %v651_v58  ;;  %v4046_v19 = vrot.slane %v5710_v27, 9  ;;  %v6000_v59 = vld [vmem:[%s5546_s7 + $0xbc] sm:$0x1] }
  0xa7   : > { %v5993_v15 = vcombine.low %v637_v47, %v647_v16  ;;  %v665_v7 = vor.u32 %v664_v32, %v660_v10  ;;  %v670_v46 = vrot.slane %v668_v31, 5  ;;  %v1328_v38 = vrot.slane %v5715_v36, 5 }
  0xa8   : > { %7231 = vst [vmem:[#allocation32_spill] sm:$0xff] %v5987_v17  ;;  %4683 = vmatmul.mubr.msk.bf16.gmra.mrb[8].mxu0 %vm753_vm2, %v5987_v17  ;;  %v656_v18 = vrot.slane %v655_v24, 4  ;;  %v1331_v22 = vrot.slane %v5729_v55, 5  ;;  %v673_v5 = vshrl.u32 %v5983_v1, 16  ;;  %v676_v57 = vshll.u32 %v5983_v1, 16 }
  0xa9   : > { %7232 = vst [vmem:[#allocation33_spill] sm:$0xff] %v5993_v15  ;;  %4529 = vmatmul.mubr.msk.bf16.gmra.mrb[24].mxu1 %vm753_vm2, %v5993_v15  ;;  %v666_v16 = vrot.slane %v665_v7, 4  ;;  %v1329_v32 = vsel %vm5774_vm6, %v4046_v19, %v1328_v38  ;;  %v1330_v56 = vrot.slane %v1328_v38, 4  ;;  %v682_v47 = vshll.u32 %v5991_v9, 16 }
  0xaa   : > { %v661_v24 = vsel %vm5587_vm3, %v656_v18, %v660_v10  ;;  %v675_v55 = vrot.slane %v673_v5, 4  ;;  %v678_v43 = vrot.slane %v676_v57, 5  ;;  %v686_v58 = vshrl.u32 %v5991_v9, 16 }
  0xab   : > { %v671_v26 = vsel %vm5587_vm3, %v666_v16, %v670_v46  ;;  %v1332_v31 = vsel %vm5774_vm6, %v1330_v56, %v1331_v22  ;;  %v684_v7 = vrot.slane %v682_v47, 5  ;;  %v692_v15 = vshll.u32 %v6000_v59, 16 }
  0xac   : > { %v6017_v19 = vcombine.low %v661_v24, %v671_v26  ;;  %v6019_v38 = vcombine.low %v1329_v32, %v1332_v31  ;;  %v679_v17 = vor.u32 %v678_v43, %v675_v55  ;;  %v688_v0 = vrot.slane %v686_v58, 4 }
  0xad   : > { %v694_v10 = vrot.slane %v692_v15, 5  ;;  %v4047_v18 = vrot.slane %v5734_v60, 9  ;;  %v1335_v5 = vrot.slane %v5741_v20, 5  ;;  %v1338_v57 = vrot.slane %v5749_v33, 5 }
  0xae   : > { %4532 = vmatprep.mubr.msk.bf16.mxu1 %vm753_vm2, %v6017_v19  ;;  %4686 = vmatprep.mubr.msk.bf16.mxu0 %vm753_vm2, %v6019_v38  ;;  %v680_v46 = vrot.slane %v679_v17, 4  ;;  %v689_v22 = vor.u32 %v688_v0, %v684_v7  ;;  %v4048_v16 = vrot.slane %v5759_v51, 9  ;;  %v1342_v32 = vrot.slane %v5766_v62, 5 }
  0xaf   : > { %v1336_v15 = vsel %vm5774_vm6, %v4047_v18, %v1335_v5  ;;  %v1337_v56 = vrot.slane %v1335_v5, 4  ;;  %v4006_v47 = vcombine.low %v5557_v2, %v5560_v3  ;;  %v1345_v33 = vrot.slane %v5786_v21, 5 }
  0xb0   : > { %v685_v24 = vsel %vm5587_vm3, %v680_v46, %v684_v7  ;;  %v690_v55 = vrot.slane %v689_v22, 4  ;;  %v1343_v17 = vsel %vm5774_vm6, %v4048_v16, %v1342_v32  ;;  %v1344_v0 = vrot.slane %v1342_v32, 4 }
  0xb1   : > { %v1339_v43 = vsel %vm5774_vm6, %v1337_v56, %v1338_v57  ;;  %v4049_v58 = vrot.slane %v5796_v50, 9  ;;  %v1349_v26 = vrot.slane %v5805_v8, 5  ;;  %v1352_v31 = vrot.slane %v5808_v61, 5 }
  0xb2   : > { %v695_v2 = vsel %vm5587_vm3, %v690_v55, %v694_v10  ;;  %v6046_v3 = vcombine.low %v1336_v15, %v1339_v43  ;;  %v1346_v21 = vsel %vm5774_vm6, %v1344_v0, %v1345_v33  ;;  %v4050_v7 = vrot.slane %v5847_v52, 9 }
  0xb3   : > { %v6051_v18 = vcombine.low %v685_v24, %v695_v2  ;;  %v6053_v5 = vcombine.low %v1343_v17, %v1346_v21  ;;  %v1351_v57 = vrot.slane %v1349_v26, 4  ;;  %v1356_v61 = vrot.slane %v5854_v12, 5  ;;  %v6091_v21 = vld [vmem:[#allocation5 + $0x18] sm:$0xff]  }
  0xb4   : > { %4687 = vmatmul.mubr.msk.bf16.gmra.mrb[12].mxu0 %vm753_vm2, %v6046_v3  ;;  %v1359_v46 = vrot.slane %v5860_v41, 5  ;;  %v1350_v10 = vsel %vm5774_vm6, %v4049_v58, %v1349_v26  ;;  %v1363_v16 = vrot.slane %v5885_v48, 5  ;;  %v4051_v15 = vrot.slane %v5882_v45, 9 }
  0xb5   : > { %4533 = vmatmul.mubr.msk.bf16.gmra.mrb[28].mxu1 %vm753_vm2, %v6051_v18  ;;  %4690 = vmatprep.mubr.msk.bf16.mxu0 %vm753_vm2, %v6053_v5  ;;  %v1353_v22 = vsel %vm5774_vm6, %v1351_v57, %v1352_v31  ;;  %v1357_v32 = vsel %vm5774_vm6, %v4050_v7, %v1356_v61  ;;  %v1358_v41 = vrot.slane %v1356_v61, 4  ;;  %v1366_v33 = vrot.slane %v5900_v39, 5 }
  0xb6   : > { %4538 = vmatprep.mubr.msk.bf16.mxu1 %vm753_vm2, %v4006_v47  ;;  %v1365_v56 = vrot.slane %v1363_v16, 4  ;;  %v1370_v24 = vrot.slane %v5925_v63, 5  ;;  %v6074_v55 = vcombine.low %v1350_v10, %v1353_v22  ;;  %v4052_v47 = vrot.slane %v5917_v37, 9 }
  0xb7   : > { %v1360_v17 = vsel %vm5774_vm6, %v1358_v41, %v1359_v46  ;;  %v1373_v58 = vrot.slane %v5934_v44, 5  ;;  %v6084_v26 = vcombine.low %v5598_v30, %v5601_v35  ;;  %v1364_v39 = vsel %vm5774_vm6, %v4051_v15, %v1363_v16 }
  0xb8   : > { %v6078_v0 = vcombine.low %v1357_v32, %v1360_v17  ;;  %v1372_v43 = vrot.slane %v1370_v24, 4  ;;  %v1367_v31 = vsel %vm5774_vm6, %v1365_v56, %v1366_v33  ;;  %v1377_v2 = vrot.slane %v5959_v23, 5 }
  0xb9   : > { %v1371_v30 = vsel %vm5774_vm6, %v4052_v47, %v1370_v24  ;;  %v1384_v44 = vrot.slane %v5991_v9, 5  ;;  %v6109_v7 = vcombine.low %v5615_v49, %v5620_v54  ;;  %v6111_v57 = vcombine.low %v1364_v39, %v1367_v31 }
  0xba   : > { %v1374_v35 = vsel %vm5774_vm6, %v1372_v43, %v1373_v58  ;;  %v4053_v61 = vrot.slane %v5952_v40, 9  ;;  %v6116_v46 = vcombine.low %v5759_v51, %v5766_v62  ;;  %v1379_v10 = vrot.slane %v1377_v2, 4 }
  0xbb   : > { %v6124_v22 = vcombine.low %v5847_v52, %v5854_v12  ;;  %v6128_v49 = vcombine.low %v5882_v45, %v5885_v48  ;;  %v6131_v54 = vcombine.low %v1371_v30, %v1374_v35  ;;  %v1380_v51 = vrot.slane %v5969_v28, 5  ;;  %v6141_v12 = vld [vmem:[%s5546_s7 + $0xc4] sm:$0xf] }
  0xbc   : > { %4691 = vmatmul.mubr.msk.bf16.gmra.mrb[16].mxu0 %vm753_vm2, %v6074_v55  ;;  %v4054_v62 = vrot.slane %v5983_v1, 9  ;;  %v1387_v52 = vrot.slane %v6000_v59, 5  ;;  %v6145_v45 = vcombine.low %v5952_v40, %v5959_v23  ;;  %v6149_v48 = vcombine.low %v5983_v1, %v5991_v9  ;;  %v6171_v23 = vld [vmem:[%s5546_s7 + $0xc0] sm:$0xf]  ;;  %v303_v1 = vld [vmem:[%s5546_s7 + $0xc8] sm:$0x1] }
  0xbd   : > { %4539 = vmatmul.mubr.msk.bf16.vlgmr.msra.gmra.mrb[0].mxu1 %vm753_vm2, %v5595_v29  ;;  %4694 = vmatprep.mubr.msk.bf16.mxu0 %vm753_vm2, %v6078_v0  ;;  %v6153_v28 = vcombine.low %v5636_v6, %v5640_v13  ;;  %v2132_v40 = vrot.slane %v6141_v12, 5  ;;  %v6178_v9 = vcombine.low %v5657_v34, %v5663_v42  ;;  %v4124_v32 = vrot.slane %v6171_v23, 9 }
  0xbe   : > { %4571 = vmatpush3.bf16.msra.mxu1 %v5642_v14  ;;  %4542 = vmatprep.mubr.msk.bf16.mxu1 %vm753_vm2, %v6084_v26  ;;  %v6120_v14 = vcombine.low %v5796_v50, %v5805_v8  ;;  %v6137_v50 = vcombine.low %v5917_v37, %v5925_v63  ;;  %v1386_v8 = vrot.slane %v1384_v44, 4  ;;  %v1378_v37 = vsel %vm5774_vm6, %v4053_v61, %v1377_v2 }
  0xbf   : > { %4604 = vmatprep.subr.bf16.mxu1 %v6091_v21  ;;  %v1381_v63 = vsel %vm5774_vm6, %v1379_v10, %v1380_v51  ;;  %v1385_v6 = vsel %vm5774_vm6, %v4054_v62, %v1384_v44  ;;  %v2134_v41 = vrot.slane %v2132_v40, 4  ;;  %v2135_v15 = vrot.slane %v303_v1, 5 }
  0xc0   : > { %v1388_v13 = vsel %vm5774_vm6, %v1386_v8, %v1387_v52  ;;  %v6180_v59 = vcombine.low %v1378_v37, %v1381_v63  ;;  %v1898_v56 = vshrl.u32 %v6171_v23, 16  ;;  %v1901_v33 = vshll.u32 %v6171_v23, 16  ;;  %v5172_v37 = vld [vmem:[%s5546_s7 + $0x8] sm:$0x1] }
  0xc1   : > { %v6182_v16 = vcombine.low %v1385_v6, %v1388_v13  ;;  %v1907_v24 = vshll.u32 %v6141_v12, 16  ;;  %v1911_v17 = vshrl.u32 %v6141_v12, 16  ;;  %v6191_v34 = vcombine.low %v5676_v53, %v5690_v4 }
  0xc2   : > { %v1900_v42 = vrot.slane %v1898_v56, 4  ;;  %v1903_v47 = vrot.slane %v1901_v33, 5  ;;  %v2133_v39 = vsel %vm5774_vm6, %v4124_v32, %v2132_v40  ;;  %v2136_v53 = vsel %vm5774_vm6, %v2134_v41, %v2135_v15  ;;  %v5173_v40 = vld [vmem:[%s5546_s7] sm:$0xf]  ;;  %v7235_v56 = vld [vmem:[#allocation23_spill] sm:$0xff]  ;;  %v5174_v33 = vld [vmem:[#allocation5 + $0x20] sm:$0xff]  }
  0xc3   : > { %v1909_v43 = vrot.slane %v1907_v24, 5  ;;  %v1913_v58 = vrot.slane %v1911_v17, 4  ;;  %v1917_v2 = vshll.u32 %v303_v1, 16  ;;  %v6205_v61 = vcombine.low %v2133_v39, %v2136_v53  ;;  %v7234_v15 = vld [vmem:[#allocation21_spill] sm:$0xff]  ;;  %v7236_v24 = vld [vmem:[#allocation26_spill] sm:$0xff]  ;;  %v7237_v17 = vld [vmem:[#allocation28_spill] sm:$0xff] }
  0xc4   : > { %4695 = vmatmul.mubr.msk.bf16.gmra.mrb[20].mxu0 %vm753_vm2, %v6111_v57  ;;  %v1904_v4 = vor.u32 %v1903_v47, %v1900_v42  ;;  %v6209_v10 = vcombine.low %v5710_v27, %v5715_v36  ;;  %v6217_v8 = vcombine.low %v5734_v60, %v5741_v20  ;;  %v5170_v27 = vld [vmem:[#allocation5 + $0x40] sm:$0xff]   ;;  %v7233_v36 = vld [vmem:[#allocation25_spill] sm:$0xff]  ;;  %v1282_v63 = vrot.slane %v5172_v37, 5  ;;  %v7238_v42 = vld [vmem:[#allocation31_spill] sm:$0xff] }
  0xc5   : > { %4543 = vmatmul.mubr.msk.bf16.gmra.mrb[4].mxu1 %vm753_vm2, %v6109_v7  ;;  %4698 = vmatprep.mubr.msk.bf16.mxu0 %vm753_vm2, %v6131_v54  ;;  %v1914_v31 = vor.u32 %v1913_v58, %v1909_v43  ;;  %v1919_v44 = vrot.slane %v1917_v2, 5  ;;  %v5171_v60 = vld [vmem:[%s5546_s7 + $0x4] sm:$0xf]  ;;  %v4039_v6 = vrot.slane %v5173_v40, 9  ;;  %v6296_v47 = vld [vmem:[%s5546_s7 + $0xcc] sm:$0xf] }
  0xc6   : > { %4546 = vmatprep.mubr.msk.bf16.mxu1 %vm753_vm2, %v6153_v28  ;;  %v1905_v30 = vrot.slane %v1904_v4, 4  ;;  %v1279_v20 = vrot.slane %v5171_v60, 5  ;;  %v7239_v58 = vld [vmem:[#allocation32_spill] sm:$0xff]  ;;  %v7242_v53 = vld [vmem:[#allocation17_spill] sm:$0xff]  ;;  %v7243_v4 = vld [vmem:[#allocation18_spill] sm:$0xff]  ;;  %vm3003_vm7 = vcmask 257024  }
  0xc7   : > { %v1915_v35 = vrot.slane %v1914_v31, 4  ;;  %v7241_v39 = vld [vmem:[#allocation16_spill] sm:$0xff]  ;;  %v7244_v31 = vld [vmem:[#allocation19_spill] sm:$0xff]  ;;  %v7250_v60 = vld [vmem:[#allocation30_spill] sm:$0xff]  ;;  %v5369_v11 = vmov 0   ;;  %vm3006_vm8 = vcmask 253952  }
  0xc8   : > { %v1910_v51 = vsel %vm5587_vm3, %v1905_v30, %v1909_v43  ;;  %v1281_v13 = vrot.slane %v1279_v20, 4  ;;  %v1280_v1 = vsel %vm5774_vm6, %v4039_v6, %v1279_v20  ;;  %v6299_v43 = vld [vmem:[%s5546_s7 + $0xd0] sm:$0xf]  ;;  %v7246_v30 = vld [vmem:[#allocation22_spill] sm:$0xff]  ;;  %v306_v6 = vld [vmem:[%s5546_s7 + $0xd4] sm:$0x1] }
  0xc9   : > { %v1920_v62 = vsel %vm5587_vm3, %v1915_v35, %v1919_v44  ;;  %v7245_v2 = vld [vmem:[#allocation20_spill] sm:$0xff]  ;;  %v7248_v44 = vld [vmem:[#allocation27_spill] sm:$0xff]  ;;  %v2565_v20 = vshll.u32 %v6299_v43, 16  ;;  %v2790_v25 = vrot.slane %v6299_v43, 5  ;;  %3011 = vst.msk [vmem:[%s6451_s21 + $0x18] sm:$0xf] %vm3003_vm7, %v5369_v11 }
  0xca   : > { %v6219_v52 = vcombine.low %v1910_v51, %v1920_v62  ;;  %v1283_v32 = vsel %vm5774_vm6, %v1281_v13, %v1282_v63  ;;  %v7247_v35 = vld [vmem:[#allocation24_spill] sm:$0xff]  ;;  %v7249_v51 = vld [vmem:[#allocation29_spill] sm:$0xff]  ;;  %v2556_v62 = vshrl.u32 %v6296_v47, 16  ;;  %3004 = vst.msk [vmem:[%s6451_s21] sm:$0xf] %vm3003_vm7, %v5369_v11  ;;  %vm3596_vm9 = vcmask 261120  }
  0xcb   : > { %v4055_v41 = vcombine.low %v1280_v1, %v1283_v32  ;;  %v2567_v63 = vrot.slane %v2565_v20, 5  ;;  %v7251_v13 = vld [vmem:[#allocation33_spill] sm:$0xff]  ;;  %v2575_v32 = vshll.u32 %v306_v6, 16  ;;  %3005 = vst.msk [vmem:[%s6451_s21 + $0x4] sm:$0xf] %vm3003_vm7, %v5369_v11 }
  0xcc   : > { %4699 = vmatmul.mubr.msk.bf16.gmra.mrb[24].mxu0 %vm753_vm2, %v6180_v59  ;;  %3008 = vst.msk [vmem:[%s6451_s21 + $0xc] sm:$0xf] %vm3003_vm7, %v5369_v11  ;;  %3009 = vst.msk [vmem:[%s6451_s21 + $0x10] sm:$0xf] %vm3003_vm7, %v5369_v11  ;;  %vm3480_vm10 = vsmask.f32 7938 }
  0xcd   : > { %4547 = vmatmul.mubr.msk.bf16.gmra.mrb[8].mxu1 %vm753_vm2, %v6178_v9  ;;  %4702 = vmatprep.mubr.msk.bf16.mxu0 %vm753_vm2, %v6182_v16  ;;  %3012 = vst.msk [vmem:[%s6451_s21 + $0x1c] sm:$0xf] %vm3003_vm7, %v5369_v11  ;;  %3014 = vst.msk [vmem:[%s6451_s21 + $0x24] sm:$0xf] %vm3003_vm7, %v5369_v11  ;;  %vm3155_vm11 = vsmask.f32 256 }
  0xce   : > { %4550 = vmatprep.mubr.msk.bf16.mxu1 %vm753_vm2, %v6191_v34  ;;  %3015 = vst.msk [vmem:[%s6451_s21 + $0x28] sm:$0xf] %vm3003_vm7, %v5369_v11  ;;  %3017 = vst.msk [vmem:[%s6451_s21 + $0x30] sm:$0xf] %vm3003_vm7, %v5369_v11  ;;  %vm3156_vm12 = vsmask.f32 4368 }
  0xcf   : > { %3018 = vst.msk [vmem:[%s6451_s21 + $0x34] sm:$0xf] %vm3003_vm7, %v5369_v11  ;;  %3020 = vst.msk [vmem:[%s6451_s21 + $0x3c] sm:$0xf] %vm3003_vm7, %v5369_v11 }
  0xd0   : > { %3021 = vst.msk [vmem:[%s6451_s21 + $0x40] sm:$0xf] %vm3003_vm7, %v5369_v11  ;;  %3023 = vst.msk [vmem:[%s6451_s21 + $0x48] sm:$0xf] %vm3003_vm7, %v5369_v11 }
  0xd1   : > { %3024 = vst.msk [vmem:[%s6451_s21 + $0x4c] sm:$0xf] %vm3003_vm7, %v5369_v11  ;;  %3026 = vst.msk [vmem:[%s6451_s21 + $0x54] sm:$0xf] %vm3003_vm7, %v5369_v11 }
  0xd2   : > { %3027 = vst.msk [vmem:[%s6451_s21 + $0x58] sm:$0xf] %vm3003_vm7, %v5369_v11  ;;  %3029 = vst.msk [vmem:[%s6451_s21 + $0x60] sm:$0xf] %vm3003_vm7, %v5369_v11 }
  0xd3   : > { %3030 = vst.msk [vmem:[%s6451_s21 + $0x64] sm:$0xf] %vm3003_vm7, %v5369_v11  ;;  %3032 = vst.msk [vmem:[%s6451_s21 + $0x6c] sm:$0xf] %vm3003_vm7, %v5369_v11 }
  0xd4   : > { %4703 = vmatmul.mubr.msk.bf16.gmra.mrb[28].mxu0 %vm753_vm2, %v6205_v61  ;;  %3033 = vst.msk [vmem:[%s6451_s21 + $0x70] sm:$0xf] %vm3003_vm7, %v5369_v11  ;;  %3035 = vst.msk [vmem:[%s6451_s21 + $0x78] sm:$0xf] %vm3003_vm7, %v5369_v11 }
  0xd5   : > { %4551 = vmatmul.mubr.msk.bf16.gmra.mrb[12].mxu1 %vm753_vm2, %v6209_v10  ;;  %4708 = vmatprep.mubr.msk.bf16.mxu0 %vm753_vm2, %v6084_v26  ;;  %3036 = vst.msk [vmem:[%s6451_s21 + $0x7c] sm:$0xf] %vm3003_vm7, %v5369_v11  ;;  %3038 = vst.msk [vmem:[%s6451_s21 + $0x84] sm:$0xf] %vm3003_vm7, %v5369_v11 }
  0xd6   : > { %4554 = vmatprep.mubr.msk.bf16.mxu1 %vm753_vm2, %v6217_v8  ;;  %3039 = vst.msk [vmem:[%s6451_s21 + $0x88] sm:$0xf] %vm3003_vm7, %v5369_v11  ;;  %3041 = vst.msk [vmem:[%s6451_s21 + $0x90] sm:$0xf] %vm3003_vm7, %v5369_v11 }
  0xd7   : > { %3042 = vst.msk [vmem:[%s6451_s21 + $0x94] sm:$0xf] %vm3003_vm7, %v5369_v11  ;;  %3044 = vst.msk [vmem:[%s6451_s21 + $0x9c] sm:$0xf] %vm3003_vm7, %v5369_v11 }
  0xd8   : > { %3045 = vst.msk [vmem:[%s6451_s21 + $0xa0] sm:$0xf] %vm3003_vm7, %v5369_v11  ;;  %3047 = vst.msk [vmem:[%s6451_s21 + $0xa8] sm:$0xf] %vm3003_vm7, %v5369_v11 }
  0xd9   : > { %3048 = vst.msk [vmem:[%s6451_s21 + $0xac] sm:$0xf] %vm3003_vm7, %v5369_v11  ;;  %3050 = vst.msk [vmem:[%s6451_s21 + $0xb4] sm:$0xf] %vm3003_vm7, %v5369_v11 }
  0xda   : > { %3051 = vst.msk [vmem:[%s6451_s21 + $0xb8] sm:$0xf] %vm3003_vm7, %v5369_v11  ;;  %3053 = vst.msk [vmem:[%s6451_s21 + $0xc0] sm:$0xf] %vm3003_vm7, %v5369_v11 }
  0xdb   : > { %3054 = vst.msk [vmem:[%s6451_s21 + $0xc4] sm:$0xf] %vm3003_vm7, %v5369_v11  ;;  %3056 = vst.msk [vmem:[%s6451_s21 + $0xcc] sm:$0xf] %vm3003_vm7, %v5369_v11 }
  0xdc   : > { %4709 = vmatmul.mubr.msk.bf16.vlgmr.msra.gmra.mrb[0].mxu0 %vm753_vm2, %v6109_v7  ;;  %3057 = vst.msk [vmem:[%s6451_s21 + $0xd0] sm:$0xf] %vm3003_vm7, %v5369_v11  ;;  %vm6592_vm13 = vmand %vm3003_vm7, %vm3480_vm10 }
  0xdd   : > { %4555 = vmatmul.mubr.msk.bf16.gmra.mrb[16].mxu1 %vm753_vm2, %v6116_v46  ;;  %4741 = vmatpush3.bf16.msra.mxu0 %v7233_v36  ;;  %v2569_v36 = vshrl.u32 %v6299_v43, 16  ;;  %3013 = vst.msk [vmem:[%s6451_s21 + $0x20] sm:$0x1] %vm3006_vm8, %v5369_v11  ;;  %3007 = vst.msk [vmem:[%s6451_s21 + $0x8] sm:$0x1] %vm3006_vm8, %v5369_v11 }
  0xde   : > { %4558 = vmatprep.mubr.msk.bf16.mxu1 %vm753_vm2, %v6120_v14  ;;  %4712 = vmatprep.mubr.msk.bf16.mxu0 %vm753_vm2, %v6153_v28  ;;  %3010 = vst.msk [vmem:[%s6451_s21 + $0x14] sm:$0x1] %vm3006_vm8, %v5369_v11  ;;  %3016 = vst.msk [vmem:[%s6451_s21 + $0x2c] sm:$0x1] %vm3006_vm8, %v5369_v11 }
  0xdf   : > { %4774 = vmatprep.subr.bf16.mxu0 %v5170_v27  ;;  %v2571_v40 = vrot.slane %v2569_v36, 4  ;;  %3019 = vst.msk [vmem:[%s6451_s21 + $0x38] sm:$0x1] %vm3006_vm8, %v5369_v11  ;;  %3022 = vst.msk [vmem:[%s6451_s21 + $0x44] sm:$0x1] %vm3006_vm8, %v5369_v11 }
  0xe0   : > { %3025 = vst.msk [vmem:[%s6451_s21 + $0x50] sm:$0x1] %vm3006_vm8, %v5369_v11  ;;  %3028 = vst.msk [vmem:[%s6451_s21 + $0x5c] sm:$0x1] %vm3006_vm8, %v5369_v11 }
  0xe1   : > { %v2572_v1 = vor.u32 %v2571_v40, %v2567_v63  ;;  %3031 = vst.msk [vmem:[%s6451_s21 + $0x68] sm:$0x1] %vm3006_vm8, %v5369_v11  ;;  %3034 = vst.msk [vmem:[%s6451_s21 + $0x74] sm:$0x1] %vm3006_vm8, %v5369_v11 }
  0xe2   : > { %3037 = vst.msk [vmem:[%s6451_s21 + $0x80] sm:$0x1] %vm3006_vm8, %v5369_v11  ;;  %3040 = vst.msk [vmem:[%s6451_s21 + $0x8c] sm:$0x1] %vm3006_vm8, %v5369_v11 }
  0xe3   : > { %3043 = vst.msk [vmem:[%s6451_s21 + $0x98] sm:$0x1] %vm3006_vm8, %v5369_v11  ;;  %3046 = vst.msk [vmem:[%s6451_s21 + $0xa4] sm:$0x1] %vm3006_vm8, %v5369_v11 }
  0xe4   : > { %4713 = vmatmul.mubr.msk.bf16.gmra.mrb[4].mxu0 %vm753_vm2, %v6178_v9  ;;  %3049 = vst.msk [vmem:[%s6451_s21 + $0xb0] sm:$0x1] %vm3006_vm8, %v5369_v11  ;;  %3052 = vst.msk [vmem:[%s6451_s21 + $0xbc] sm:$0x1] %vm3006_vm8, %v5369_v11 }
  0xe5   : > { %4559 = vmatmul.mubr.msk.bf16.gmra.mrb[20].mxu1 %vm753_vm2, %v6124_v22  ;;  %4716 = vmatprep.mubr.msk.bf16.mxu0 %vm753_vm2, %v6191_v34  ;;  %3055 = vst.msk [vmem:[%s6451_s21 + $0xc8] sm:$0x1] %vm3006_vm8, %v5369_v11  ;;  %3058 = vst.msk [vmem:[%s6451_s21 + $0xd4] sm:$0x1] %vm3006_vm8, %v5369_v11 }
  0xe6   : > { %4562 = vmatprep.mubr.msk.bf16.mxu1 %vm753_vm2, %v6128_v49  ;;  %vm6601_vm14 = vmor %vm3155_vm11, %vm3156_vm12 }
  0xe7   : > { %vm6607_vm15 = vmand %vm3006_vm8, %vm3155_vm11 }
  0xec   : > { %4717 = vmatmul.mubr.msk.bf16.gmra.mrb[8].mxu0 %vm753_vm2, %v6209_v10 }
  0xed   : > { %4563 = vmatmul.mubr.msk.bf16.gmra.mrb[24].mxu1 %vm753_vm2, %v6137_v50  ;;  %4720 = vmatprep.mubr.msk.bf16.mxu0 %vm753_vm2, %v6217_v8 }
  0xee   : > { %4566 = vmatprep.mubr.msk.bf16.mxu1 %vm753_vm2, %v6145_v45 }
  0xf4   : > { %4721 = vmatmul.mubr.msk.bf16.gmra.mrb[12].mxu0 %vm753_vm2, %v6116_v46 }
  0xf5   : > { %4567 = vmatmul.mubr.msk.bf16.gmra.mrb[28].mxu1 %vm753_vm2, %v6149_v48  ;;  %4724 = vmatprep.mubr.msk.bf16.mxu0 %vm753_vm2, %v6120_v14 }
  0xf6   : > { %4572 = vmatprep.mubr.msk.bf16.mxu1 %vm753_vm2, %v4055_v41  ;;  %v2573_v41 = vrot.slane %v2572_v1, 4 }
  0xfc   : > { %4725 = vmatmul.mubr.msk.bf16.gmra.mrb[16].mxu0 %vm753_vm2, %v6124_v22 }
  0xfd   : > { %4573 = vmatmul.mubr.msk.bf16.vlgmr.msra.gmra.mrb[0].mxu1 %vm753_vm2, %v7234_v15  ;;  %4728 = vmatprep.mubr.msk.bf16.mxu0 %vm753_vm2, %v6128_v49  ;;  %v2577_v15 = vrot.slane %v2575_v32, 5 }
  0xfe   : > { %4605 = vmatpush3.bf16.msra.mxu1 %v6091_v21  ;;  %4576 = vmatprep.mubr.msk.bf16.mxu1 %vm753_vm2, %v7235_v56  ;;  %v6287_v21 = vcombine.low %v6171_v23, %v6141_v12  ;;  %v4143_v12 = vcombine.low %v6296_v47, %v6299_v43  ;;  %v7240_v23 = vld [vmem:[#allocation15_spill] sm:$0xff] }
  0xff   : > { %4808 = vmatprep.subr.bf16.mxu1 %v5174_v33 }
 0x104   : > { %4729 = vmatmul.mubr.msk.bf16.gmra.mrb[20].mxu0 %vm753_vm2, %v6137_v50 }
 0x105   : > { %4577 = vmatmul.mubr.msk.bf16.gmra.mrb[4].mxu1 %vm753_vm2, %v7236_v24  ;;  %4732 = vmatprep.mubr.msk.bf16.mxu0 %vm753_vm2, %v6145_v45 }
 0x106   : > { %4580 = vmatprep.mubr.msk.bf16.mxu1 %vm753_vm2, %v7237_v17 }
 0x10c   : > { %4733 = vmatmul.mubr.msk.bf16.gmra.mrb[24].mxu0 %vm753_vm2, %v6149_v48 }
 0x10d   : > { %4581 = vmatmul.mubr.msk.bf16.gmra.mrb[8].mxu1 %vm753_vm2, %v7238_v42  ;;  %4736 = vmatprep.mubr.msk.bf16.mxu0 %vm753_vm2, %v6287_v21 }
 0x10e   : > { %4584 = vmatprep.mubr.msk.bf16.mxu1 %vm753_vm2, %v7239_v58 }
 0x114   : > { %4737 = vmatmul.mubr.msk.bf16.gmra.mrb[28].mxu0 %vm753_vm2, %v4143_v12 }
 0x115   : > { %4585 = vmatmul.mubr.msk.bf16.gmra.mrb[12].mxu1 %vm753_vm2, %v6019_v38  ;;  %4742 = vmatprep.mubr.msk.bf16.mxu0 %vm753_vm2, %v7240_v23 }
 0x116   : > { %4588 = vmatprep.mubr.msk.bf16.mxu1 %vm753_vm2, %v6046_v3 }
 0x11c   : > { %4743 = vmatmul.mubr.msk.bf16.vlgmr.msra.gmra.mrb[0].mxu0 %vm753_vm2, %v7241_v39 }
 0x11d   : > { %4589 = vmatmul.mubr.msk.bf16.gmra.mrb[16].mxu1 %vm753_vm2, %v6053_v5  ;;  %4775 = vmatpush3.bf16.msra.mxu0 %v5170_v27  ;;  %v2559_v27 = vshll.u32 %v6296_v47, 16 }
 0x11e   : > { %4592 = vmatprep.mubr.msk.bf16.mxu1 %vm753_vm2, %v6074_v55  ;;  %4746 = vmatprep.mubr.msk.bf16.mxu0 %vm753_vm2, %v7242_v53 }
 0x11f   : > { %v2561_v37 = vrot.slane %v2559_v27, 5 }
 0x124   : > { %4747 = vmatmul.mubr.msk.bf16.gmra.mrb[4].mxu0 %vm753_vm2, %v7243_v4 }
 0x125   : > { %4593 = vmatmul.mubr.msk.bf16.gmra.mrb[20].mxu1 %vm753_vm2, %v6078_v0  ;;  %4750 = vmatprep.mubr.msk.bf16.mxu0 %vm753_vm2, %v7244_v31 }
 0x126   : > { %4596 = vmatprep.mubr.msk.bf16.mxu1 %vm753_vm2, %v6111_v57 }
 0x12c   : > { %4751 = vmatmul.mubr.msk.bf16.gmra.mrb[8].mxu0 %vm753_vm2, %v7245_v2 }
 0x12d   : > { %4597 = vmatmul.mubr.msk.bf16.gmra.mrb[24].mxu1 %vm753_vm2, %v6131_v54  ;;  %4754 = vmatprep.mubr.msk.bf16.mxu0 %vm753_vm2, %v7246_v30 }
 0x12e   : > { %4600 = vmatprep.mubr.msk.bf16.mxu1 %vm753_vm2, %v6180_v59 }
 0x134   : > { %4755 = vmatmul.mubr.msk.bf16.gmra.mrb[12].mxu0 %vm753_vm2, %v7247_v35 }
 0x135   : > { %4601 = vmatmul.mubr.msk.bf16.gmra.mrb[28].mxu1 %vm753_vm2, %v6182_v16  ;;  %4758 = vmatprep.mubr.msk.bf16.mxu0 %vm753_vm2, %v7248_v44 }
 0x136   : > { %4606 = vmatprep.mubr.msk.bf16.mxu1 %vm753_vm2, %v5595_v29  ;;  %v2558_v29 = vrot.slane %v2556_v62, 4 }
 0x13c   : > { %4759 = vmatmul.mubr.msk.bf16.gmra.mrb[16].mxu0 %vm753_vm2, %v7249_v51 }
 0x13d   : > { %4607 = vmatmul.mubr.msk.bf16.vlgmr.msra.gmra.mrb[0].mxu1 %vm753_vm2, %v6084_v26  ;;  %4762 = vmatprep.mubr.msk.bf16.mxu0 %vm753_vm2, %v7250_v60  ;;  %v2562_v26 = vor.u32 %v2561_v37, %v2558_v29  ;;  %v4235_v37 = vld [vmem:[%s6451_s21 + $0x18] sm:$0xf] }
 0x13e   : > { %4809 = vmatpush3.bf16.msra.mxu1 %v5174_v33  ;;  %4610 = vmatprep.mubr.msk.bf16.mxu1 %vm753_vm2, %v6109_v7  ;;  %v2578_v33 = vsel %vm5587_vm3, %v2573_v41, %v2577_v15 }
 0x13f   : > { %v2563_v7 = vrot.slane %v2562_v26, 4 }
 0x144   : > { %4763 = vmatmul.mubr.msk.bf16.gmra.mrb[20].mxu0 %vm753_vm2, %v7251_v13 }
 0x145   : > { %4611 = vmatmul.mubr.msk.bf16.gmra.mrb[4].mxu1 %vm753_vm2, %v6153_v28  ;;  %4766 = vmatprep.mubr.msk.bf16.mxu0 %vm753_vm2, %v6017_v19  ;;  %v2568_v28 = vsel %vm5587_vm3, %v2563_v7, %v2567_v63  ;;  %v4230_v7 = vld [vmem:[%s6451_s21 + $0xc] sm:$0xf] }
 0x146   : > { %4614 = vmatprep.mubr.msk.bf16.mxu1 %vm753_vm2, %v6178_v9  ;;  %v4161_v9 = vcombine.low %v2568_v28, %v2578_v33 }
 0x14c   : > { %4767 = vmatmul.mubr.msk.bf16.gmra.mrb[24].mxu0 %vm753_vm2, %v6051_v18 }
 0x14d   : > { %4615 = vmatmul.mubr.msk.bf16.gmra.mrb[8].mxu1 %vm753_vm2, %v6191_v34  ;;  %4770 = vmatprep.mubr.msk.bf16.mxu0 %vm753_vm2, %v6219_v52 }
 0x14e   : > { %4618 = vmatprep.mubr.msk.bf16.mxu1 %vm753_vm2, %v6209_v10 }
 0x154   : > { %4771 = vmatmul.mubr.msk.bf16.gmra.mrb[28].mxu0 %vm753_vm2, %v4161_v9 }
 0x155   : > { %4619 = vmatmul.mubr.msk.bf16.gmra.mrb[12].mxu1 %vm753_vm2, %v6217_v8  ;;  %4776 = vmatprep.mubr.msk.bf16.mxu0 %vm753_vm2, %v7235_v56 }
 0x156   : > { %4622 = vmatprep.mubr.msk.bf16.mxu1 %vm753_vm2, %v6116_v46 }
 0x15c   : > { %4777 = vmatmul.mubr.msk.bf16.vlgmr.msra.gmra.mrb[0].mxu0 %vm753_vm2, %v7236_v24 }
 0x15d   : > { %4623 = vmatmul.mubr.msk.bf16.gmra.mrb[16].mxu1 %vm753_vm2, %v6120_v14  ;;  %4780 = vmatprep.mubr.msk.bf16.mxu0 %vm753_vm2, %v7237_v17 }
 0x15e   : > { %4626 = vmatprep.mubr.msk.bf16.mxu1 %vm753_vm2, %v6124_v22 }
 0x164   : > { %4781 = vmatmul.mubr.msk.bf16.gmra.mrb[4].mxu0 %vm753_vm2, %v7238_v42 }
 0x165   : > { %4627 = vmatmul.mubr.msk.bf16.gmra.mrb[20].mxu1 %vm753_vm2, %v6128_v49  ;;  %4784 = vmatprep.mubr.msk.bf16.mxu0 %vm753_vm2, %v7239_v58 }
 0x166   : > { %4630 = vmatprep.mubr.msk.bf16.mxu1 %vm753_vm2, %v6137_v50 }
 0x16c   : > { %4785 = vmatmul.mubr.msk.bf16.gmra.mrb[8].mxu0 %vm753_vm2, %v6019_v38  ;;  %v4179_v38 = vrot.slane %v6296_v47, 9 }
 0x16d   : > { %4631 = vmatmul.mubr.msk.bf16.gmra.mrb[24].mxu1 %vm753_vm2, %v6145_v45  ;;  %4788 = vmatprep.mubr.msk.bf16.mxu0 %vm753_vm2, %v6046_v3  ;;  %v2792_v3 = vrot.slane %v2790_v25, 4 }
 0x16e   : > { %4634 = vmatprep.mubr.msk.bf16.mxu1 %vm753_vm2, %v6149_v48 }
 0x174   : > { %4789 = vmatmul.mubr.msk.bf16.gmra.mrb[12].mxu0 %vm753_vm2, %v6053_v5  ;;  %v2793_v5 = vrot.slane %v306_v6, 5 }
 0x175   : > { %4635 = vmatmul.mubr.msk.bf16.gmra.mrb[28].mxu1 %vm753_vm2, %v6287_v21  ;;  %4792 = vmatprep.mubr.msk.bf16.mxu0 %vm753_vm2, %v6074_v55  ;;  %v2791_v55 = vsel %vm5774_vm6, %v4179_v38, %v2790_v25  ;;  %v4238_v38 = vld [vmem:[%s6451_s21 + $0x20] sm:$0x1] }
 0x176   : > { %4656 = vmatprep.mubr.msk.bf16.mxu1 %vm753_vm2, %v7247_v35 }
 0x17c   : > { %4793 = vmatmul.mubr.msk.bf16.gmra.mrb[16].mxu0 %vm753_vm2, %v6078_v0  ;;  %v2794_v0 = vsel %vm5774_vm6, %v2792_v3, %v2793_v5 }
 0x17d   : > { %4657 = vmatmul.mubr.msk.bf16.vlgmr.msra.gmra.mrb[16].mxu1 %vm753_vm2, %v7248_v44  ;;  %4796 = vmatprep.mubr.msk.bf16.mxu0 %vm753_vm2, %v6111_v57  ;;  %v4180_v57 = vcombine.low %v2791_v55, %v2794_v0 }
 0x17e   : > { %4660 = vmatprep.mubr.msk.bf16.mxu1 %vm753_vm2, %v7249_v51 }
 0x184   : > { %4797 = vmatmul.mubr.msk.bf16.gmra.mrb[20].mxu0 %vm753_vm2, %v6131_v54 }
 0x185   : > { %4661 = vmatmul.mubr.msk.bf16.gmra.mrb[20].mxu1 %vm753_vm2, %v7250_v60  ;;  %4800 = vmatprep.mubr.msk.bf16.mxu0 %vm753_vm2, %v6180_v59 }
 0x186   : > { %4664 = vmatprep.mubr.msk.bf16.mxu1 %vm753_vm2, %v7251_v13 }
 0x18c   : > { %4801 = vmatmul.mubr.msk.bf16.gmra.mrb[24].mxu0 %vm753_vm2, %v6182_v16 }
 0x18d   : > { %4665 = vmatmul.mubr.msk.bf16.gmra.mrb[24].mxu1 %vm753_vm2, %v6017_v19  ;;  %4804 = vmatprep.mubr.msk.bf16.mxu0 %vm753_vm2, %v6205_v61 }
 0x18e   : > { %4668 = vmatprep.mubr.msk.bf16.mxu1 %vm753_vm2, %v6051_v18 }
 0x194   : > { %4805 = vmatmul.mubr.msk.bf16.gmra.mrb[28].mxu0 %vm753_vm2, %v4180_v57 }
 0x195   : > { %4669 = vmatmul.mubr.msk.bf16.gmra.mrb[28].mxu1 %vm753_vm2, %v6219_v52 }
 0x210   : > { %v4608_v19 = vpop.f32.mrb[0].mxu1 }
 0x211   : > { %v1738_v18 = vpop.f32.mrb[1].mxu1 }
 0x212   : > { %v4609_v46 = vpop.f32.mrb[2].mxu1 }
 0x213   : > { %v1741_v14 = vpop.f32.mrb[3].mxu1 }
 0x218   : > { %v6561_v22 = vpop.f32.mrb[4].mxu1 }
 0x219   : > { %v6563_v49 = vpop.f32.mrb[5].mxu1 }
 0x21a   : > { %v6565_v54 = vpop.f32.mrb[6].mxu1 }
 0x21b   : > { %v6567_v50 = vpop.f32.mrb[7].mxu1 }
 0x220   : > { %v6569_v45 = vpop.f32.mrb[8].mxu1 }
 0x221   : > { %v6571_v48 = vpop.f32.mrb[9].mxu1 }
 0x222   : > { %v6573_v59 = vpop.f32.mrb[10].mxu1 }
 0x223   : > { %v6575_v16 = vpop.f32.mrb[11].mxu1 }
 0x228   : > { %v6577_v34 = vpop.f32.mrb[12].mxu1 }
 0x229   : > { %v6579_v61 = vpop.f32.mrb[13].mxu1 }
 0x22a   : > { %v6581_v10 = vpop.f32.mrb[14].mxu1 }
 0x22b   : > { %v6583_v8 = vpop.f32.mrb[15].mxu1 }
 0x22f   : > { %v4778_v52 = vpop.f32.mrb[0].mxu0 }
 0x230   : > { %v4810_v56 = vadd.f32 %v4778_v52, %v4608_v19  ;;  %v2844_v24 = vpop.f32.mrb[1].mxu0 }
 0x231   : > { %v4811_v17 = vadd.f32 %v2844_v24, %v1738_v18  ;;  %v4779_v21 = vpop.f32.mrb[2].mxu0 }
 0x232   : > { %v4319_v42 = vpack.c.bf16 %v4810_v56, %v4810_v56  ;;  %v3669_v47 = vmul.f32 %v4810_v56, %v4810_v56  ;;  %v4812_v43 = vadd.f32 %v4779_v21, %v4609_v46  ;;  %v2847_v58 = vpop.f32.mrb[3].mxu0  ;;  %v3600_v12 = vsel %vm3596_vm9, %v4810_v56, 0.0 }
 0x233   : > { %v4317_v23 = vpack.c.bf16 %v4811_v17, %v4811_v17  ;;  %v3667_v39 = vmul.f32 %v4811_v17, %v4811_v17  ;;  %v4813_v53 = vadd.f32 %v2847_v58, %v1741_v14  ;;  %v3597_v2 = vsel %vm3596_vm9, %v4811_v17, 0.0 }
 0x234   : > { %v3176_v4 = vshrl.u32 %v4319_v42, 16  ;;  %v3179_v31 = vshll.u32 %v4319_v42, 16  ;;  %v4320_v30 = vpack.c.bf16 %v4812_v43, %v4812_v43  ;;  %v3702_v35 = vsel %vm3596_vm9, %v3669_v47, 0.0  ;;  %v4233_v42 = vld [vmem:[%s6451_s21 + $0x14] sm:$0x1] }
 0x235   : > { %v3159_v44 = vshrl.u32 %v4317_v23, 16  ;;  %v3162_v51 = vshll.u32 %v4317_v23, 16  ;;  %v3699_v62 = vsel %vm3596_vm9, %v3667_v39, 0.0  ;;  %v3602_v60 = vsel %vm3596_vm9, %v4812_v43, 0.0 }
 0x236   : > { %v3178_v27 = vrot.slane %v3176_v4, 7  ;;  %v3184_v36 = vshrl.u32 %v4320_v30, 16  ;;  %v3670_v20 = vmul.f32 %v4812_v43, %v4812_v43  ;;  %v4318_v40 = vpack.c.bf16 %v4813_v53, %v4813_v53 }
 0x237   : > { %v3161_v63 = vrot.slane %v3159_v44, 7  ;;  %v3598_v6 = vsel %vm3596_vm9, %v4813_v53, 0.0  ;;  %v3668_v13 = vmul.f32 %v4813_v53, %v4813_v53  ;;  %v4782_v26 = vpop.f32.mrb[4].mxu0  ;;  %v3187_v28 = vshll.u32 %v4320_v30, 16 }
 0x238   : > { %v3181_v1 = vor.u32 %v3179_v31, %v3178_v27  ;;  %v3182_v32 = vrot.slane %v3178_v27, 4  ;;  %v3186_v15 = vrot.slane %v3184_v36, 7  ;;  %v2860_v33 = vpop.f32.mrb[5].mxu0  ;;  %v3704_v3 = vsel %vm3596_vm9, %v3670_v20, 0.0 }
 0x239   : > { %v3164_v9 = vor.u32 %v3162_v51, %v3161_v63  ;;  %v3167_v5 = vshrl.u32 %v4318_v40, 16  ;;  %v3170_v55 = vshll.u32 %v4318_v40, 16  ;;  %v4783_v0 = vpop.f32.mrb[6].mxu0  ;;  %v3599_v18 = vadd.f32 %v3598_v6, %v3597_v2 }
 0x23a   : > { %v3492_v57 = vsel %vm6592_vm13, %v3181_v1, %v4235_v37  ;;  %v3189_v11 = vor.u32 %v3187_v28, %v3186_v15  ;;  %v3191_v19 = vrot.slane %v3186_v15, 4  ;;  %v2863_v46 = vpop.f32.mrb[7].mxu0  ;;  %v3700_v56 = vsel %vm3596_vm9, %v3668_v13, 0.0  ;;  %v4245_v13 = vld [vmem:[%s6451_s21 + $0x30] sm:$0xf] }
 0x23b   : > { %4236 = vst [vmem:[%s6451_s21 + $0x18] sm:$0xf] %v3492_v57  ;;  %v3483_v14 = vsel %vm6592_vm13, %v3164_v9, %v4230_v7  ;;  %v3169_v52 = vrot.slane %v3167_v5, 7  ;;  %v4814_v24 = vadd.f32 %v4782_v26, %v6561_v22  ;;  %v3601_v47 = vadd.f32 %v3600_v12, %v3599_v18  ;;  %v4240_v57 = vld [vmem:[%s6451_s21 + $0x24] sm:$0xf] }
 0x23c   : > { %4231 = vst [vmem:[%s6451_s21 + $0xc] sm:$0xf] %v3483_v14  ;;  %v3190_v17 = vsel %vm6601_vm14, %v3182_v32, %v3189_v11  ;;  %v3496_v21 = vsel %vm6607_vm15, %v3191_v19, %v4238_v38  ;;  %v3701_v43 = vadd.f32 %v3700_v56, %v3699_v62  ;;  %v3165_v58 = vrot.slane %v3161_v63, 4 }
 0x23d   : > { %4237 = vst.msk [vmem:[%s6451_s21 + $0x1c] sm:$0xf] %vm3003_vm7, %v3190_v17  ;;  %4239 = vst [vmem:[%s6451_s21 + $0x20] sm:$0x1] %v3496_v21  ;;  %v3172_v23 = vor.u32 %v3170_v55, %v3169_v52  ;;  %v3174_v39 = vrot.slane %v3169_v52, 4  ;;  %v4323_v53 = vpack.c.bf16 %v4814_v24, %v4814_v24  ;;  %v3673_v4 = vmul.f32 %v4814_v24, %v4814_v24 }
 0x23e   : > { %v3703_v22 = vadd.f32 %v3702_v35, %v3701_v43  ;;  %v4815_v31 = vadd.f32 %v2860_v33, %v6563_v49  ;;  %v3603_v2 = vadd.f32 %v3602_v60, %v3601_v47  ;;  %v3608_v51 = vsel %vm3596_vm9, %v4814_v24, 0.0  ;;  %v4248_v43 = vld [vmem:[%s6451_s21 + $0x38] sm:$0x1] }
 0x23f   : > { %v3173_v30 = vsel %vm6601_vm14, %v3165_v58, %v3172_v23  ;;  %v3489_v12 = vsel %vm6607_vm15, %v3174_v39, %v4233_v42  ;;  %v3210_v44 = vshrl.u32 %v4323_v53, 16  ;;  %v4786_v62 = vpop.f32.mrb[8].mxu0  ;;  %v3213_v27 = vshll.u32 %v4323_v53, 16 }
 0x240   : > { %4232 = vst.msk [vmem:[%s6451_s21 + $0x10] sm:$0xf] %vm3003_vm7, %v3173_v30  ;;  %4234 = vst [vmem:[%s6451_s21 + $0x14] sm:$0x1] %v3489_v12  ;;  %v4321_v35 = vpack.c.bf16 %v4815_v31, %v4815_v31  ;;  %v3604_v36 = vsel %vm3596_vm9, %v4815_v31, 0.0  ;;  %v3671_v49 = vmul.f32 %v4815_v31, %v4815_v31  ;;  %v2876_v60 = vpop.f32.mrb[9].mxu0  ;;  %v3705_v63 = vadd.f32 %v3704_v3, %v3703_v22 }
 0x241   : > { %v3212_v20 = vrot.slane %v3210_v44, 7  ;;  %v3605_v37 = vadd.f32 %v3604_v36, %v3603_v2  ;;  %v4816_v40 = vadd.f32 %v4783_v0, %v6565_v54  ;;  %v6640_v6 = vpop.f32.mrb[10].mxu0  ;;  %v3710_v26 = vsel %vm3596_vm9, %v3673_v4, 0.0  ;;  %v4243_v31 = vld [vmem:[%s6451_s21 + $0x2c] sm:$0x1] }
 0x242   : > { %v3193_v1 = vshrl.u32 %v4321_v35, 16  ;;  %v3706_v32 = vsel %vm3596_vm9, %v3671_v49, 0.0  ;;  %v4817_v7 = vadd.f32 %v2863_v46, %v6567_v50  ;;  %v6646_v15 = vpop.f32.mrb[11].mxu0  ;;  %v3196_v33 = vshll.u32 %v4321_v35, 16 }
 0x243   : > { %v3215_v28 = vor.u32 %v3213_v27, %v3212_v20  ;;  %v3707_v9 = vadd.f32 %v3706_v32, %v3705_v63  ;;  %v4324_v38 = vpack.c.bf16 %v4816_v40, %v4816_v40  ;;  %v3216_v3 = vrot.slane %v3212_v20, 4 }
 0x244   : > { %v3195_v54 = vrot.slane %v3193_v1, 7  ;;  %v3610_v5 = vsel %vm3596_vm9, %v4816_v40, 0.0  ;;  %v4322_v55 = vpack.c.bf16 %v4817_v7, %v4817_v7  ;;  %v3674_v19 = vmul.f32 %v4816_v40, %v4816_v40 }
 0x245   : > { %v3506_v0 = vsel %vm6592_vm13, %v3215_v28, %v4245_v13  ;;  %v3218_v11 = vshrl.u32 %v4324_v38, 16  ;;  %v3606_v50 = vsel %vm3596_vm9, %v4817_v7, 0.0  ;;  %v3221_v14 = vshll.u32 %v4324_v38, 16  ;;  %v4255_v38 = vld [vmem:[%s6451_s21 + $0x48] sm:$0xf] }
 0x246   : > { %4246 = vst [vmem:[%s6451_s21 + $0x30] sm:$0xf] %v3506_v0  ;;  %v3198_v18 = vor.u32 %v3196_v33, %v3195_v54  ;;  %v3199_v46 = vrot.slane %v3195_v54, 4  ;;  %v3201_v52 = vshrl.u32 %v4322_v55, 16  ;;  %v3204_v24 = vshll.u32 %v4322_v55, 16 }
 0x247   : > { %v3220_v56 = vrot.slane %v3218_v11, 7  ;;  %v3607_v17 = vadd.f32 %v3606_v50, %v3605_v37  ;;  %v3672_v21 = vmul.f32 %v4817_v7, %v4817_v7  ;;  %v6654_v42 = vpop.f32.mrb[12].mxu0  ;;  %v4818_v23 = vadd.f32 %v4786_v62, %v6569_v45 }
 0x248   : > { %v3499_v47 = vsel %vm6592_vm13, %v3198_v18, %v4240_v57  ;;  %v3203_v58 = vrot.slane %v3201_v52, 7  ;;  %v4819_v39 = vadd.f32 %v2876_v60, %v6571_v48  ;;  %v6661_v53 = vpop.f32.mrb[13].mxu0  ;;  %v4820_v55 = vadd.f32 %v6640_v6, %v6573_v59 }
 0x249   : > { %4241 = vst [vmem:[%s6451_s21 + $0x24] sm:$0xf] %v3499_v47  ;;  %v3223_v22 = vor.u32 %v3221_v14, %v3220_v56  ;;  %v3225_v4 = vrot.slane %v3220_v56, 4  ;;  %v3609_v2 = vadd.f32 %v3608_v51, %v3607_v17  ;;  %v3708_v30 = vsel %vm3596_vm9, %v3672_v21, 0.0  ;;  %v6666_v12 = vpop.f32.mrb[14].mxu0 }
 0x24a   : > { %v3206_v44 = vor.u32 %v3204_v24, %v3203_v58  ;;  %v3208_v27 = vrot.slane %v3203_v58, 4  ;;  %v3709_v45 = vadd.f32 %v3708_v30, %v3707_v9  ;;  %v4327_v62 = vpack.c.bf16 %v4818_v23, %v4818_v23  ;;  %v6668_v48 = vpop.f32.mrb[15].mxu0  ;;  %v4250_v17 = vld [vmem:[%s6451_s21 + $0x3c] sm:$0xf] }
 0x24b   : > { %v3224_v35 = vsel %vm6601_vm14, %v3216_v3, %v3223_v22  ;;  %v3510_v36 = vsel %vm6607_vm15, %v3225_v4, %v4248_v43  ;;  %v3712_v51 = vsel %vm3596_vm9, %v3674_v19, 0.0  ;;  %v3677_v49 = vmul.f32 %v4818_v23, %v4818_v23 }
 0x24c   : > { %4247 = vst.msk [vmem:[%s6451_s21 + $0x34] sm:$0xf] %vm3003_vm7, %v3224_v35  ;;  %4249 = vst [vmem:[%s6451_s21 + $0x38] sm:$0x1] %v3510_v36  ;;  %v3207_v60 = vsel %vm6601_vm14, %v3199_v46, %v3206_v44  ;;  %v3503_v20 = vsel %vm6607_vm15, %v3208_v27, %v4243_v31  ;;  %v3711_v37 = vadd.f32 %v3710_v26, %v3709_v45  ;;  %v3244_v63 = vshrl.u32 %v4327_v62, 16 }
 0x24d   : > { %4242 = vst.msk [vmem:[%s6451_s21 + $0x28] sm:$0xf] %vm3003_vm7, %v3207_v60  ;;  %4244 = vst [vmem:[%s6451_s21 + $0x2c] sm:$0x1] %v3503_v20  ;;  %v3247_v40 = vshll.u32 %v4327_v62, 16  ;;  %v3616_v13 = vsel %vm3596_vm9, %v4818_v23, 0.0  ;;  %v4325_v1 = vpack.c.bf16 %v4819_v39, %v4819_v39  ;;  %v3611_v32 = vadd.f32 %v3610_v5, %v3609_v2 }
 0x24e   : > { %v6686_v7 = vrot.slane %v3244_v63, 7  ;;  %v3612_v28 = vsel %vm3596_vm9, %v4819_v39, 0.0  ;;  %v3675_v33 = vmul.f32 %v4819_v39, %v4819_v39  ;;  %v3713_v9 = vadd.f32 %v3712_v51, %v3711_v37  ;;  %v4258_v36 = vld [vmem:[%s6451_s21 + $0x50] sm:$0x1] }
 0x24f   : > { %v6691_v3 = vsel %vm3596_vm9, %v3677_v49, 0.0  ;;  %v3227_v26 = vshrl.u32 %v4325_v1, 16  ;;  %v3613_v54 = vadd.f32 %v3612_v28, %v3611_v32  ;;  %v6695_v0 = vpop.f32.mrb[16].mxu0  ;;  %v3230_v57 = vshll.u32 %v4325_v1, 16 }
 0x250   : > { %v3249_v5 = vor.u32 %v3247_v40, %v6686_v7  ;;  %v3714_v11 = vsel %vm3596_vm9, %v3675_v33, 0.0  ;;  %v4821_v19 = vadd.f32 %v6646_v15, %v6575_v16  ;;  %v6701_v50 = vpop.f32.mrb[16].mxu1  ;;  %v6703_v18 = vpop.f32.mrb[17].mxu0  ;;  %v3250_v46 = vrot.slane %v6686_v7, 4  ;;  %v4253_v40 = vld [vmem:[%s6451_s21 + $0x44] sm:$0x1] }
 0x251   : > { %v3229_v14 = vrot.slane %v3227_v26, 7  ;;  %v3715_v52 = vadd.f32 %v3714_v11, %v3713_v9  ;;  %v4328_v59 = vpack.c.bf16 %v4820_v55, %v4820_v55  ;;  %v6706_v6 = vpop.f32.mrb[17].mxu1  ;;  %v6708_v56 = vpop.f32.mrb[18].mxu0  ;;  %v3618_v16 = vsel %vm3596_vm9, %v4820_v55, 0.0 }
 0x252   : > { %v3520_v24 = vsel %vm6592_vm13, %v3249_v5, %v4255_v38  ;;  %v4326_v15 = vpack.c.bf16 %v4821_v19, %v4821_v19  ;;  %v3614_v21 = vsel %vm3596_vm9, %v4821_v19, 0.0  ;;  %v6715_v47 = vpop.f32.mrb[18].mxu1  ;;  %v6717_v43 = vpop.f32.mrb[19].mxu0  ;;  %v3678_v22 = vmul.f32 %v4820_v55, %v4820_v55 }
 0x253   : > { %4256 = vst [vmem:[%s6451_s21 + $0x48] sm:$0xf] %v3520_v24  ;;  %v3232_v58 = vor.u32 %v3230_v57, %v3229_v14  ;;  %v3233_v23 = vrot.slane %v3229_v14, 4  ;;  %v3252_v39 = vshrl.u32 %v4328_v59, 16  ;;  %v6720_v4 = vpop.f32.mrb[19].mxu1  ;;  %v3255_v31 = vshll.u32 %v4328_v59, 16 }
 0x254   : > { %v3235_v2 = vshrl.u32 %v4326_v15, 16  ;;  %v3238_v30 = vshll.u32 %v4326_v15, 16  ;;  %v3615_v44 = vadd.f32 %v3614_v21, %v3613_v54  ;;  %v3676_v62 = vmul.f32 %v4821_v19, %v4821_v19 }
 0x255   : > { %v3513_v27 = vsel %vm6592_vm13, %v3232_v58, %v4250_v17  ;;  %v3254_v45 = vrot.slane %v3252_v39, 7  ;;  %v4822_v35 = vadd.f32 %v6654_v42, %v6577_v34  ;;  %v4823_v60 = vadd.f32 %v6661_v53, %v6579_v61  ;;  %v4265_v17 = vld [vmem:[%s6451_s21 + $0x60] sm:$0xf] }
 0x256   : > { %4251 = vst [vmem:[%s6451_s21 + $0x3c] sm:$0xf] %v3513_v27  ;;  %v3237_v51 = vrot.slane %v3235_v2, 7  ;;  %v3617_v49 = vadd.f32 %v3616_v13, %v3615_v44  ;;  %v6732_v20 = vadd.f32 %v6666_v12, %v6581_v10  ;;  %v3716_v1 = vsel %vm3596_vm9, %v3676_v62, 0.0 }
 0x257   : > { %v3257_v37 = vor.u32 %v3255_v31, %v3254_v45  ;;  %v3259_v63 = vrot.slane %v3254_v45, 4  ;;  %v4331_v32 = vpack.c.bf16 %v4822_v35, %v4822_v35  ;;  %v6736_v34 = vpop.f32.mrb[20].mxu0  ;;  %v3720_v42 = vsel %vm3596_vm9, %v3678_v22, 0.0 }
 0x258   : > { %v3240_v13 = vor.u32 %v3238_v30, %v3237_v51  ;;  %v3242_v7 = vrot.slane %v3237_v51, 4  ;;  %v3717_v28 = vadd.f32 %v3716_v1, %v3715_v52  ;;  %v6739_v61 = vpop.f32.mrb[20].mxu1  ;;  %v6741_v10 = vpop.f32.mrb[21].mxu0  ;;  %v3681_v57 = vmul.f32 %v4822_v35, %v4822_v35 }
 0x259   : > { %v3258_v53 = vsel %vm6601_vm14, %v3250_v46, %v3257_v37  ;;  %v3524_v12 = vsel %vm6607_vm15, %v3259_v63, %v4258_v36  ;;  %v3278_v33 = vshrl.u32 %v4331_v32, 16  ;;  %v3281_v9 = vshll.u32 %v4331_v32, 16  ;;  %v6747_v38 = vpop.f32.mrb[21].mxu1  ;;  %v6749_v26 = vpop.f32.mrb[22].mxu0  ;;  %v4260_v36 = vld [vmem:[%s6451_s21 + $0x54] sm:$0xf] }
 0x25a   : > { %4257 = vst.msk [vmem:[%s6451_s21 + $0x4c] sm:$0xf] %vm3003_vm7, %v3258_v53  ;;  %4259 = vst [vmem:[%s6451_s21 + $0x50] sm:$0x1] %v3524_v12  ;;  %v3241_v54 = vsel %vm6601_vm14, %v3233_v23, %v3240_v13  ;;  %v3517_v55 = vsel %vm6607_vm15, %v3242_v7, %v4253_v40  ;;  %v3719_v5 = vadd.f32 %v6691_v3, %v3717_v28  ;;  %v6759_v11 = vpop.f32.mrb[22].mxu1  ;;  %v6761_v19 = vpop.f32.mrb[23].mxu0 }
 0x25b   : > { %4252 = vst.msk [vmem:[%s6451_s21 + $0x40] sm:$0xf] %vm3003_vm7, %v3241_v54  ;;  %4254 = vst [vmem:[%s6451_s21 + $0x44] sm:$0x1] %v3517_v55  ;;  %v3280_v46 = vrot.slane %v3278_v33, 7  ;;  %v4329_v14 = vpack.c.bf16 %v4823_v60, %v4823_v60  ;;  %v3619_v52 = vadd.f32 %v3618_v16, %v3617_v49  ;;  %v3620_v59 = vsel %vm3596_vm9, %v4823_v60, 0.0 }
 0x25c   : > { %v6767_v24 = vpop.f32.mrb[23].mxu1  ;;  %v3679_v15 = vmul.f32 %v4823_v60, %v4823_v60  ;;  %v3721_v3 = vadd.f32 %v3720_v42, %v3719_v5  ;;  %v4332_v21 = vpack.c.bf16 %v6732_v20, %v6732_v20  ;;  %v3624_v23 = vsel %vm3596_vm9, %v4822_v35, 0.0  ;;  %v4268_v32 = vld [vmem:[%s6451_s21 + $0x68] sm:$0x1] }
 0x25d   : > { %v3283_v58 = vor.u32 %v3281_v9, %v3280_v46  ;;  %v3261_v39 = vshrl.u32 %v4329_v14, 16  ;;  %v3726_v22 = vsel %vm3596_vm9, %v3681_v57, 0.0  ;;  %v3621_v31 = vadd.f32 %v3620_v59, %v3619_v52 }
 0x25e   : > { %v3722_v16 = vsel %vm3596_vm9, %v3679_v15, 0.0  ;;  %v3286_v2 = vshrl.u32 %v4332_v21, 16  ;;  %v3264_v27 = vshll.u32 %v4329_v14, 16  ;;  %v3289_v51 = vshll.u32 %v4332_v21, 16  ;;  %v4263_v21 = vld [vmem:[%s6451_s21 + $0x5c] sm:$0x1] }
 0x25f   : > { %v3534_v30 = vsel %vm6592_vm13, %v3283_v58, %v4265_v17  ;;  %v6777_v44 = vrot.slane %v3261_v39, 7  ;;  %v3723_v45 = vadd.f32 %v3722_v16, %v3721_v3  ;;  %v6779_v62 = vpop.f32.mrb[24].mxu0  ;;  %v4825_v49 = vadd.f32 %v6668_v48, %v6583_v8 }
 0x260   : > { %4266 = vst [vmem:[%s6451_s21 + $0x60] sm:$0xf] %v3534_v30  ;;  %v3288_v35 = vrot.slane %v3286_v2, 7  ;;  %v6787_v60 = vadd.f32 %v6695_v0, %v6701_v50  ;;  %v6789_v37 = vpop.f32.mrb[24].mxu1  ;;  %v6791_v63 = vpop.f32.mrb[25].mxu0  ;;  %v3284_v40 = vrot.slane %v3280_v46, 4  ;;  %v4827_v42 = vadd.f32 %v6703_v18, %v6706_v6 }
 0x261   : > { %v3266_v1 = vor.u32 %v3264_v27, %v6777_v44  ;;  %v6799_v13 = vadd.f32 %v6708_v56, %v6715_v47  ;;  %v6801_v8 = vpop.f32.mrb[25].mxu1  ;;  %v6803_v48 = vpop.f32.mrb[26].mxu0  ;;  %v3682_v7 = vmul.f32 %v6732_v20, %v6732_v20  ;;  %v4330_v28 = vpack.c.bf16 %v4825_v49, %v4825_v49  ;;  %v4275_v27 = vld [vmem:[%s6451_s21 + $0x78] sm:$0xf] }
 0x262   : > { %v3291_v0 = vor.u32 %v3289_v51, %v3288_v35  ;;  %v3293_v50 = vrot.slane %v3288_v35, 4  ;;  %v6807_v53 = vpop.f32.mrb[26].mxu1  ;;  %v6809_v12 = vpop.f32.mrb[27].mxu0  ;;  %v3622_v6 = vsel %vm3596_vm9, %v4825_v49, 0.0  ;;  %v3680_v56 = vmul.f32 %v4825_v49, %v4825_v49 }
 0x263   : > { %v3527_v18 = vsel %vm6592_vm13, %v3266_v1, %v4260_v36  ;;  %v4335_v47 = vpack.c.bf16 %v6787_v60, %v6787_v60  ;;  %v6816_v33 = vpop.f32.mrb[27].mxu1  ;;  %v3626_v55 = vsel %vm3596_vm9, %v6732_v20, 0.0  ;;  %v3269_v5 = vshrl.u32 %v4330_v28, 16 }
 0x264   : > { %4261 = vst [vmem:[%s6451_s21 + $0x54] sm:$0xf] %v3527_v18  ;;  %v3292_v9 = vsel %vm6601_vm14, %v3284_v40, %v3291_v0  ;;  %v3538_v54 = vsel %vm6607_vm15, %v3293_v50, %v4268_v32  ;;  %v3267_v57 = vrot.slane %v6777_v44, 4  ;;  %v3623_v46 = vadd.f32 %v3622_v6, %v3621_v31 }
 0x265   : > { %4267 = vst.msk [vmem:[%s6451_s21 + $0x64] sm:$0xf] %vm3003_vm7, %v3292_v9  ;;  %4269 = vst [vmem:[%s6451_s21 + $0x68] sm:$0x1] %v3538_v54  ;;  %v3724_v14 = vsel %vm3596_vm9, %v3680_v56, 0.0  ;;  %v3312_v52 = vshrl.u32 %v4335_v47, 16  ;;  %v4333_v16 = vpack.c.bf16 %v4827_v42, %v4827_v42  ;;  %v3685_v36 = vmul.f32 %v6787_v60, %v6787_v60 }
 0x266   : > { %v3728_v59 = vsel %vm3596_vm9, %v3682_v7, 0.0  ;;  %v3271_v17 = vrot.slane %v3269_v5, 7  ;;  %v3272_v15 = vshll.u32 %v4330_v28, 16  ;;  %v3725_v3 = vadd.f32 %v3724_v14, %v3723_v45  ;;  %v4270_v5 = vld [vmem:[%s6451_s21 + $0x6c] sm:$0xf] }
 0x267   : > { %v3625_v58 = vadd.f32 %v3624_v23, %v3623_v46  ;;  %v6832_v39 = vrot.slane %v3312_v52, 7  ;;  %v3315_v20 = vshll.u32 %v4335_v47, 16  ;;  %v6834_v2 = vpop.f32.mrb[28].mxu0  ;;  %v3295_v51 = vshrl.u32 %v4333_v16, 16 }
 0x268   : > { %v3274_v30 = vor.u32 %v3272_v15, %v3271_v17  ;;  %v3276_v44 = vrot.slane %v3271_v17, 4  ;;  %v3727_v31 = vadd.f32 %v3726_v22, %v3725_v3  ;;  %v6839_v35 = vpop.f32.mrb[28].mxu1  ;;  %v6841_v45 = vpop.f32.mrb[29].mxu0  ;;  %v3298_v49 = vshll.u32 %v4333_v16, 16 }
 0x269   : > { %v3317_v23 = vor.u32 %v3315_v20, %v6832_v39  ;;  %v3628_v40 = vsel %vm3596_vm9, %v4827_v42, 0.0  ;;  %v6845_v1 = vpop.f32.mrb[29].mxu1  ;;  %v6847_v22 = vpop.f32.mrb[30].mxu0  ;;  %v3627_v50 = vadd.f32 %v3626_v55, %v3625_v58  ;;  %v3683_v7 = vmul.f32 %v4827_v42, %v4827_v42 }
 0x26a   : > { %v3275_v32 = vsel %vm6601_vm14, %v3267_v57, %v3274_v30  ;;  %v3531_v0 = vsel %vm6607_vm15, %v3276_v44, %v4263_v21  ;;  %v6853_v28 = vpop.f32.mrb[30].mxu1  ;;  %v6855_v18 = vpop.f32.mrb[31].mxu0  ;;  %v3297_v56 = vrot.slane %v3295_v51, 7  ;;  %v3729_v47 = vadd.f32 %v3728_v59, %v3727_v31  ;;  %v4278_v30 = vld [vmem:[%s6451_s21 + $0x80] sm:$0x1] }
 0x26b   : > { %4262 = vst.msk [vmem:[%s6451_s21 + $0x58] sm:$0xf] %vm3003_vm7, %v3275_v32  ;;  %4264 = vst [vmem:[%s6451_s21 + $0x5c] sm:$0x1] %v3531_v0  ;;  %v3548_v6 = vsel %vm6592_vm13, %v3317_v23, %v4275_v27  ;;  %v4336_v9 = vpack.c.bf16 %v6799_v13, %v6799_v13  ;;  %v6864_v54 = vpop.f32.mrb[31].mxu1  ;;  %v3632_v42 = vsel %vm3596_vm9, %v6787_v60, 0.0  ;;  %v3629_v57 = vadd.f32 %v3628_v40, %v3627_v50 }
 0x26c   : > { %4276 = vst [vmem:[%s6451_s21 + $0x78] sm:$0xf] %v3548_v6  ;;  %v3734_v55 = vsel %vm3596_vm9, %v3685_v36, 0.0  ;;  %v3730_v46 = vsel %vm3596_vm9, %v3683_v7, 0.0  ;;  %v3318_v14 = vrot.slane %v6832_v39, 4  ;;  %v3300_v52 = vor.u32 %v3298_v49, %v3297_v56 }
 0x26d   : > { %v3731_v59 = vadd.f32 %v3730_v46, %v3729_v47  ;;  %v3320_v17 = vshrl.u32 %v4336_v9, 16  ;;  %v3323_v15 = vshll.u32 %v4336_v9, 16  ;;  %v3634_v3 = vsel %vm3596_vm9, %v6799_v13, 0.0  ;;  %v4273_v7 = vld [vmem:[%s6451_s21 + $0x74] sm:$0x1] }
 0x26e   : > { %v4829_v60 = vadd.f32 %v6717_v43, %v6720_v4  ;;  %v4830_v21 = vadd.f32 %v6736_v34, %v6739_v61  ;;  %v3541_v58 = vsel %vm6592_vm13, %v3300_v52, %v4270_v5  ;;  %v4831_v39 = vadd.f32 %v6741_v10, %v6747_v38 }
 0x26f   : > { %v3322_v20 = vrot.slane %v3320_v17, 7  ;;  %v6885_v16 = vadd.f32 %v6749_v26, %v6759_v11  ;;  %4271 = vst [vmem:[%s6451_s21 + $0x6c] sm:$0xf] %v3541_v58  ;;  %v3686_v27 = vmul.f32 %v6799_v13, %v6799_v13  ;;  %v3301_v38 = vrot.slane %v3297_v56, 4  ;;  %v4285_v56 = vld [vmem:[%s6451_s21 + $0x90] sm:$0xf] }
 0x270   : > { %v4334_v44 = vpack.c.bf16 %v4829_v60, %v4829_v60  ;;  %v3630_v43 = vsel %vm3596_vm9, %v4829_v60, 0.0  ;;  %v3684_v4 = vmul.f32 %v4829_v60, %v4829_v60  ;;  %v4339_v34 = vpack.c.bf16 %v4830_v21, %v4830_v21 }
 0x271   : > { %v3325_v61 = vor.u32 %v3323_v15, %v3322_v20  ;;  %v3327_v31 = vrot.slane %v3322_v20, 4  ;;  %v3631_v10 = vadd.f32 %v3630_v43, %v3629_v57  ;;  %v4337_v47 = vpack.c.bf16 %v4831_v39, %v4831_v39 }
 0x272   : > { %v3303_v26 = vshrl.u32 %v4334_v44, 16  ;;  %v3732_v11 = vsel %vm3596_vm9, %v3684_v4, 0.0  ;;  %v3346_v36 = vshrl.u32 %v4339_v34, 16  ;;  %v3306_v32 = vshll.u32 %v4334_v44, 16  ;;  %v4280_v4 = vld [vmem:[%s6451_s21 + $0x84] sm:$0xf] }
 0x273   : > { %v3326_v23 = vsel %vm6601_vm14, %v3318_v14, %v3325_v61  ;;  %v3552_v51 = vsel %vm6607_vm15, %v3327_v31, %v4278_v30  ;;  %v3633_v49 = vadd.f32 %v3632_v42, %v3631_v10  ;;  %v3733_v40 = vadd.f32 %v3732_v11, %v3731_v59 }
 0x274   : > { %4277 = vst.msk [vmem:[%s6451_s21 + $0x7c] sm:$0xf] %vm3003_vm7, %v3326_v23  ;;  %4279 = vst [vmem:[%s6451_s21 + $0x80] sm:$0x1] %v3552_v51  ;;  %v3305_v13 = vrot.slane %v3303_v26, 7  ;;  %v3348_v0 = vrot.slane %v3346_v36, 7  ;;  %v3689_v59 = vmul.f32 %v4830_v21, %v4830_v21  ;;  %v3687_v58 = vmul.f32 %v4831_v39, %v4831_v39 }
 0x275   : > { %v3349_v50 = vshll.u32 %v4339_v34, 16  ;;  %v3735_v6 = vadd.f32 %v3734_v55, %v3733_v40  ;;  %v3635_v9 = vadd.f32 %v3634_v3, %v3633_v49  ;;  %v3636_v5 = vsel %vm3596_vm9, %v4831_v39, 0.0 }
 0x276   : > { %v3736_v42 = vsel %vm3596_vm9, %v3686_v27, 0.0  ;;  %v3308_v57 = vor.u32 %v3306_v32, %v3305_v13  ;;  %v3310_v46 = vrot.slane %v3305_v13, 4  ;;  %v3640_v52 = vsel %vm3596_vm9, %v4830_v21, 0.0 }
 0x277   : > { %v3351_v14 = vor.u32 %v3349_v50, %v3348_v0  ;;  %v3329_v17 = vshrl.u32 %v4337_v47, 16  ;;  %v3637_v15 = vadd.f32 %v3636_v5, %v3635_v9  ;;  %v3332_v30 = vshll.u32 %v4337_v47, 16 }
 0x278   : > { %v3309_v55 = vsel %vm6601_vm14, %v3301_v38, %v3308_v57  ;;  %v3545_v3 = vsel %vm6607_vm15, %v3310_v46, %v4273_v7  ;;  %v3737_v44 = vadd.f32 %v3736_v42, %v3735_v6  ;;  %v4340_v21 = vpack.c.bf16 %v6885_v16, %v6885_v16  ;;  %v4283_v57 = vld [vmem:[%s6451_s21 + $0x8c] sm:$0x1] }
 0x279   : > { %v3562_v60 = vsel %vm6592_vm13, %v3351_v14, %v4285_v56  ;;  %4272 = vst.msk [vmem:[%s6451_s21 + $0x70] sm:$0xf] %vm3003_vm7, %v3309_v55  ;;  %4274 = vst [vmem:[%s6451_s21 + $0x74] sm:$0x1] %v3545_v3  ;;  %v3331_v20 = vrot.slane %v3329_v17, 7  ;;  %v3352_v43 = vrot.slane %v3348_v0, 4  ;;  %v4833_v61 = vadd.f32 %v6761_v19, %v6767_v24 }
 0x27a   : > { %4286 = vst [vmem:[%s6451_s21 + $0x90] sm:$0xf] %v3562_v60  ;;  %v3738_v34 = vsel %vm3596_vm9, %v3687_v58, 0.0  ;;  %v4834_v39 = vadd.f32 %v6779_v62, %v6789_v37  ;;  %v3742_v31 = vsel %vm3596_vm9, %v3689_v59, 0.0  ;;  %v3354_v38 = vshrl.u32 %v4340_v21, 16 }
 0x27b   : > { %v3334_v27 = vor.u32 %v3332_v30, %v3331_v20  ;;  %v3739_v10 = vadd.f32 %v3738_v34, %v3737_v44  ;;  %v3357_v26 = vshll.u32 %v4340_v21, 16  ;;  %v3642_v11 = vsel %vm3596_vm9, %v6885_v16, 0.0  ;;  %v4288_v62 = vld [vmem:[%s6451_s21 + $0x98] sm:$0x1]  ;;  %v4295_v3 = vld [vmem:[%s6451_s21 + $0xa8] sm:$0xf] }
 0x27c   : > { %v4338_v36 = vpack.c.bf16 %v4833_v61, %v4833_v61  ;;  %v3638_v23 = vsel %vm3596_vm9, %v4833_v61, 0.0  ;;  %v3356_v19 = vrot.slane %v3354_v38, 7  ;;  %v3688_v49 = vmul.f32 %v4833_v61, %v4833_v61 }
 0x27d   : > { %v3555_v51 = vsel %vm6592_vm13, %v3334_v27, %v4280_v4  ;;  %v3639_v24 = vadd.f32 %v3638_v23, %v3637_v15  ;;  %v3335_v40 = vrot.slane %v3331_v20, 4  ;;  %v3690_v37 = vmul.f32 %v6885_v16, %v6885_v16 }
 0x27e   : > { %4281 = vst [vmem:[%s6451_s21 + $0x84] sm:$0xf] %v3555_v51  ;;  %v3337_v13 = vshrl.u32 %v4338_v36, 16  ;;  %v4343_v32 = vpack.c.bf16 %v4834_v39, %v4834_v39  ;;  %v3359_v0 = vor.u32 %v3357_v26, %v3356_v19  ;;  %v3361_v50 = vrot.slane %v3356_v19, 4  ;;  %v4290_v51 = vld [vmem:[%s6451_s21 + $0x9c] sm:$0xf] }
 0x27f   : > { %v3641_v7 = vadd.f32 %v3640_v52, %v3639_v24  ;;  %v3740_v6 = vsel %vm3596_vm9, %v3688_v49, 0.0  ;;  %v3340_v47 = vshll.u32 %v4338_v36, 16  ;;  %v4835_v14 = vadd.f32 %v6791_v63, %v6801_v8 }
 0x280   : > { %v3339_v56 = vrot.slane %v3337_v13, 7  ;;  %v3741_v9 = vadd.f32 %v3740_v6, %v3739_v10  ;;  %v3380_v5 = vshrl.u32 %v4343_v32, 16  ;;  %v3360_v42 = vsel %vm6601_vm14, %v3352_v43, %v3359_v0 }
 0x281   : > { %v3566_v16 = vsel %vm6607_vm15, %v3361_v50, %v4288_v62  ;;  %v3383_v46 = vshll.u32 %v4343_v32, 16  ;;  %4287 = vst.msk [vmem:[%s6451_s21 + $0x94] sm:$0xf] %vm3003_vm7, %v3360_v42  ;;  %v3744_v55 = vsel %vm3596_vm9, %v3690_v37, 0.0  ;;  %v4341_v60 = vpack.c.bf16 %v4835_v14, %v4835_v14  ;;  %v4298_v50 = vld [vmem:[%s6451_s21 + $0xb0] sm:$0x1] }
 0x282   : > { %4289 = vst [vmem:[%s6451_s21 + $0x98] sm:$0x1] %v3566_v16  ;;  %v3342_v52 = vor.u32 %v3340_v47, %v3339_v56  ;;  %v3344_v59 = vrot.slane %v3339_v56, 4  ;;  %v3743_v17 = vadd.f32 %v3742_v31, %v3741_v9  ;;  %v3382_v15 = vrot.slane %v3380_v5, 7  ;;  %v4293_v42 = vld [vmem:[%s6451_s21 + $0xa4] sm:$0x1] }
 0x283   : > { %v3643_v58 = vadd.f32 %v3642_v11, %v3641_v7  ;;  %v3644_v20 = vsel %vm3596_vm9, %v4835_v14, 0.0  ;;  %v3693_v44 = vmul.f32 %v4834_v39, %v4834_v39  ;;  %v3363_v21 = vshrl.u32 %v4341_v60, 16 }
 0x284   : > { %v3343_v63 = vsel %vm6601_vm14, %v3335_v40, %v3342_v52  ;;  %v3559_v8 = vsel %vm6607_vm15, %v3344_v59, %v4283_v57  ;;  %v3385_v30 = vor.u32 %v3383_v46, %v3382_v15  ;;  %v3366_v43 = vshll.u32 %v4341_v60, 16 }
 0x285   : > { %4282 = vst.msk [vmem:[%s6451_s21 + $0x88] sm:$0xf] %vm3003_vm7, %v3343_v63  ;;  %4284 = vst [vmem:[%s6451_s21 + $0x8c] sm:$0x1] %v3559_v8  ;;  %v3645_v4 = vadd.f32 %v3644_v20, %v3643_v58  ;;  %v3691_v34 = vmul.f32 %v4835_v14, %v4835_v14  ;;  %v3745_v31 = vadd.f32 %v3744_v55, %v3743_v17  ;;  %v3365_v38 = vrot.slane %v3363_v21, 7 }
 0x286   : > { %v3576_v61 = vsel %vm6592_vm13, %v3385_v30, %v4295_v3  ;;  %v4836_v27 = vadd.f32 %v6803_v48, %v6807_v53  ;;  %v4837_v10 = vadd.f32 %v6809_v12, %v6816_v33  ;;  %v6964_v11 = vadd.f32 %v6834_v2, %v6839_v35  ;;  %v4305_v63 = vld [vmem:[%s6451_s21 + $0xc0] sm:$0xf] }
 0x287   : > { %4296 = vst [vmem:[%s6451_s21 + $0xa8] sm:$0xf] %v3576_v61  ;;  %v3746_v26 = vsel %vm3596_vm9, %v3691_v34, 0.0  ;;  %v4839_v36 = vadd.f32 %v6841_v45, %v6845_v1  ;;  %v3648_v23 = vsel %vm3596_vm9, %v4834_v39, 0.0  ;;  %v3750_v53 = vsel %vm3596_vm9, %v3693_v44, 0.0 }
 0x288   : > { %v3747_v19 = vadd.f32 %v3746_v26, %v3745_v31  ;;  %v4344_v48 = vpack.c.bf16 %v4836_v27, %v4836_v27  ;;  %v3368_v12 = vor.u32 %v3366_v43, %v3365_v38  ;;  %v4342_v33 = vpack.c.bf16 %v4837_v10, %v4837_v10 }
 0x289   : > { %v3646_v24 = vsel %vm3596_vm9, %v4837_v10, 0.0  ;;  %v3386_v49 = vrot.slane %v3382_v15, 4  ;;  %v3650_v2 = vsel %vm3596_vm9, %v4836_v27, 0.0  ;;  %v3694_v1 = vmul.f32 %v4836_v27, %v4836_v27 }
 0x28a   : > { %v3388_v40 = vshrl.u32 %v4344_v48, 16  ;;  %v3647_v35 = vadd.f32 %v3646_v24, %v3645_v4  ;;  %v3569_v45 = vsel %vm6592_vm13, %v3368_v12, %v4290_v51  ;;  %v3371_v39 = vshrl.u32 %v4342_v33, 16 }
 0x28b   : > { %v3692_v62 = vmul.f32 %v4837_v10, %v4837_v10  ;;  %4291 = vst [vmem:[%s6451_s21 + $0x9c] sm:$0xf] %v3569_v45  ;;  %v3391_v13 = vshll.u32 %v4344_v48, 16  ;;  %v4347_v0 = vpack.c.bf16 %v6964_v11, %v6964_v11  ;;  %v3374_v6 = vshll.u32 %v4342_v33, 16  ;;  %v4300_v10 = vld [vmem:[%s6451_s21 + $0xb4] sm:$0xf] }
 0x28c   : > { %v3390_v37 = vrot.slane %v3388_v40, 7  ;;  %v3649_v32 = vadd.f32 %v3648_v23, %v3647_v35  ;;  %v3373_v7 = vrot.slane %v3371_v39, 7  ;;  %v4345_v47 = vpack.c.bf16 %v4839_v36, %v4839_v36  ;;  %v4308_v45 = vld [vmem:[%s6451_s21 + $0xc8] sm:$0x1] }
 0x28d   : > { %v3748_v56 = vsel %vm3596_vm9, %v3692_v62, 0.0  ;;  %v3414_v57 = vshrl.u32 %v4347_v0, 16  ;;  %v3369_v46 = vrot.slane %v3365_v38, 4  ;;  %v3417_v59 = vshll.u32 %v4347_v0, 16 }
 0x28e   : > { %v3393_v9 = vor.u32 %v3391_v13, %v3390_v37  ;;  %v3395_v5 = vrot.slane %v3390_v37, 4  ;;  %v3749_v16 = vadd.f32 %v3748_v56, %v3747_v19  ;;  %v3376_v14 = vor.u32 %v3374_v6, %v3373_v7 }
 0x28f   : > { %v3378_v52 = vrot.slane %v3373_v7, 4  ;;  %v3416_v3 = vrot.slane %v3414_v57, 7  ;;  %v3752_v60 = vsel %vm3596_vm9, %v3694_v1, 0.0  ;;  %v3397_v8 = vshrl.u32 %v4345_v47, 16 }
 0x290   : > { %v3394_v17 = vsel %vm6601_vm14, %v3386_v49, %v3393_v9  ;;  %v3580_v15 = vsel %vm6607_vm15, %v3395_v5, %v4298_v50  ;;  %v3751_v55 = vadd.f32 %v3750_v53, %v3749_v16  ;;  %v3377_v58 = vsel %vm6601_vm14, %v3369_v46, %v3376_v14 }
 0x291   : > { %4297 = vst.msk [vmem:[%s6451_s21 + $0xac] sm:$0xf] %vm3003_vm7, %v3394_v17  ;;  %4299 = vst [vmem:[%s6451_s21 + $0xb0] sm:$0x1] %v3580_v15  ;;  %v3573_v20 = vsel %vm6607_vm15, %v3378_v52, %v4293_v42  ;;  %v3419_v30 = vor.u32 %v3417_v59, %v3416_v3  ;;  %v3400_v44 = vshll.u32 %v4345_v47, 16  ;;  %v3651_v21 = vadd.f32 %v3650_v2, %v3649_v32 }
 0x292   : > { %4292 = vst.msk [vmem:[%s6451_s21 + $0xa0] sm:$0xf] %vm3003_vm7, %v3377_v58  ;;  %4294 = vst [vmem:[%s6451_s21 + $0xa4] sm:$0x1] %v3573_v20  ;;  %v3652_v43 = vsel %vm3596_vm9, %v4839_v36, 0.0  ;;  %v3399_v4 = vrot.slane %v3397_v8, 7  ;;  %v3695_v34 = vmul.f32 %v4839_v36, %v4839_v36  ;;  %v3753_v61 = vadd.f32 %v3752_v60, %v3751_v55 }
 0x293   : > { %v4840_v31 = vadd.f32 %v6847_v22, %v6853_v28  ;;  %v3590_v27 = vsel %vm6592_vm13, %v3419_v30, %v4305_v63  ;;  %v3653_v38 = vadd.f32 %v3652_v43, %v3651_v21  ;;  %v4841_v26 = vadd.f32 %v6855_v18, %v6864_v54  ;;  %v4303_v32 = vld [vmem:[%s6451_s21 + $0xbc] sm:$0x1] }
 0x294   : > { %4306 = vst [vmem:[%s6451_s21 + $0xc0] sm:$0xf] %v3590_v27  ;;  %v3402_v23 = vor.u32 %v3400_v44, %v3399_v4  ;;  %v3754_v51 = vsel %vm3596_vm9, %v3695_v34, 0.0  ;;  %v3656_v22 = vsel %vm3596_vm9, %v6964_v11, 0.0  ;;  %v3420_v18 = vrot.slane %v3416_v3, 4 }
 0x295   : > { %v4348_v19 = vpack.c.bf16 %v4840_v31, %v4840_v31  ;;  %v3755_v36 = vadd.f32 %v3754_v51, %v3753_v61  ;;  %v4346_v48 = vpack.c.bf16 %v4841_v26, %v4841_v26  ;;  %v3654_v12 = vsel %vm3596_vm9, %v4841_v26, 0.0 }
 0x296   : > { %v3583_v28 = vsel %vm6592_vm13, %v3402_v23, %v4300_v10  ;;  %v3697_v54 = vmul.f32 %v6964_v11, %v6964_v11  ;;  %v3655_v24 = vadd.f32 %v3654_v12, %v3653_v38  ;;  %v3403_v49 = vrot.slane %v3399_v4, 4 }
 0x297   : > { %v3422_v53 = vshrl.u32 %v4348_v19, 16  ;;  %4301 = vst [vmem:[%s6451_s21 + $0xb4] sm:$0xf] %v3583_v28  ;;  %v3405_v33 = vshrl.u32 %v4346_v48, 16  ;;  %v3425_v2 = vshll.u32 %v4348_v19, 16  ;;  %v3696_v35 = vmul.f32 %v4841_v26, %v4841_v26 }
 0x298   : > { %v3658_v29 = vsel %vm3596_vm9, %v4840_v31, 0.0  ;;  %v3408_v39 = vshll.u32 %v4346_v48, 16  ;;  %v3657_v62 = vadd.f32 %v3656_v22, %v3655_v24  ;;  %v3698_v13 = vmul.f32 %v4840_v31, %v4840_v31 }
 0x299   : > { %v3424_v40 = vrot.slane %v3422_v53, 7  ;;  %v3407_v1 = vrot.slane %v3405_v33, 7  ;;  %v3756_v0 = vsel %vm3596_vm9, %v3696_v35, 0.0  ;;  %v3758_v47 = vsel %vm3596_vm9, %v3697_v54, 0.0 }
 0x29a   : > { %v3659_v6 = vadd.f32 %v3658_v29, %v3657_v62  ;;  %v3757_v56 = vadd.f32 %v3756_v0, %v3755_v36  ;;  %v3760_v14 = vsel %vm3596_vm9, %v3698_v13, 0.0 }
 0x29b   : > { %v3427_v37 = vor.u32 %v3425_v2, %v3424_v40  ;;  %v3429_v11 = vrot.slane %v3424_v40, 4  ;;  %v3410_v50 = vor.u32 %v3408_v39, %v3407_v1  ;;  %v3412_v7 = vrot.slane %v3407_v1, 4 }
 0x29c   : > { %v3660_v57 = vrot.slane %v3659_v6, 4  ;;  %v3759_v46 = vadd.f32 %v3758_v47, %v3757_v56 }
 0x29d   : > { %v3428_v9 = vsel %vm6601_vm14, %v3420_v18, %v3427_v37  ;;  %v3594_v5 = vsel %vm6607_vm15, %v3429_v11, %v4308_v45  ;;  %v3411_v42 = vsel %vm6601_vm14, %v3403_v49, %v3410_v50  ;;  %v3587_v16 = vsel %vm6607_vm15, %v3412_v7, %v4303_v32 }
 0x29e   : > { %4307 = vst.msk [vmem:[%s6451_s21 + $0xc4] sm:$0xf] %vm3003_vm7, %v3428_v9  ;;  %4309 = vst [vmem:[%s6451_s21 + $0xc8] sm:$0x1] %v3594_v5  ;;  %v3661_v52 = vadd.f32 %v3660_v57, %v3659_v6  ;;  %v3761_v59 = vadd.f32 %v3760_v14, %v3759_v46 }
 0x29f   : > { %4302 = vst.msk [vmem:[%s6451_s21 + $0xb8] sm:$0xf] %vm3003_vm7, %v3411_v42  ;;  %4304 = vst [vmem:[%s6451_s21 + $0xbc] sm:$0x1] %v3587_v16 }
 0x2a0   : > { %5246 = shalt.err (!%p5243_p7)
}
 0x2a1   : > { %s5247_s20 = scalar_lea.hbm %s7024_s10, 3456  ;;  %s5251_s7 = scalar_lea.hbm %s7163_s2, 6912 }
 0x2a2   : > { %p5248_p9 = scmp.ne.s32.totalorder %s7024_s10, %s5247_s20  ;;  %p5252_p5 = scmp.lt.u32.totalorder %s7024_s10, %s7163_s2 }
 0x2a3   : > { %p5253_p13 = scmp.lt.u32.totalorder %s5251_s7, %s5247_s20  ;;  %p5255_p4 = scmp.lt.u32.totalorder %s5247_s20, %s7024_s10 }
 0x2a4   : > { %p5249_p1 = pnand %p5248_p9, %p5488_p10 }
 0x2a5   : > { %p5254_p2 = por %p5253_p13, %p5252_p5 }
 0x2a6   : > { %p5250_p0 = pneg %p5249_p1 }
 0x2a7   : > { %p5256_p6 = por %p5255_p4, %p5254_p2 }
 0x2a9   : > { %p5257_p8 = pnand %p5256_p6, %p5250_p0 }
 0x2ab   : > { %5260 = shalt.err (!%p5257_p8)
}
 0x2ac   : > { %s5371_s12 = smov 64   ;;  %s5372_s8 = smov 4   ;;  %v3662_v41 = vrot.slane %v3661_v52, 2  ;;  %v3762_v25 = vrot.slane %v3761_v59, 4 }
 0x2ad   : > { %5076 = dma.vmem_to_hbm [thread:$0]  (%p5488_p10), %s7031_s11, 3456, %s7024_s10, %s3770_s25, %s5371_s12, %s5371_s12, %s5372_s8  }
 0x2ae   : > { %v3663_v17 = vadd.f32 %v3662_v41, %v3661_v52  ;;  %v3763_v15 = vadd.f32 %v3762_v25, %v3761_v59  ;;  %s3774_s28 = sand.u32 1, %s5421_s19   ;;  %s4313_s26 = sshll.u32 %s5421_s19, 7 }
 0x2af   : > { %s242_s5 = scalar_lea.vmem [#allocation8], %s3971_s13  ;;  %s7078_s6 = scalar_lea.hbm %s7164_s3, %s4313_s26 }
 0x2b0   : > { %s3810_s9 = sshll.u32 %s242_s5, 4  ;;  %v3764_v55 = vrot.slane %v3763_v15, 2  ;;  %v3664_v3 = vrot.slane %v3663_v17, 1  ;;  %s7084_s11 = scalar_lea.vmem [#allocation10], %s3971_s13  ;;  %s7080_s9 = int_to_ptr.vmem [resolvable:$true] %s3810_s9 }
 0x2b1   : > { %s3823_s10 = sshll.u32 %s7084_s11, 4  ;;  %s7088_s25 = scalar_lea.sflag [#allocation9], %s3774_s28  ;;  %s3824_s10 = int_to_ptr.vmem [resolvable:$true] %s3823_s10 }
 0x2b2   : > { %v3765_v60 = vadd.f32 %v3764_v55, %v3763_v15  ;;  %v3665_v58 = vadd.f32 %v3664_v3, %v3663_v17  ;;  %s5261_s7 = scalar_lea.vmem %s7080_s9, 128  ;;  %s5373_s21 = smov [#allocation8]  }
 0x2b3   : > { %p5262_p12 = scmp.ne.s32.totalorder %s7080_s9, %s5261_s7  ;;  %s5265_s23 = sshll.u32 %s5373_s21, 4  ;;  %s5266_s23 = int_to_ptr.vmem [resolvable:$false] %s5265_s23 }
 0x2b4   : > { %v3766_v20 = vrot.slane %v3765_v60, 1  ;;  %3666 = vst.msk [vmem:[%s242_s5] sm:$0xff] %vm3596_vm9, %v3665_v58  ;;  %s5267_s14 = scalar_lea.vmem %s5266_s23, 256  ;;  %p5268_p7 = scmp.lt.s32.totalorder %s7080_s9, %s5266_s23 }
 0x2b5   : > { %p5263_p11 = pnand %p5262_p12, %p5488_p10  ;;  %p5269_p9 = scmp.lt.s32.totalorder %s5267_s14, %s5261_s7 }
 0x2b7   : > { %p5264_p3 = pneg %p5263_p11  ;;  %p5270_p1 = por %p5269_p9, %p5268_p7 }
 0x2b9   : > { %p5271_p0 = pnand %p5270_p1, %p5264_p3 }
 0x2bb   : > { %5274 = shalt.err (!%p5271_p0)
}
 0x2bc   : > { %s5275_s13 = scalar_lea.hbm %s7078_s6, 128  ;;  %s5279_s28 = scalar_lea.hbm %s7164_s3, 256 }
 0x2bd   : > { %p5276_p5 = scmp.ne.s32.totalorder %s7078_s6, %s5275_s13  ;;  %p5280_p4 = scmp.lt.u32.totalorder %s7078_s6, %s7164_s3 }
 0x2be   : > { %p5281_p6 = scmp.lt.u32.totalorder %s5279_s28, %s5275_s13  ;;  %p5283_p12 = scmp.lt.u32.totalorder %s5275_s13, %s7078_s6 }
 0x2bf   : > { %p5277_p13 = pnand %p5276_p5, %p5488_p10 }
 0x2c0   : > { %p5282_p8 = por %p5281_p6, %p5280_p4 }
 0x2c1   : > { %p5278_p2 = pneg %p5277_p13 }
 0x2c2   : > { %p5284_p11 = por %p5283_p12, %p5282_p8 }
 0x2c4   : > { %p5285_p3 = pnand %p5284_p11, %p5278_p2 }
 0x2c6   : > { %5288 = shalt.err (!%p5285_p3)
}
 0x2c7   : > { %5077 = dma.vmem_to_hbm [thread:$0]  (%p5488_p10), %s7080_s9, 128, %s7078_s6, %s7088_s25   ;;  %v3767_v63 = vadd.f32 %v3766_v20, %v3765_v60 }
 0x2c8   : > { %s7117_s21 = scalar_lea.hbm %s7165_s4, %s4313_s26  ;;  %s5289_s23 = scalar_lea.vmem %s3824_s10, 128 }
 0x2c9   : > { %3768 = vst.msk [vmem:[%s7084_s11] sm:$0xff] %vm3596_vm9, %v3767_v63  ;;  %p5290_p7 = scmp.ne.s32.totalorder %s3824_s10, %s5289_s23  ;;  %s5374_s14 = smov [#allocation10]  }
 0x2ca   : > { %s5293_s13 = sshll.u32 %s5374_s14, 4  ;;  %s5294_s13 = int_to_ptr.vmem [resolvable:$false] %s5293_s13 }
 0x2cb   : > { %p5291_p9 = pnand %p5290_p7, %p5488_p10  ;;  %s5295_s9 = scalar_lea.vmem %s5294_s13, 256 }
 0x2cc   : > { %p5296_p0 = scmp.lt.s32.totalorder %s3824_s10, %s5294_s13  ;;  %p5297_p5 = scmp.lt.s32.totalorder %s5295_s9, %s5289_s23 }
 0x2cd   : > { %p5292_p1 = pneg %p5291_p9 }
 0x2ce   : > { %p5298_p13 = por %p5297_p5, %p5296_p0 }
 0x2d0   : > { %p5299_p2 = pnand %p5298_p13, %p5292_p1 }
 0x2d2   : > { %5302 = shalt.err (!%p5299_p2)
}
 0x2d3   : > { %s5303_s19 = scalar_lea.hbm %s7117_s21, 128  ;;  %s5307_s11 = scalar_lea.hbm %s7165_s4, 256 }
 0x2d4   : > { %p5304_p4 = scmp.ne.s32.totalorder %s7117_s21, %s5303_s19  ;;  %p5308_p12 = scmp.lt.u32.totalorder %s7117_s21, %s7165_s4 }
 0x2d5   : > { %p5309_p11 = scmp.lt.u32.totalorder %s5307_s11, %s5303_s19  ;;  %p5311_p7 = scmp.lt.u32.totalorder %s5303_s19, %s7117_s21 }
 0x2d6   : > { %p5305_p6 = pnand %p5304_p4, %p5488_p10 }
 0x2d7   : > { %p5310_p3 = por %p5309_p11, %p5308_p12 }
 0x2d8   : > { %p5306_p8 = pneg %p5305_p6 }
 0x2d9   : > { %p5312_p9 = por %p5311_p7, %p5310_p3 }
 0x2db   : > { %p5313_p1 = pnand %p5312_p9, %p5306_p8 }
 0x2dd   : > { %5316 = shalt.err (!%p5313_p1)
}
 0x2de   : > { %5078 = dma.vmem_to_hbm [thread:$0]  (%p5488_p10), %s3824_s10, 128, %s7117_s21, %s7088_s25  }
 0x2df PF: > { %s3835_s28 = sand.u32 1, %s5351_s15   ;;  %p7258_p0 = scmp.ne.s32.totalorder %s7200_s22, 0 }
 0x2e0   : > { %p7259_p5 = scmp.ge.s32.totalorder %s5363_s18, 2  ;;  %s3836_s5 = scalar_lea.sflag [#allocation4], %s3835_s28 }
 0x2e2   : > { %p5091_p13 = pnand %p7259_p5, %p7258_p0 }
 0x2e4   : > { %5342 = dma.done.wait (!%p5091_p13), %s3836_s5, 3456  }
 0x2e5   : > { %5344 = vsyncadd (!%p5091_p13), %s3836_s5, 4294963840  ;;  %s7260_s20 = sadd.s32 4294967294, %s5363_s18  }
 0x2e6   : > { %s3844_s24 = sand.u32 1, %s7260_s20  }
 0x2e7   : > { %s3845_s7 = scalar_lea.sflag [#allocation9], %s3844_s24 }
 0x2e8   : > { %5346 = dma.done.wait (!%p5091_p13), %s3845_s7, 256  }
 0x2e9   : > { %5348 = vsyncadd (!%p5091_p13), %s3845_s7, 4294967040  ;;  %p22_p10 = scmp.ge.s32.totalorder %s5456_s27, 4   ;;  %s7261_s15 = smov %s5355_s16 }
 0x2ea   : > { %s7262_s16 = smov %s5359_s17  ;;  %s7263_s17 = smov %s5484_s29 }
 0x2eb   : > { %s7264_s18 = smov %s5456_s27  ;;  %24 = sbr.rel (!%p22_p10) target bundleno = 8 (0x8), region = 118 }
 0x2f2   :  { %3859 = vsyncpa [#allocation3], 1 }
 0x2f3   :  { %3861 = vsyncpa [#allocation3 + $0x1], 1 }
 0x2f4   :  { %3862 = vsyncpa [#allocation6], 1 }
 0x2f5   :  { %3863 = vsyncpa [#allocation4], 1 }
 0x2f6   :  { %3865 = vsyncpa [#allocation4 + $0x1], 1 }
 0x2f7   :  { %3866 = vsyncpa [#allocation9], 1 }
 0x2f8   :  { %3868 = vsyncpa [#allocation9 + $0x1], 1 }

</bundles_post_ra>
